<compile_context>
chip_gen: v6e
topology: v6e:2x2x1
jax: 0.10.0
libtpu: 0.0.40
codegen_flags: <defaults>
</compile_context>

<pallas_src>
import functools

import jax
import jax.numpy as jnp
from jax.experimental import pallas as pl
from jax.experimental.pallas import tpu as pltpu

D_MODEL = 32
NHEAD = 4
HEAD_DIM = D_MODEL // NHEAD
SEQ = 8
BATCH = D_MODEL  # required: BatchNorm1d(d_model) sees the batch axis as channels
LN_EPS = 1e-5
BN_EPS = 1e-5
NEG_INF = -1e30


def transformer_block_kernel(
    x_ref,      # (S, Bb, D) f32   slice of the batch (Bb batch elements)
    wqkv_ref,   # (D, 3D)   bf16   in_proj_weight.T, 1/sqrt(hd) folded into Q cols
    bqkv_ref,   # (1, 3D)   f32    (same scale folded into the Q part)
    wo_ref,     # (NHEAD, hd, D) bf16   out_proj.weight.T split per head
    bo_ref,     # (1, D)    f32
    ln1w_ref,   # (1, D)    f32
    ln1b_ref,   # (1, D)    f32
    w12_ref,    # (D, 2D)   bf16   [linear1.weight.T | beta*linear2.weight.T]
    b12_ref,    # (1, 2D)   f32    [b1 | beta*b2]
    ln2w_ref,   # (1, D)    f32
    ln2b_ref,   # (1, D)    f32
    bnw_ref,    # (1, Bb, 1) f32   batch_norm weight (channel == batch element)
    bnb_ref,    # (1, Bb, 1) f32   batch_norm bias
    o_ref,      # (S, Bb, D) f32
):
    S, Bb, D = x_ref.shape
    hd = D // NHEAD
    M = S * Bb

    # Flatten (seq, batch) -> M rows; row = s * Bb + b.  Merging leading dims is
    # a free, layout-preserving reshape (lane dim D unchanged).
    x = x_ref[...].reshape(M, D)
    x_bf = x.astype(jnp.bfloat16)

    # ---- fused QKV projection: one (M, D) @ (D, 3D) bf16 matmul, f32 acc ----
    qkv = jnp.dot(x_bf, wqkv_ref[...], preferred_element_type=jnp.float32) + bqkv_ref[...]

    # ---- same-batch mask, built once and reused by every head ----
    # Rows mix batch elements; attention must stay within one batch element.
    # With row = s*Bb + b and Bb a power of two, the batch id is row & (Bb-1)
    # (no vector modulo).  Masked entries get -1e30 and vanish in the softmax.
    row_b = jax.lax.broadcasted_iota(jnp.int32, (M, M), 0) & (Bb - 1)
    col_b = jax.lax.broadcasted_iota(jnp.int32, (M, M), 1) & (Bb - 1)
    mask_bias = jnp.where(row_b == col_b, 0.0, NEG_INF).astype(jnp.float32)

    # ---- multi-head self-attention, all resident batch elements at once ----
    # Per-head out-projections are accumulated directly into one f32 (M, D)
    # value (MRB-friendly on v7x); no head concat / relayout.
    attn = jnp.zeros((M, D), jnp.float32)
    for h in range(NHEAD):
        qh = qkv[:, h * hd:(h + 1) * hd].astype(jnp.bfloat16)
        kh = qkv[:, D + h * hd:D + (h + 1) * hd].astype(jnp.bfloat16)
        vh = qkv[:, 2 * D + h * hd:2 * D + (h + 1) * hd].astype(jnp.bfloat16)
        s = jax.lax.dot_general(qh, kh, (((1,), (1,)), ((), ())),
                                preferred_element_type=jnp.float32)     # (M, M)
        s = s + mask_bias                       # 1/sqrt(hd) already folded into Wq
        s = s - jnp.max(s, axis=-1, keepdims=True)
        p = jnp.exp(s)
        p = p * pl.reciprocal(jnp.sum(p, axis=-1, keepdims=True), approx=True)
        ho = jnp.dot(p.astype(jnp.bfloat16), vh,
                     preferred_element_type=jnp.float32)                # (M, hd)
        attn = attn + jnp.dot(ho.astype(jnp.bfloat16), wo_ref[h],
                              preferred_element_type=jnp.float32)       # (M, D)
    attn = attn + bo_ref[...]

    # ---- LayerNorm 1 (over d_model), residual kept in f32 ----
    h1 = x + attn
    mu1 = jnp.mean(h1, axis=-1, keepdims=True)
    var1 = jnp.mean((h1 - mu1) ** 2, axis=-1, keepdims=True)
    h1 = (h1 - mu1) * jax.lax.rsqrt(var1 + LN_EPS) * ln1w_ref[...] + ln1b_ref[...]

    # ---- SwiGLU: single fused (M, D) @ (D, 2D) matmul; beta folded into gate ----
    ag = jnp.dot(h1.astype(jnp.bfloat16), w12_ref[...],
                 preferred_element_type=jnp.float32) + b12_ref[...]
    sw = ag[:, :D] * jax.nn.sigmoid(ag[:, D:])

    # ---- LayerNorm 2 ----
    h2 = h1 + sw
    mu2 = jnp.mean(h2, axis=-1, keepdims=True)
    var2 = jnp.mean((h2 - mu2) ** 2, axis=-1, keepdims=True)
    h2 = (h2 - mu2) * jax.lax.rsqrt(var2 + LN_EPS) * ln2w_ref[...] + ln2b_ref[...]

    # ---- BatchNorm1d after x.transpose(0, 2) ----
    # transpose(0,2) -> (d_model, batch, seq); channel axis = batch element, so
    # training-mode stats = biased mean/var over all (seq, d_model) entries per
    # batch element, and the outer transposes cancel -> normalize in place.
    # (Each BN channel lives entirely inside one grid program, so per-program
    # stats are exact.)
    h2 = h2.reshape(S, Bb, D)
    mu_b = jnp.mean(jnp.mean(h2, axis=2, keepdims=True), axis=0, keepdims=True)  # (1, Bb, 1)
    dev = h2 - mu_b
    var_b = jnp.mean(jnp.mean(dev * dev, axis=2, keepdims=True), axis=0, keepdims=True)
    o_ref[...] = dev * jax.lax.rsqrt(var_b + BN_EPS) * bnw_ref[...] + bnb_ref[...]


def prepare_params(params):
    """One-time weight prep (hoisted out of the per-call path, per review).

    - fuses the two SwiGLU projections into one (D, 2D) weight / (1, 2D) bias,
    - folds the SwiGLU beta into the gate half (removes SMEM operand + VPU mul),
    - folds the 1/sqrt(head_dim) attention scale into the Q projection,
    - splits out_proj.weight.T into per-head (NHEAD, hd, D) slices,
    - casts all matmul weights to bf16 (MXU-native on v5e/v6e/v7x).
    """
    D = D_MODEL
    hd = D // NHEAD
    scale = 1.0 / (hd ** 0.5)
    beta = params["beta"][0]

    qkv_scale = jnp.concatenate(
        [jnp.full((D,), scale, jnp.float32), jnp.ones((2 * D,), jnp.float32)])
    wqkv = params["wqkv_t"] * qkv_scale[None, :]
    bqkv = params["bqkv"] * qkv_scale[None, :]

    w12 = jnp.concatenate([params["w1_t"], params["w2_t"] * beta], axis=1)   # (D, 2D)
    b12 = jnp.concatenate([params["b1"], params["b2"] * beta], axis=1)       # (1, 2D)

    return {
        "wqkv": wqkv.astype(jnp.bfloat16),
        "bqkv": bqkv.astype(jnp.float32),
        "wo":   params["wo_t"].reshape(NHEAD, hd, D).astype(jnp.bfloat16),
        "bo":   params["bo"].astype(jnp.float32),
        "ln1w": params["ln1w"].astype(jnp.float32),
        "ln1b": params["ln1b"].astype(jnp.float32),
        "w12":  w12.astype(jnp.bfloat16),
        "b12":  b12.astype(jnp.float32),
        "ln2w": params["ln2w"].astype(jnp.float32),
        "ln2b": params["ln2b"].astype(jnp.float32),
        "bnw":  params["bnw"].reshape(1, -1, 1).astype(jnp.float32),
        "bnb":  params["bnb"].reshape(1, -1, 1).astype(jnp.float32),
    }


@functools.partial(jax.jit, static_argnames=("grid_b",))
def transformer_block_forward(x_sbd, prepped, grid_b=2):
    """x_sbd: (seq, batch, d_model) float32, batch must equal d_model.

    grid_b: number of "parallel" grid programs splitting the batch dim.
    2 keeps both v7x TensorCores busy; on single-TC v5e/v6e the extra serial
    step (~0.35 us) roughly cancels the halved masked-softmax width, so 2 is
    kept as the common default (measured trade, see review).
    """
    S, B, D = x_sbd.shape
    assert B == D, "PyTorch module requires batch == d_model (BatchNorm1d after transpose)"
    assert B % grid_b == 0
    Bb = B // grid_b
    assert Bb % 8 == 0, "per-program batch slice must be a multiple of 8 sublanes"
    assert (Bb & (Bb - 1)) == 0, "Bb must be a power of two for the bitwise batch mask"

    weights = [
        prepped["wqkv"], prepped["bqkv"], prepped["wo"], prepped["bo"],
        prepped["ln1w"], prepped["ln1b"], prepped["w12"], prepped["b12"],
        prepped["ln2w"], prepped["ln2b"],
    ]

    def full_spec(a):
        n = a.ndim
        return pl.BlockSpec(a.shape, lambda i, n=n: (0,) * n)

    in_specs = (
        [pl.BlockSpec((S, Bb, D), lambda i: (0, i, 0))]
        + [full_spec(a) for a in weights]
        + [pl.BlockSpec((1, Bb, 1), lambda i: (0, i, 0))] * 2
    )
    out_specs = pl.BlockSpec((S, Bb, D), lambda i: (0, i, 0))

    return pl.pallas_call(
        transformer_block_kernel,
        out_shape=jax.ShapeDtypeStruct((S, B, D), jnp.float32),
        grid=(grid_b,),
        in_specs=in_specs,
        out_specs=out_specs,
        # "parallel" lets megacore shard the batch programs on v7x; on v5e/v6e
        # it is a plain serial loop (near-zero codegen effect either way).
        compiler_params=pltpu.CompilerParams(dimension_semantics=("parallel",)),
    )(x_sbd, *weights, prepped["bnw"], prepped["bnb"])


def reference_forward(x, p):
    """Pure-JAX f32 reference mirroring the PyTorch forward (training mode, dropout=0)."""
    S, B, D = x.shape
    wqkv = p["wqkv_t"].T                                # (3D, D)
    qkv = jnp.einsum("sbd,ed->sbe", x, wqkv) + p["bqkv"].reshape(3 * D)
    q = qkv[..., :D].reshape(S, B, NHEAD, HEAD_DIM)
    k = qkv[..., D:2 * D].reshape(S, B, NHEAD, HEAD_DIM)
    v = qkv[..., 2 * D:].reshape(S, B, NHEAD, HEAD_DIM)
    scores = jnp.einsum("sbhd,tbhd->bhst", q, k) / (HEAD_DIM ** 0.5)
    attn_p = jax.nn.softmax(scores, axis=-1)
    attn = jnp.einsum("bhst,tbhd->sbhd", attn_p, v).reshape(S, B, D)
    attn = attn @ p["wo_t"] + p["bo"].reshape(D)

    def ln(z, w, b):
        mu = z.mean(-1, keepdims=True)
        var = ((z - mu) ** 2).mean(-1, keepdims=True)
        return (z - mu) / jnp.sqrt(var + LN_EPS) * w.reshape(D) + b.reshape(D)

    h = ln(x + attn, p["ln1w"], p["ln1b"])
    a = h @ p["w1_t"] + p["b1"].reshape(D)
    g = h @ p["w2_t"] + p["b2"].reshape(D)
    h2 = ln(h + a * jax.nn.sigmoid(p["beta"][0] * g), p["ln2w"], p["ln2b"])

    xt = jnp.transpose(h2, (2, 1, 0))                   # (D, B, S)
    mu = xt.mean(axis=(0, 2), keepdims=True)
    var = ((xt - mu) ** 2).mean(axis=(0, 2), keepdims=True)
    xt = (xt - mu) / jnp.sqrt(var + BN_EPS) * p["bnw"].reshape(1, B, 1) + p["bnb"].reshape(1, B, 1)
    return jnp.transpose(xt, (2, 1, 0))


def make_params(key, D, B):
    ks = jax.random.split(key, 16)

    def rnd(k, shape, scale):
        return (scale * jax.random.normal(k, shape)).astype(jnp.float32)

    return {
        "wqkv_t": rnd(ks[0], (3 * D, D), 0.1).T,        # (D, 3D)
        "bqkv":   rnd(ks[1], (1, 3 * D), 0.01),
        "wo_t":   rnd(ks[2], (D, D), 0.1).T,
        "bo":     rnd(ks[3], (1, D), 0.01),
        "ln1w":   jnp.ones((1, D), jnp.float32) + rnd(ks[4], (1, D), 0.01),
        "ln1b":   rnd(ks[5], (1, D), 0.01),
        "w1_t":   rnd(ks[6], (D, D), 0.1).T,
        "b1":     rnd(ks[7], (1, D), 0.01),
        "w2_t":   rnd(ks[8], (D, D), 0.1).T,
        "b2":     rnd(ks[9], (1, D), 0.01),
        "ln2w":   jnp.ones((1, D), jnp.float32) + rnd(ks[10], (1, D), 0.01),
        "ln2b":   rnd(ks[11], (1, D), 0.01),
        # SwiGLU beta (PyTorch init is 1.0; non-default value here exercises the fold)
        "beta":   jnp.full((1,), 1.25, jnp.float32),
        "bnw":    jnp.ones((B,), jnp.float32) + rnd(ks[12], (B,), 0.01),
        "bnb":    rnd(ks[13], (B,), 0.01),
    }


if __name__ == "__main__":
    key = jax.random.PRNGKey(0)
    pkey, xkey = jax.random.split(key)
    params = make_params(pkey, D_MODEL, BATCH)
    x = jax.random.normal(xkey, (SEQ, BATCH, D_MODEL), dtype=jnp.float32)

    prepped = prepare_params(params)                 # one-time weight prep
    out = transformer_block_forward(x, prepped)      # jitted wrapper
    out = jax.block_until_ready(out)

    ref = jax.block_until_ready(reference_forward(x, params))
    assert out.shape == (SEQ, BATCH, D_MODEL)
    max_err = float(jnp.max(jnp.abs(out - ref)))
    assert jnp.allclose(out, ref, atol=5e-2, rtol=5e-2), max_err
    print("KERNEL_OK")
</pallas_src>

<mosaic_0001>
module attributes {stable_mosaic.version = 11 : i64} {
  func.func @transformer_block_kernel(%arg0: i32, %arg1: memref<8x16x32xf32, #tpu.memory_space<vmem>>, %arg2: memref<32x96xbf16, #tpu.memory_space<vmem>>, %arg3: memref<1x96xf32, #tpu.memory_space<vmem>>, %arg4: memref<4x8x32xbf16, #tpu.memory_space<vmem>>, %arg5: memref<1x32xf32, #tpu.memory_space<vmem>>, %arg6: memref<1x32xf32, #tpu.memory_space<vmem>>, %arg7: memref<1x32xf32, #tpu.memory_space<vmem>>, %arg8: memref<32x64xbf16, #tpu.memory_space<vmem>>, %arg9: memref<1x64xf32, #tpu.memory_space<vmem>>, %arg10: memref<1x32xf32, #tpu.memory_space<vmem>>, %arg11: memref<1x32xf32, #tpu.memory_space<vmem>>, %arg12: memref<1x16x1xf32, #tpu.memory_space<vmem>>, %arg13: memref<1x16x1xf32, #tpu.memory_space<vmem>>, %arg14: memref<8x16x32xf32, #tpu.memory_space<vmem>>) attributes {dimension_semantics = [#tpu.dimension_semantics<parallel>], iteration_bounds = array<i64: 2>, scalar_prefetch = 0 : i64, scratch_operands = 0 : i64, tpu.core_type = #tpu.core_type<tc>, window_params = [{transform_indices = @transform_0, window_bounds = array<i64: 8, 16, 32>}, {pipeline_mode = #tpu.pipeline_mode<synchronous>, transform_indices = @transform_1, window_bounds = array<i64: 32, 96>}, {pipeline_mode = #tpu.pipeline_mode<synchronous>, transform_indices = @transform_2, window_bounds = array<i64: 1, 96>}, {pipeline_mode = #tpu.pipeline_mode<synchronous>, transform_indices = @transform_3, window_bounds = array<i64: 4, 8, 32>}, {pipeline_mode = #tpu.pipeline_mode<synchronous>, transform_indices = @transform_4, window_bounds = array<i64: 1, 32>}, {pipeline_mode = #tpu.pipeline_mode<synchronous>, transform_indices = @transform_5, window_bounds = array<i64: 1, 32>}, {pipeline_mode = #tpu.pipeline_mode<synchronous>, transform_indices = @transform_6, window_bounds = array<i64: 1, 32>}, {pipeline_mode = #tpu.pipeline_mode<synchronous>, transform_indices = @transform_7, window_bounds = array<i64: 32, 64>}, {pipeline_mode = #tpu.pipeline_mode<synchronous>, transform_indices = @transform_8, window_bounds = array<i64: 1, 64>}, {pipeline_mode = #tpu.pipeline_mode<synchronous>, transform_indices = @transform_9, window_bounds = array<i64: 1, 32>}, {pipeline_mode = #tpu.pipeline_mode<synchronous>, transform_indices = @transform_10, window_bounds = array<i64: 1, 32>}, {transform_indices = @transform_11, window_bounds = array<i64: 1, 16, 1>}, {transform_indices = @transform_12, window_bounds = array<i64: 1, 16, 1>}, {transform_indices = @transform_13, window_bounds = array<i64: 8, 16, 32>}]} {
    %c0 = arith.constant 0 : index
    %c0_0 = arith.constant 0 : index
    %c0_1 = arith.constant 0 : index
    %0 = vector.load %arg1[%c0, %c0_0, %c0_1] : memref<8x16x32xf32, #tpu.memory_space<vmem>>, vector<8x16x32xf32>
    %1 = vector.shape_cast %0 : vector<8x16x32xf32> to vector<128x32xf32>
    %2 = arith.truncf %1 : vector<128x32xf32> to vector<128x32xbf16>
    %c0_2 = arith.constant 0 : index
    %c0_3 = arith.constant 0 : index
    %3 = vector.load %arg2[%c0_2, %c0_3] : memref<32x96xbf16, #tpu.memory_space<vmem>>, vector<32x96xbf16>
    %cst = arith.constant dense<0.000000e+00> : vector<128x96xf32>
    %4 = tpu.matmul %2, %3, %cst {dimension_numbers = #tpu.dot_dimension_numbers<[1], [0], [0], [1], [0, 0, 1, 1], [], []>} : vector<128x32xbf16>, vector<32x96xbf16>, vector<128x96xf32> -> vector<128x96xf32>
    %c0_4 = arith.constant 0 : index
    %c0_5 = arith.constant 0 : index
    %5 = vector.load %arg3[%c0_4, %c0_5] : memref<1x96xf32, #tpu.memory_space<vmem>>, vector<1x96xf32>
    %6 = vector.broadcast %5 : vector<1x96xf32> to vector<128x96xf32>
    %7 = arith.addf %4, %6 : vector<128x96xf32>
    %8 = tpu.iota {dimensions = array<i32: 0>} : vector<128x128xi32>
    %c15_i32 = arith.constant 15 : i32
    %9 = vector.broadcast %c15_i32 : i32 to vector<128x128xi32>
    %10 = arith.andi %8, %9 : vector<128x128xi32>
    %11 = tpu.iota {dimensions = array<i32: 1>} : vector<128x128xi32>
    %c15_i32_6 = arith.constant 15 : i32
    %12 = vector.broadcast %c15_i32_6 : i32 to vector<128x128xi32>
    %13 = arith.andi %11, %12 : vector<128x128xi32>
    %14 = arith.cmpi eq, %10, %13 : vector<128x128xi32>
    %cst_7 = arith.constant 0.000000e+00 : f32
    %cst_8 = arith.constant -1.000000e+30 : f32
    %15 = vector.broadcast %cst_7 : f32 to vector<128x128xf32>
    %16 = vector.broadcast %cst_8 : f32 to vector<128x128xf32>
    %17 = arith.select %14, %15, %16 : vector<128x128xi1>, vector<128x128xf32>
    %cst_9 = arith.constant 0.000000e+00 : f32
    %18 = vector.broadcast %cst_9 : f32 to vector<128x32xf32>
    %19 = vector.extract_strided_slice %7 {offsets = [0, 0], sizes = [128, 8], strides = [1, 1]} : vector<128x96xf32> to vector<128x8xf32>
    %20 = arith.truncf %19 : vector<128x8xf32> to vector<128x8xbf16>
    %21 = vector.extract_strided_slice %7 {offsets = [0, 32], sizes = [128, 8], strides = [1, 1]} : vector<128x96xf32> to vector<128x8xf32>
    %22 = arith.truncf %21 : vector<128x8xf32> to vector<128x8xbf16>
    %23 = vector.extract_strided_slice %7 {offsets = [0, 64], sizes = [128, 8], strides = [1, 1]} : vector<128x96xf32> to vector<128x8xf32>
    %24 = arith.truncf %23 : vector<128x8xf32> to vector<128x8xbf16>
    %cst_10 = arith.constant dense<0.000000e+00> : vector<128x128xf32>
    %25 = tpu.matmul %20, %22, %cst_10 {dimension_numbers = #tpu.dot_dimension_numbers<[1], [1], [0], [0], [0, 0, 1, 0], [], []>} : vector<128x8xbf16>, vector<128x8xbf16>, vector<128x128xf32> -> vector<128x128xf32>
    %26 = arith.addf %25, %17 : vector<128x128xf32>
    %cst_11 = arith.constant dense<0xFF800000> : vector<128xf32>
    %27 = vector.multi_reduction <maximumf>, %26, %cst_11 [1] : vector<128x128xf32> to vector<128xf32>
    %28 = vector.shape_cast %27 : vector<128xf32> to vector<128x1xf32>
    %29 = vector.broadcast %28 : vector<128x1xf32> to vector<128x128xf32>
    %30 = arith.subf %26, %29 : vector<128x128xf32>
    %31 = math.exp %30 : vector<128x128xf32>
    %cst_12 = arith.constant dense<0.000000e+00> : vector<128xf32>
    %32 = vector.multi_reduction <add>, %31, %cst_12 [1] : vector<128x128xf32> to vector<128xf32>
    %33 = vector.shape_cast %32 : vector<128xf32> to vector<128x1xf32>
    %34 = tpu.reciprocal %33 {approx = true} : vector<128x1xf32> -> vector<128x1xf32>
    %35 = vector.broadcast %34 : vector<128x1xf32> to vector<128x128xf32>
    %36 = arith.mulf %31, %35 : vector<128x128xf32>
    %37 = arith.truncf %36 : vector<128x128xf32> to vector<128x128xbf16>
    %cst_13 = arith.constant dense<0.000000e+00> : vector<128x8xf32>
    %38 = tpu.matmul %37, %24, %cst_13 {dimension_numbers = #tpu.dot_dimension_numbers<[1], [0], [0], [1], [0, 0, 1, 1], [], []>} : vector<128x128xbf16>, vector<128x8xbf16>, vector<128x8xf32> -> vector<128x8xf32>
    %39 = arith.truncf %38 : vector<128x8xf32> to vector<128x8xbf16>
    %c0_14 = arith.constant 0 : index
    %c0_15 = arith.constant 0 : index
    %c0_16 = arith.constant 0 : index
    %40 = vector.load %arg4[%c0_14, %c0_15, %c0_16] : memref<4x8x32xbf16, #tpu.memory_space<vmem>>, vector<1x8x32xbf16>
    %41 = vector.shape_cast %40 : vector<1x8x32xbf16> to vector<8x32xbf16>
    %cst_17 = arith.constant dense<0.000000e+00> : vector<128x32xf32>
    %42 = tpu.matmul %39, %41, %cst_17 {dimension_numbers = #tpu.dot_dimension_numbers<[1], [0], [0], [1], [0, 0, 1, 1], [], []>} : vector<128x8xbf16>, vector<8x32xbf16>, vector<128x32xf32> -> vector<128x32xf32>
    %43 = arith.addf %18, %42 : vector<128x32xf32>
    %44 = vector.extract_strided_slice %7 {offsets = [0, 8], sizes = [128, 8], strides = [1, 1]} : vector<128x96xf32> to vector<128x8xf32>
    %45 = arith.truncf %44 : vector<128x8xf32> to vector<128x8xbf16>
    %46 = vector.extract_strided_slice %7 {offsets = [0, 40], sizes = [128, 8], strides = [1, 1]} : vector<128x96xf32> to vector<128x8xf32>
    %47 = arith.truncf %46 : vector<128x8xf32> to vector<128x8xbf16>
    %48 = vector.extract_strided_slice %7 {offsets = [0, 72], sizes = [128, 8], strides = [1, 1]} : vector<128x96xf32> to vector<128x8xf32>
    %49 = arith.truncf %48 : vector<128x8xf32> to vector<128x8xbf16>
    %cst_18 = arith.constant dense<0.000000e+00> : vector<128x128xf32>
    %50 = tpu.matmul %45, %47, %cst_18 {dimension_numbers = #tpu.dot_dimension_numbers<[1], [1], [0], [0], [0, 0, 1, 0], [], []>} : vector<128x8xbf16>, vector<128x8xbf16>, vector<128x128xf32> -> vector<128x128xf32>
    %51 = arith.addf %50, %17 : vector<128x128xf32>
    %cst_19 = arith.constant dense<0xFF800000> : vector<128xf32>
    %52 = vector.multi_reduction <maximumf>, %51, %cst_19 [1] : vector<128x128xf32> to vector<128xf32>
    %53 = vector.shape_cast %52 : vector<128xf32> to vector<128x1xf32>
    %54 = vector.broadcast %53 : vector<128x1xf32> to vector<128x128xf32>
    %55 = arith.subf %51, %54 : vector<128x128xf32>
    %56 = math.exp %55 : vector<128x128xf32>
    %cst_20 = arith.constant dense<0.000000e+00> : vector<128xf32>
    %57 = vector.multi_reduction <add>, %56, %cst_20 [1] : vector<128x128xf32> to vector<128xf32>
    %58 = vector.shape_cast %57 : vector<128xf32> to vector<128x1xf32>
    %59 = tpu.reciprocal %58 {approx = true} : vector<128x1xf32> -> vector<128x1xf32>
    %60 = vector.broadcast %59 : vector<128x1xf32> to vector<128x128xf32>
    %61 = arith.mulf %56, %60 : vector<128x128xf32>
    %62 = arith.truncf %61 : vector<128x128xf32> to vector<128x128xbf16>
    %cst_21 = arith.constant dense<0.000000e+00> : vector<128x8xf32>
    %63 = tpu.matmul %62, %49, %cst_21 {dimension_numbers = #tpu.dot_dimension_numbers<[1], [0], [0], [1], [0, 0, 1, 1], [], []>} : vector<128x128xbf16>, vector<128x8xbf16>, vector<128x8xf32> -> vector<128x8xf32>
    %64 = arith.truncf %63 : vector<128x8xf32> to vector<128x8xbf16>
    %c1 = arith.constant 1 : index
    %c0_22 = arith.constant 0 : index
    %c0_23 = arith.constant 0 : index
    %65 = vector.load %arg4[%c1, %c0_22, %c0_23] : memref<4x8x32xbf16, #tpu.memory_space<vmem>>, vector<1x8x32xbf16>
    %66 = vector.shape_cast %65 : vector<1x8x32xbf16> to vector<8x32xbf16>
    %cst_24 = arith.constant dense<0.000000e+00> : vector<128x32xf32>
    %67 = tpu.matmul %64, %66, %cst_24 {dimension_numbers = #tpu.dot_dimension_numbers<[1], [0], [0], [1], [0, 0, 1, 1], [], []>} : vector<128x8xbf16>, vector<8x32xbf16>, vector<128x32xf32> -> vector<128x32xf32>
    %68 = arith.addf %43, %67 : vector<128x32xf32>
    %69 = vector.extract_strided_slice %7 {offsets = [0, 16], sizes = [128, 8], strides = [1, 1]} : vector<128x96xf32> to vector<128x8xf32>
    %70 = arith.truncf %69 : vector<128x8xf32> to vector<128x8xbf16>
    %71 = vector.extract_strided_slice %7 {offsets = [0, 48], sizes = [128, 8], strides = [1, 1]} : vector<128x96xf32> to vector<128x8xf32>
    %72 = arith.truncf %71 : vector<128x8xf32> to vector<128x8xbf16>
    %73 = vector.extract_strided_slice %7 {offsets = [0, 80], sizes = [128, 8], strides = [1, 1]} : vector<128x96xf32> to vector<128x8xf32>
    %74 = arith.truncf %73 : vector<128x8xf32> to vector<128x8xbf16>
    %cst_25 = arith.constant dense<0.000000e+00> : vector<128x128xf32>
    %75 = tpu.matmul %70, %72, %cst_25 {dimension_numbers = #tpu.dot_dimension_numbers<[1], [1], [0], [0], [0, 0, 1, 0], [], []>} : vector<128x8xbf16>, vector<128x8xbf16>, vector<128x128xf32> -> vector<128x128xf32>
    %76 = arith.addf %75, %17 : vector<128x128xf32>
    %cst_26 = arith.constant dense<0xFF800000> : vector<128xf32>
    %77 = vector.multi_reduction <maximumf>, %76, %cst_26 [1] : vector<128x128xf32> to vector<128xf32>
    %78 = vector.shape_cast %77 : vector<128xf32> to vector<128x1xf32>
    %79 = vector.broadcast %78 : vector<128x1xf32> to vector<128x128xf32>
    %80 = arith.subf %76, %79 : vector<128x128xf32>
    %81 = math.exp %80 : vector<128x128xf32>
    %cst_27 = arith.constant dense<0.000000e+00> : vector<128xf32>
    %82 = vector.multi_reduction <add>, %81, %cst_27 [1] : vector<128x128xf32> to vector<128xf32>
    %83 = vector.shape_cast %82 : vector<128xf32> to vector<128x1xf32>
    %84 = tpu.reciprocal %83 {approx = true} : vector<128x1xf32> -> vector<128x1xf32>
    %85 = vector.broadcast %84 : vector<128x1xf32> to vector<128x128xf32>
    %86 = arith.mulf %81, %85 : vector<128x128xf32>
    %87 = arith.truncf %86 : vector<128x128xf32> to vector<128x128xbf16>
    %cst_28 = arith.constant dense<0.000000e+00> : vector<128x8xf32>
    %88 = tpu.matmul %87, %74, %cst_28 {dimension_numbers = #tpu.dot_dimension_numbers<[1], [0], [0], [1], [0, 0, 1, 1], [], []>} : vector<128x128xbf16>, vector<128x8xbf16>, vector<128x8xf32> -> vector<128x8xf32>
    %89 = arith.truncf %88 : vector<128x8xf32> to vector<128x8xbf16>
    %c2 = arith.constant 2 : index
    %c0_29 = arith.constant 0 : index
    %c0_30 = arith.constant 0 : index
    %90 = vector.load %arg4[%c2, %c0_29, %c0_30] : memref<4x8x32xbf16, #tpu.memory_space<vmem>>, vector<1x8x32xbf16>
    %91 = vector.shape_cast %90 : vector<1x8x32xbf16> to vector<8x32xbf16>
    %cst_31 = arith.constant dense<0.000000e+00> : vector<128x32xf32>
    %92 = tpu.matmul %89, %91, %cst_31 {dimension_numbers = #tpu.dot_dimension_numbers<[1], [0], [0], [1], [0, 0, 1, 1], [], []>} : vector<128x8xbf16>, vector<8x32xbf16>, vector<128x32xf32> -> vector<128x32xf32>
    %93 = arith.addf %68, %92 : vector<128x32xf32>
    %94 = vector.extract_strided_slice %7 {offsets = [0, 24], sizes = [128, 8], strides = [1, 1]} : vector<128x96xf32> to vector<128x8xf32>
    %95 = arith.truncf %94 : vector<128x8xf32> to vector<128x8xbf16>
    %96 = vector.extract_strided_slice %7 {offsets = [0, 56], sizes = [128, 8], strides = [1, 1]} : vector<128x96xf32> to vector<128x8xf32>
    %97 = arith.truncf %96 : vector<128x8xf32> to vector<128x8xbf16>
    %98 = vector.extract_strided_slice %7 {offsets = [0, 88], sizes = [128, 8], strides = [1, 1]} : vector<128x96xf32> to vector<128x8xf32>
    %99 = arith.truncf %98 : vector<128x8xf32> to vector<128x8xbf16>
    %cst_32 = arith.constant dense<0.000000e+00> : vector<128x128xf32>
    %100 = tpu.matmul %95, %97, %cst_32 {dimension_numbers = #tpu.dot_dimension_numbers<[1], [1], [0], [0], [0, 0, 1, 0], [], []>} : vector<128x8xbf16>, vector<128x8xbf16>, vector<128x128xf32> -> vector<128x128xf32>
    %101 = arith.addf %100, %17 : vector<128x128xf32>
    %cst_33 = arith.constant dense<0xFF800000> : vector<128xf32>
    %102 = vector.multi_reduction <maximumf>, %101, %cst_33 [1] : vector<128x128xf32> to vector<128xf32>
    %103 = vector.shape_cast %102 : vector<128xf32> to vector<128x1xf32>
    %104 = vector.broadcast %103 : vector<128x1xf32> to vector<128x128xf32>
    %105 = arith.subf %101, %104 : vector<128x128xf32>
    %106 = math.exp %105 : vector<128x128xf32>
    %cst_34 = arith.constant dense<0.000000e+00> : vector<128xf32>
    %107 = vector.multi_reduction <add>, %106, %cst_34 [1] : vector<128x128xf32> to vector<128xf32>
    %108 = vector.shape_cast %107 : vector<128xf32> to vector<128x1xf32>
    %109 = tpu.reciprocal %108 {approx = true} : vector<128x1xf32> -> vector<128x1xf32>
    %110 = vector.broadcast %109 : vector<128x1xf32> to vector<128x128xf32>
    %111 = arith.mulf %106, %110 : vector<128x128xf32>
    %112 = arith.truncf %111 : vector<128x128xf32> to vector<128x128xbf16>
    %cst_35 = arith.constant dense<0.000000e+00> : vector<128x8xf32>
    %113 = tpu.matmul %112, %99, %cst_35 {dimension_numbers = #tpu.dot_dimension_numbers<[1], [0], [0], [1], [0, 0, 1, 1], [], []>} : vector<128x128xbf16>, vector<128x8xbf16>, vector<128x8xf32> -> vector<128x8xf32>
    %114 = arith.truncf %113 : vector<128x8xf32> to vector<128x8xbf16>
    %c3 = arith.constant 3 : index
    %c0_36 = arith.constant 0 : index
    %c0_37 = arith.constant 0 : index
    %115 = vector.load %arg4[%c3, %c0_36, %c0_37] : memref<4x8x32xbf16, #tpu.memory_space<vmem>>, vector<1x8x32xbf16>
    %116 = vector.shape_cast %115 : vector<1x8x32xbf16> to vector<8x32xbf16>
    %cst_38 = arith.constant dense<0.000000e+00> : vector<128x32xf32>
    %117 = tpu.matmul %114, %116, %cst_38 {dimension_numbers = #tpu.dot_dimension_numbers<[1], [0], [0], [1], [0, 0, 1, 1], [], []>} : vector<128x8xbf16>, vector<8x32xbf16>, vector<128x32xf32> -> vector<128x32xf32>
    %118 = arith.addf %93, %117 : vector<128x32xf32>
    %c0_39 = arith.constant 0 : index
    %c0_40 = arith.constant 0 : index
    %119 = vector.load %arg5[%c0_39, %c0_40] : memref<1x32xf32, #tpu.memory_space<vmem>>, vector<1x32xf32>
    %120 = vector.broadcast %119 : vector<1x32xf32> to vector<128x32xf32>
    %121 = arith.addf %118, %120 : vector<128x32xf32>
    %122 = arith.addf %1, %121 : vector<128x32xf32>
    %cst_41 = arith.constant dense<0.000000e+00> : vector<128xf32>
    %123 = vector.multi_reduction <add>, %122, %cst_41 [1] : vector<128x32xf32> to vector<128xf32>
    %124 = vector.shape_cast %123 : vector<128xf32> to vector<128x1xf32>
    %cst_42 = arith.constant 3.200000e+01 : f32
    %125 = vector.broadcast %cst_42 : f32 to vector<128x1xf32>
    %126 = arith.divf %124, %125 : vector<128x1xf32>
    %127 = vector.broadcast %126 : vector<128x1xf32> to vector<128x32xf32>
    %128 = arith.subf %122, %127 : vector<128x32xf32>
    %129 = arith.mulf %128, %128 : vector<128x32xf32>
    %cst_43 = arith.constant dense<0.000000e+00> : vector<128xf32>
    %130 = vector.multi_reduction <add>, %129, %cst_43 [1] : vector<128x32xf32> to vector<128xf32>
    %131 = vector.shape_cast %130 : vector<128xf32> to vector<128x1xf32>
    %cst_44 = arith.constant 3.200000e+01 : f32
    %132 = vector.broadcast %cst_44 : f32 to vector<128x1xf32>
    %133 = arith.divf %131, %132 : vector<128x1xf32>
    %134 = vector.broadcast %126 : vector<128x1xf32> to vector<128x32xf32>
    %135 = arith.subf %122, %134 : vector<128x32xf32>
    %cst_45 = arith.constant 9.99999974E-6 : f32
    %136 = vector.broadcast %cst_45 : f32 to vector<128x1xf32>
    %137 = arith.addf %133, %136 : vector<128x1xf32>
    %138 = math.rsqrt %137 : vector<128x1xf32>
    %139 = vector.broadcast %138 : vector<128x1xf32> to vector<128x32xf32>
    %140 = arith.mulf %135, %139 : vector<128x32xf32>
    %c0_46 = arith.constant 0 : index
    %c0_47 = arith.constant 0 : index
    %141 = vector.load %arg6[%c0_46, %c0_47] : memref<1x32xf32, #tpu.memory_space<vmem>>, vector<1x32xf32>
    %142 = vector.broadcast %141 : vector<1x32xf32> to vector<128x32xf32>
    %143 = arith.mulf %140, %142 : vector<128x32xf32>
    %c0_48 = arith.constant 0 : index
    %c0_49 = arith.constant 0 : index
    %144 = vector.load %arg7[%c0_48, %c0_49] : memref<1x32xf32, #tpu.memory_space<vmem>>, vector<1x32xf32>
    %145 = vector.broadcast %144 : vector<1x32xf32> to vector<128x32xf32>
    %146 = arith.addf %143, %145 : vector<128x32xf32>
    %147 = arith.truncf %146 : vector<128x32xf32> to vector<128x32xbf16>
    %c0_50 = arith.constant 0 : index
    %c0_51 = arith.constant 0 : index
    %148 = vector.load %arg8[%c0_50, %c0_51] : memref<32x64xbf16, #tpu.memory_space<vmem>>, vector<32x64xbf16>
    %cst_52 = arith.constant dense<0.000000e+00> : vector<128x64xf32>
    %149 = tpu.matmul %147, %148, %cst_52 {dimension_numbers = #tpu.dot_dimension_numbers<[1], [0], [0], [1], [0, 0, 1, 1], [], []>} : vector<128x32xbf16>, vector<32x64xbf16>, vector<128x64xf32> -> vector<128x64xf32>
    %c0_53 = arith.constant 0 : index
    %c0_54 = arith.constant 0 : index
    %150 = vector.load %arg9[%c0_53, %c0_54] : memref<1x64xf32, #tpu.memory_space<vmem>>, vector<1x64xf32>
    %151 = vector.broadcast %150 : vector<1x64xf32> to vector<128x64xf32>
    %152 = arith.addf %149, %151 : vector<128x64xf32>
    %153 = vector.extract_strided_slice %152 {offsets = [0, 0], sizes = [128, 32], strides = [1, 1]} : vector<128x64xf32> to vector<128x32xf32>
    %154 = vector.extract_strided_slice %152 {offsets = [0, 32], sizes = [128, 32], strides = [1, 1]} : vector<128x64xf32> to vector<128x32xf32>
    %155 = arith.negf %154 : vector<128x32xf32>
    %156 = math.exp %155 : vector<128x32xf32>
    %cst_55 = arith.constant 1.000000e+00 : f32
    %157 = vector.broadcast %cst_55 : f32 to vector<128x32xf32>
    %158 = arith.addf %157, %156 : vector<128x32xf32>
    %159 = arith.divf %157, %158 : vector<128x32xf32>
    %160 = arith.mulf %153, %159 : vector<128x32xf32>
    %161 = arith.addf %146, %160 : vector<128x32xf32>
    %cst_56 = arith.constant dense<0.000000e+00> : vector<128xf32>
    %162 = vector.multi_reduction <add>, %161, %cst_56 [1] : vector<128x32xf32> to vector<128xf32>
    %163 = vector.shape_cast %162 : vector<128xf32> to vector<128x1xf32>
    %cst_57 = arith.constant 3.200000e+01 : f32
    %164 = vector.broadcast %cst_57 : f32 to vector<128x1xf32>
    %165 = arith.divf %163, %164 : vector<128x1xf32>
    %166 = vector.broadcast %165 : vector<128x1xf32> to vector<128x32xf32>
    %167 = arith.subf %161, %166 : vector<128x32xf32>
    %168 = arith.mulf %167, %167 : vector<128x32xf32>
    %cst_58 = arith.constant dense<0.000000e+00> : vector<128xf32>
    %169 = vector.multi_reduction <add>, %168, %cst_58 [1] : vector<128x32xf32> to vector<128xf32>
    %170 = vector.shape_cast %169 : vector<128xf32> to vector<128x1xf32>
    %cst_59 = arith.constant 3.200000e+01 : f32
    %171 = vector.broadcast %cst_59 : f32 to vector<128x1xf32>
    %172 = arith.divf %170, %171 : vector<128x1xf32>
    %173 = vector.broadcast %165 : vector<128x1xf32> to vector<128x32xf32>
    %174 = arith.subf %161, %173 : vector<128x32xf32>
    %cst_60 = arith.constant 9.99999974E-6 : f32
    %175 = vector.broadcast %cst_60 : f32 to vector<128x1xf32>
    %176 = arith.addf %172, %175 : vector<128x1xf32>
    %177 = math.rsqrt %176 : vector<128x1xf32>
    %178 = vector.broadcast %177 : vector<128x1xf32> to vector<128x32xf32>
    %179 = arith.mulf %174, %178 : vector<128x32xf32>
    %c0_61 = arith.constant 0 : index
    %c0_62 = arith.constant 0 : index
    %180 = vector.load %arg10[%c0_61, %c0_62] : memref<1x32xf32, #tpu.memory_space<vmem>>, vector<1x32xf32>
    %181 = vector.broadcast %180 : vector<1x32xf32> to vector<128x32xf32>
    %182 = arith.mulf %179, %181 : vector<128x32xf32>
    %c0_63 = arith.constant 0 : index
    %c0_64 = arith.constant 0 : index
    %183 = vector.load %arg11[%c0_63, %c0_64] : memref<1x32xf32, #tpu.memory_space<vmem>>, vector<1x32xf32>
    %184 = vector.broadcast %183 : vector<1x32xf32> to vector<128x32xf32>
    %185 = arith.addf %182, %184 : vector<128x32xf32>
    %186 = vector.shape_cast %185 : vector<128x32xf32> to vector<8x16x32xf32>
    %cst_65 = arith.constant dense<0.000000e+00> : vector<8x16xf32>
    %187 = vector.multi_reduction <add>, %186, %cst_65 [2] : vector<8x16x32xf32> to vector<8x16xf32>
    %188 = vector.shape_cast %187 : vector<8x16xf32> to vector<8x16x1xf32>
    %cst_66 = arith.constant 3.200000e+01 : f32
    %189 = vector.broadcast %cst_66 : f32 to vector<8x16x1xf32>
    %190 = arith.divf %188, %189 : vector<8x16x1xf32>
    %cst_67 = arith.constant dense<0.000000e+00> : vector<16x1xf32>
    %191 = vector.multi_reduction <add>, %190, %cst_67 [0] : vector<8x16x1xf32> to vector<16x1xf32>
    %192 = vector.shape_cast %191 : vector<16x1xf32> to vector<1x16x1xf32>
    %cst_68 = arith.constant 8.000000e+00 : f32
    %193 = vector.broadcast %cst_68 : f32 to vector<1x16x1xf32>
    %194 = arith.divf %192, %193 : vector<1x16x1xf32>
    %195 = vector.broadcast %194 : vector<1x16x1xf32> to vector<8x16x32xf32>
    %196 = arith.subf %186, %195 : vector<8x16x32xf32>
    %197 = arith.mulf %196, %196 : vector<8x16x32xf32>
    %cst_69 = arith.constant dense<0.000000e+00> : vector<8x16xf32>
    %198 = vector.multi_reduction <add>, %197, %cst_69 [2] : vector<8x16x32xf32> to vector<8x16xf32>
    %199 = vector.shape_cast %198 : vector<8x16xf32> to vector<8x16x1xf32>
    %cst_70 = arith.constant 3.200000e+01 : f32
    %200 = vector.broadcast %cst_70 : f32 to vector<8x16x1xf32>
    %201 = arith.divf %199, %200 : vector<8x16x1xf32>
    %cst_71 = arith.constant dense<0.000000e+00> : vector<16x1xf32>
    %202 = vector.multi_reduction <add>, %201, %cst_71 [0] : vector<8x16x1xf32> to vector<16x1xf32>
    %203 = vector.shape_cast %202 : vector<16x1xf32> to vector<1x16x1xf32>
    %cst_72 = arith.constant 8.000000e+00 : f32
    %204 = vector.broadcast %cst_72 : f32 to vector<1x16x1xf32>
    %205 = arith.divf %203, %204 : vector<1x16x1xf32>
    %cst_73 = arith.constant 9.99999974E-6 : f32
    %206 = vector.broadcast %cst_73 : f32 to vector<1x16x1xf32>
    %207 = arith.addf %205, %206 : vector<1x16x1xf32>
    %208 = math.rsqrt %207 : vector<1x16x1xf32>
    %209 = vector.broadcast %208 : vector<1x16x1xf32> to vector<8x16x32xf32>
    %210 = arith.mulf %196, %209 : vector<8x16x32xf32>
    %c0_74 = arith.constant 0 : index
    %c0_75 = arith.constant 0 : index
    %c0_76 = arith.constant 0 : index
    %211 = vector.load %arg12[%c0_74, %c0_75, %c0_76] : memref<1x16x1xf32, #tpu.memory_space<vmem>>, vector<1x16x1xf32>
    %212 = vector.broadcast %211 : vector<1x16x1xf32> to vector<8x16x32xf32>
    %213 = arith.mulf %210, %212 : vector<8x16x32xf32>
    %c0_77 = arith.constant 0 : index
    %c0_78 = arith.constant 0 : index
    %c0_79 = arith.constant 0 : index
    %214 = vector.load %arg13[%c0_77, %c0_78, %c0_79] : memref<1x16x1xf32, #tpu.memory_space<vmem>>, vector<1x16x1xf32>
    %215 = vector.broadcast %214 : vector<1x16x1xf32> to vector<8x16x32xf32>
    %216 = arith.addf %213, %215 : vector<8x16x32xf32>
    %c0_80 = arith.constant 0 : index
    %c0_81 = arith.constant 0 : index
    %c0_82 = arith.constant 0 : index
    %217 = vector.load %arg14[%c0_80, %c0_81, %c0_82] : memref<8x16x32xf32, #tpu.memory_space<vmem>>, vector<8x16x32xf32>
    tpu.vector_store %arg14[%c0_80, %c0_81, %c0_82], %216 {strides = array<i32>} : memref<8x16x32xf32, #tpu.memory_space<vmem>>, vector<8x16x32xf32>,
    return
  }
  func.func @transform_0(%arg0: i32) -> (i32, i32, i32) {
    %c0_i32 = arith.constant 0 : i32
    %c0_i32_0 = arith.constant 0 : i32
    %c0_i32_1 = arith.constant 0 : i32
    return %c0_i32, %arg0, %c0_i32_0 : i32, i32, i32
  }
  func.func @transform_1(%arg0: i32) -> (i32, i32) {
    %c0_i32 = arith.constant 0 : i32
    %c0_i32_0 = arith.constant 0 : i32
    %c0_i32_1 = arith.constant 0 : i32
    return %c0_i32, %c0_i32_0 : i32, i32
  }
  func.func @transform_2(%arg0: i32) -> (i32, i32) {
    %c0_i32 = arith.constant 0 : i32
    %c0_i32_0 = arith.constant 0 : i32
    %c0_i32_1 = arith.constant 0 : i32
    return %c0_i32, %c0_i32_0 : i32, i32
  }
  func.func @transform_3(%arg0: i32) -> (i32, i32, i32) {
    %c0_i32 = arith.constant 0 : i32
    %c0_i32_0 = arith.constant 0 : i32
    %c0_i32_1 = arith.constant 0 : i32
    %c0_i32_2 = arith.constant 0 : i32
    return %c0_i32, %c0_i32_0, %c0_i32_1 : i32, i32, i32
  }
  func.func @transform_4(%arg0: i32) -> (i32, i32) {
    %c0_i32 = arith.constant 0 : i32
    %c0_i32_0 = arith.constant 0 : i32
    %c0_i32_1 = arith.constant 0 : i32
    return %c0_i32, %c0_i32_0 : i32, i32
  }
  func.func @transform_5(%arg0: i32) -> (i32, i32) {
    %c0_i32 = arith.constant 0 : i32
    %c0_i32_0 = arith.constant 0 : i32
    %c0_i32_1 = arith.constant 0 : i32
    return %c0_i32, %c0_i32_0 : i32, i32
  }
  func.func @transform_6(%arg0: i32) -> (i32, i32) {
    %c0_i32 = arith.constant 0 : i32
    %c0_i32_0 = arith.constant 0 : i32
    %c0_i32_1 = arith.constant 0 : i32
    return %c0_i32, %c0_i32_0 : i32, i32
  }
  func.func @transform_7(%arg0: i32) -> (i32, i32) {
    %c0_i32 = arith.constant 0 : i32
    %c0_i32_0 = arith.constant 0 : i32
    %c0_i32_1 = arith.constant 0 : i32
    return %c0_i32, %c0_i32_0 : i32, i32
  }
  func.func @transform_8(%arg0: i32) -> (i32, i32) {
    %c0_i32 = arith.constant 0 : i32
    %c0_i32_0 = arith.constant 0 : i32
    %c0_i32_1 = arith.constant 0 : i32
    return %c0_i32, %c0_i32_0 : i32, i32
  }
  func.func @transform_9(%arg0: i32) -> (i32, i32) {
    %c0_i32 = arith.constant 0 : i32
    %c0_i32_0 = arith.constant 0 : i32
    %c0_i32_1 = arith.constant 0 : i32
    return %c0_i32, %c0_i32_0 : i32, i32
  }
  func.func @transform_10(%arg0: i32) -> (i32, i32) {
    %c0_i32 = arith.constant 0 : i32
    %c0_i32_0 = arith.constant 0 : i32
    %c0_i32_1 = arith.constant 0 : i32
    return %c0_i32, %c0_i32_0 : i32, i32
  }
  func.func @transform_11(%arg0: i32) -> (i32, i32, i32) {
    %c0_i32 = arith.constant 0 : i32
    %c0_i32_0 = arith.constant 0 : i32
    %c0_i32_1 = arith.constant 0 : i32
    return %c0_i32, %arg0, %c0_i32_0 : i32, i32, i32
  }
  func.func @transform_12(%arg0: i32) -> (i32, i32, i32) {
    %c0_i32 = arith.constant 0 : i32
    %c0_i32_0 = arith.constant 0 : i32
    %c0_i32_1 = arith.constant 0 : i32
    return %c0_i32, %arg0, %c0_i32_0 : i32, i32, i32
  }
  func.func @transform_13(%arg0: i32) -> (i32, i32, i32) {
    %c0_i32 = arith.constant 0 : i32
    %c0_i32_0 = arith.constant 0 : i32
    %c0_i32_1 = arith.constant 0 : i32
    return %c0_i32, %arg0, %c0_i32_0 : i32, i32, i32
  }
}

</mosaic_0001>

<bundles_post_ra>
// kernel: transformer_block_forward.1
= control target key start
LH: loop header
LB: loop body
LE: loop exit
PB: predicated region body
PF: predicated region fallthrough
CT: control target
= control target key end

     0   :  { %s8144_s0 = inlined_call_operand.hbm [shape: f32[8,32,32], index: 0, kind: input, shape index: {}]   ;;  %s8145_s1 = inlined_call_operand.vmem [shape: bf16[32,96], index: 1, kind: input, shape index: {}]   ;;  %s8146_s2 = inlined_call_operand.vmem [shape: f32[1,96], index: 2, kind: input, shape index: {}]   ;;  %s8147_s3 = inlined_call_operand.vmem [shape: bf16[4,8,32], index: 3, kind: input, shape index: {}]   ;;  %s8148_s4 = inlined_call_operand.vmem [shape: f32[1,32], index: 4, kind: input, shape index: {}]   ;;  %s8149_s5 = inlined_call_operand.vmem [shape: f32[1,32], index: 5, kind: input, shape index: {}]   ;;  %s8150_s6 = inlined_call_operand.vmem [shape: f32[1,32], index: 6, kind: input, shape index: {}]   ;;  %s8151_s7 = inlined_call_operand.vmem [shape: bf16[32,64], index: 7, kind: input, shape index: {}]   ;;  %s8152_s8 = inlined_call_operand.vmem [shape: f32[1,64], index: 8, kind: input, shape index: {}]   ;;  %s8153_s9 = inlined_call_operand.vmem [shape: f32[1,32], index: 9, kind: input, shape index: {}]   ;;  %s8154_s10 = inlined_call_operand.vmem [shape: f32[1,32], index: 10, kind: input, shape index: {}]   ;;  %s8155_s11 = inlined_call_operand.vmem [shape: f32[1,32,1], index: 11, kind: input, shape index: {}]   ;;  %s8156_s12 = inlined_call_operand.vmem [shape: f32[1,32,1], index: 12, kind: input, shape index: {}]   ;;  %s8157_s13 = inlined_call_operand.hbm [shape: f32[8,32,32], index: 13, kind: output, shape index: {}]  }
   0x1   :  { %8183 = sst [smem:[#allocation41_spill]] %s8156_s12 }
   0x2   :  { %8184 = sst [smem:[#allocation42_spill]] %s8157_s13 }
   0x3   :  { %18 = vsyncpa [#allocation3], 0 }
   0x4   :  { %20 = vsyncpa [#allocation3 + $0x1], 0 }
   0x5   :  { %21 = vsyncpa [#allocation4], 0 }
   0x6   :  { %23 = vsyncpa [#allocation4 + $0x1], 0  ;;  %s5810_s25 = smov 0   ;;  %s5812_s26 = smov 0  }
   0x7   :  { %s5814_s27 = smov 0   ;;  %s5816_s28 = smov 0  }
   0x8 LB: > { %8185 = sst [smem:[#allocation13_spill]] %s5700_s25  ;;  %s5831_s29 = sadd.s32 4294967295, %s5712_s28   ;;  %s5712_s28 = sphi %s5816_s28, %s8251_s28   ;;  %s5708_s27 = sphi %s5814_s27, %s8256_s27   ;;  %s5704_s26 = sphi %s5812_s26, %s8255_s26   ;;  %s5700_s25 = sphi %s5810_s25, %s8254_s25  }
   0x9   : > { %8186 = sst [smem:[#allocation14_spill]] %s5708_s27  ;;  %s4448_s30 = sadd.s32 4294967294, %s5712_s28  }
   0xa   : > { %s5835_s14 = sadd.s32 1, %s5712_s28   ;;  %s36_s15 = sadd.s32 1, %s5708_s27 }
   0xb   : > { %8187 = sst [smem:[#allocation15_spill]] %s5835_s14  ;;  %s33_s16 = ssub.s32 %s5712_s28, %s5835_s14 }
   0xc   : > { %p43_p0 = scmp.ne.s32.totalorder %s5708_s27, %s5704_s26  ;;  %p34_p1 = scmp.eq.s32.totalorder %s33_s16, 0 }
   0xd   : > { %p44_p2 = scmp.eq.s32.totalorder %s5712_s28, 0  ;;  %p49_p3 = scmp.ne.s32.totalorder %s5704_s26, %s5700_s25 }
   0xe   : > { %p50_p4 = scmp.eq.s32.totalorder %s5831_s29, 0  ;;  %p335_p7 = scmp.eq.s32.totalorder %s5831_s29, 1 }
   0xf   : > { %s5847_s17 = scalar_select %p34_p1, %s5708_s27, %s36_s15  }
  0x10   : > { %p5849_p5 = por %p44_p2, %p43_p0  ;;  %p5853_p6 = por %p50_p4, %p49_p3 }
  0x11   : > { %8188 = sst [smem:[#allocation16_spill]] %s5847_s17  ;;  %p341_p8 = scmp.eq.s32.totalorder %s4448_s30, 1 }
  0x12   : > { %p5858_p9 = por %p335_p7, %p43_p0  ;;  %p4450_p11 = scmp.ge.s32.totalorder %s5712_s28, 2 }
  0x13   : > { %p5862_p10 = por %p341_p8, %p49_p3 }
  0x14   : > { %s8191_s20 = scalar_select %p5858_p9, 1, 0 }
  0x15   : > { %s8193_s21 = scalar_select %p5862_p10, 1, 0 }
  0x16   : > { %8192 = sst [smem:[#allocation17_spill]] %s8191_s20  ;;  %387 = sbr.rel (%p4450_p11) target bundleno = 40 (0x28), region = 56 }
  0x17   : > { %8194 = sst [smem:[#allocation18_spill]] %s8193_s21 }
  0x1b   : > { %s391_s22 = sand.u32 1, %s5708_s27   ;;  %s4578_s23 = sshll.u32 %s5712_s28, 8 }
  0x1c   : > { %s4451_s24 = sshll.u32 %s391_s22, 7  ;;  %s401_s16 = scalar_lea.hbm %s8144_s0, %s4578_s23 }
  0x1d   : > { %s5184_s17 = scalar_select %p5849_p5, [#allocation0], [#allocation10] }
  0x1e   : > { %s395_s14 = scalar_lea.vmem [#allocation2], %s4451_s24  ;;  %s5714_s13 = smov 512  }
  0x1f   : > { %s414_s21 = sshll.u32 %s395_s14, 4  ;;  %s406_s25 = sld [smem:[%s5184_s17]]   ;;  %s415_s21 = int_to_ptr.vmem [resolvable:$true] %s414_s21 }
  0x20   : > { %5185 = sst [smem:[#allocation7]] (%p5849_p5), %s5714_s13  ;;  %s5715_s27 = smov 256  }
  0x21   : > { %5186 = sst [smem:[#allocation7 + $0x1]] (%p5849_p5), %s5715_s27  ;;  %s5716_s20 = smov 2  }
  0x22   : > { %5187 = sst [smem:[#allocation7 + $0x2]] (%p5849_p5), %s5716_s20  ;;  %s5717_s12 = smov 128  }
  0x23   : > { %5188 = sst [smem:[#allocation7 + $0x3]] (%p5849_p5), %s5717_s12  ;;  %s5718_s24 = smov 8  }
  0x24   : > { %5189 = sst [smem:[#allocation7 + $0x4]] (%p5849_p5), %s5717_s12  ;;  %s392_s17 = scalar_lea.sflag [#allocation3], %s391_s22 }
  0x25   : > { %s4454_s23 = sshll.u32 %s406_s25, 26  ;;  %5190 = sst [smem:[#allocation7 + $0x5]] (%p5849_p5), %s5718_s24 }
  0x26   : > { %s4455_s14 = sadd.s32 134217728, %s4454_s23  ;;  %s5719_s30 = smov 131072  }
  0x27   : > { %5191 = dma.general (%p5849_p5), %s401_s16, 2048, %s415_s21, %s392_s17, %s5719_s30, [#allocation7], %s4455_s14, 0  }
  0x28 PF: > { %p4456_p12 = scmp.ge.s32.totalorder %s5712_s28, 1  ;;  %p453_p13 = scmp.lt.s32.totalorder %s5712_s28, 3 }
  0x2a   : > { %p454_p0 = pnand %p4456_p12, %p453_p13 }
  0x2c   : > { %457 = sbr.rel (%p454_p0) target bundleno = 4522 (0x11aa), region = 72 }
  0x31   : > { %s5893_s13 = sand.u32 1, %s5704_s26  }
  0x32   : > { %s4457_s12 = sshll.u32 %s5893_s13, 7  ;;  %s460_s25 = scalar_lea.sflag [#allocation3], %s5893_s13 }
  0x33   : > { %s5899_s27 = scalar_lea.vmem [#allocation2], %s4457_s12 }
  0x34   : > { %5691 = dma.done.wait (%p5853_p6), %s460_s25, 2048  }
  0x35   : > { %5693 = vsyncadd (%p5853_p6), %s460_s25, 4294965248  ;;  %v5266_v0 = vld [vmem:[%s8145_s1 + $0x8] sm:$0xff]   ;;  %v5267_v1 = vld [vmem:[%s8145_s1] sm:$0xff]   ;;  %vm578_vm0 = vcmask 261120   ;;  %vm800_vm1 = vcmask 64512   ;;  %s5720_s16 = smov 96  }
  0x36   : > { %4764 = vmatprep.subr.bf16.mxu0 %v5266_v0  ;;  %v531_v2 = vld [vmem:[%s5899_s27] sm:$0xff]  ;;  %v532_v3 = vld [vmem:[%s5899_s27 + $0x8] sm:$0xff]  ;;  %v533_v5 = vld [vmem:[%s5899_s27 + $0x10] sm:$0xff]  ;;  %s5721_s23 = smov 64   ;;  %s5723_s24 = smov 88  }
  0x37   : > { %4765 = vmatpush3.bf16.msra.mxu0 %v5266_v0  ;;  %v547_v4 = vpack.c.bf16 %v532_v3, %v531_v2  ;;  %v534_v6 = vld [vmem:[%s5899_s27 + $0x18] sm:$0xff]  ;;  %v535_v7 = vld [vmem:[%s5899_s27 + $0x20] sm:$0xff]  ;;  %v536_v8 = vld [vmem:[%s5899_s27 + $0x28] sm:$0xff]  ;;  %s5724_s14 = smov 120   ;;  %s5725_s17 = smov 56  }
  0x38   : > { %4766 = vmatprep.subr.bf16.mxu0 %v5267_v1  ;;  %v548_v9 = vpack.c.bf16 %v534_v6, %v533_v5  ;;  %v549_v10 = vpack.c.bf16 %v536_v8, %v535_v7  ;;  %v537_v11 = vld [vmem:[%s5899_s27 + $0x30] sm:$0xff]  ;;  %v538_v12 = vld [vmem:[%s5899_s27 + $0x38] sm:$0xff]  ;;  %v539_v13 = vld [vmem:[%s5899_s27 + $0x40] sm:$0xff]  ;;  %s5726_s30 = smov 80   ;;  %s5727_s25 = smov 112  }
  0x39   : > { %4768 = vmatprep.mubr.msk.bf16.mxu0 %vm578_vm0, %v547_v4  ;;  %v540_v14 = vld [vmem:[%s5899_s27 + $0x48] sm:$0xff]  ;;  %v550_v15 = vpack.c.bf16 %v538_v12, %v537_v11  ;;  %v541_v17 = vld [vmem:[%s5899_s27 + $0x50] sm:$0xff]  ;;  %v542_v18 = vld [vmem:[%s5899_s27 + $0x58] sm:$0xff]  ;;  %s5728_s18 = smov 72   ;;  %s5729_s20 = smov 104  }
  0x3a   : > { %v551_v16 = vpack.c.bf16 %v540_v14, %v539_v13  ;;  %v543_v19 = vld [vmem:[%s5899_s27 + $0x60] sm:$0xff]  ;;  %v544_v20 = vld [vmem:[%s5899_s27 + $0x68] sm:$0xff]  ;;  %v552_v21 = vpack.c.bf16 %v542_v18, %v541_v17  ;;  %v545_v23 = vld [vmem:[%s5899_s27 + $0x70] sm:$0xff] }
  0x3b   : > { %4767 = vmatpush3.bf16.msra.mxu0 %v5267_v1  ;;  %v553_v22 = vpack.c.bf16 %v544_v20, %v543_v19  ;;  %v546_v24 = vld [vmem:[%s5899_s27 + $0x78] sm:$0xff]  ;;  %v4463_v29 = vld [vmem:[%s8146_s2] ss:$0 sm:$0xff] }
  0x3c   : > { %v554_v25 = vpack.c.bf16 %v546_v24, %v545_v23 }
  0x3e   : > { %4769 = vmatmul.mubr.msk.bf16.vlgmr.msra.gmra.mxu0 %vm578_vm0, %v548_v9 }
  0x3f   : > { %4772 = vmatprep.mubr.msk.bf16.mxu0 %vm578_vm0, %v549_v10 }
  0x46   : > { %4773 = vmatmul.mubr.msk.bf16.gmra.mxu0 %vm578_vm0, %v550_v15 }
  0x47   : > { %4776 = vmatprep.mubr.msk.bf16.mxu0 %vm578_vm0, %v551_v16 }
  0x4e   : > { %4777 = vmatmul.mubr.msk.bf16.gmra.mxu0 %vm578_vm0, %v552_v21 }
  0x4f   : > { %4780 = vmatprep.mubr.msk.bf16.mxu0 %vm578_vm0, %v553_v22 }
  0x56   : > { %4781 = vmatmul.mubr.msk.bf16.gmra.mxu0 %vm578_vm0, %v554_v25 }
  0xfe   : > { %v4770_v26 = vpop.f32.mrf.mxu0 }
  0xff   : > { %v646_v1 = vadd.f32 %v4770_v26, %v4463_v29 }
 0x100   : > { %v637_v27 = vpop.f32.mrf.mxu0 }
 0x101   : > { %v638_v31 = vadd.f32 %v4463_v29, %v637_v27  ;;  %v700_v27 = vlaneseq }
 0x102   : > { %v4771_v28 = vpop.f32.mrf.mxu0 }
 0x103   : > { %v649_v63 = vadd.f32 %v4771_v28, %v4463_v29  ;;  %v6010_v28 = vshrl.u32 %v700_v27, 7 }
 0x104   : > { %v640_v30 = vpop.f32.mrf.mxu0 }
 0x105   : > { %v641_v32 = vadd.f32 %v4463_v29, %v640_v30  ;;  %v5969_v2 = vpack.c.bf16 %v649_v63, %v646_v1  ;;  %v734_v30 = vand.u32 127, %v700_v27  ;;  %v705_v1 = vadd.s32 32, %v6010_v28 }
 0x106   : > { %v4774_v33 = vpop.f32.mrf.mxu0  ;;  %v716_v27 = vadd.s32 120, %v6010_v28 }
 0x107   : > { %v5938_v34 = vpack.c.bf16 %v641_v32, %v638_v31  ;;  %v662_v62 = vadd.f32 %v4774_v33, %v4463_v29  ;;  %v6013_v32 = vand.u32 15, %v734_v30  ;;  %v702_v33 = vadd.s32 8, %v6010_v28 }
 0x108   : > { %v653_v35 = vpop.f32.mrf.mxu0 }
 0x109   : > { %4800 = vmatprep.mubr.msk.bf16.mxu1 %vm800_vm1, %v5938_v34  ;;  %v654_v52 = vadd.f32 %v4463_v29, %v653_v35  ;;  %v717_v35 = vand.u32 15, %v6010_v28 }
 0x10a   : > { %v4775_v36 = vpop.f32.mrf.mxu0 }
 0x10b   : > { %v665_v60 = vadd.f32 %v4775_v36, %v4463_v29  ;;  %v704_v36 = vadd.s32 24, %v6010_v28  ;;  %vm736_vm3 = vcmp.eq.s32.totalorder %v717_v35, %v6013_v32 }
 0x10c   : > { %v656_v37 = vpop.f32.mrf.mxu0 }
 0x10d   : > { %v657_v49 = vadd.f32 %v4463_v29, %v656_v37  ;;  %v5964_v0 = vpack.c.bf16 %v665_v60, %v662_v62  ;;  %v718_v37 = vand.u32 15, %v702_v33  ;;  %v708_v62 = vadd.s32 56, %v6010_v28 }
 0x10e   : > { %v4778_v38 = vpop.f32.mrf.mxu0  ;;  %v713_v33 = vadd.s32 96, %v6010_v28 }
 0x10f   : > { %v678_v41 = vadd.f32 %v4778_v38, %v4463_v29  ;;  %v5950_v56 = vpack.c.bf16 %v657_v49, %v654_v52  ;;  %v5722_v38 = vmov -1e+30   ;;  %vm737_vm4 = vcmp.eq.s32.totalorder %v718_v37, %v6013_v32 }
 0x110   : > { %v669_v39 = vpop.f32.mrf.mxu0 }
 0x111   : > { %v670_v47 = vadd.f32 %v4463_v29, %v669_v39 }
 0x112   : > { %v4779_v40 = vpop.f32.mrf.mxu0 }
 0x113   : > { %v681_v42 = vadd.f32 %v4779_v40, %v4463_v29  ;;  %v720_v40 = vand.u32 15, %v704_v36 }
 0x114   : > { %v672_v43 = vpop.f32.mrf.mxu0 }
 0x115   : > { %v5942_v44 = vpack.c.bf16 %v681_v42, %v678_v41  ;;  %v673_v45 = vadd.f32 %v4463_v29, %v672_v43  ;;  %v6028_v43 = vsel %vm736_vm3, 0.0, %v5722_v38  ;;  %vm739_vm5 = vcmp.eq.s32.totalorder %v720_v40, %v6013_v32 }
 0x116   : > { %v4782_v46 = vpop.f32.mrf.mxu0  ;;  %v6039_v49 = vsel %vm739_vm5, 0.0, %v5722_v38  ;;  %v732_v40 = vand.u32 15, %v716_v27 }
 0x117   : > { %794 = vrot.lane.b32.xlu1 %v5942_v44, %s5720_s16  ;;  %v5946_v50 = vpack.c.bf16 %v673_v45, %v670_v47  ;;  %v694_v53 = vadd.f32 %v4782_v46, %v4463_v29  ;;  %v6033_v47 = vsel %vm737_vm4, 0.0, %v5722_v38  ;;  %vm1712_vm4 = vcmask 1043456  }
 0x118   : > { %v685_v48 = vpop.f32.mrf.mxu0  ;;  %vm751_vm15 = vcmp.eq.s32.totalorder %v732_v40, %v6013_v32 }
 0x119   : > { %v686_v59 = vadd.f32 %v4463_v29, %v685_v48 }
 0x11a   : > { %v4783_v51 = vpop.f32.mrf.mxu0 }
 0x11b   : > { %v697_v54 = vadd.f32 %v4783_v51, %v4463_v29  ;;  %792 = vrot.lane.b32.xlu1 %v5946_v50, %s5720_s16 }
 0x11c   : > { %v688_v55 = vpop.f32.mrf.mxu0 }
 0x11d   : > { %v5952_v57 = vpack.c.bf16 %v697_v54, %v694_v53  ;;  %v689_v58 = vadd.f32 %v4463_v29, %v688_v55  ;;  %v703_v29 = vadd.s32 16, %v6010_v28 }
 0x11f   : > { %798 = vrot.lane.b32.xlu0 %v5952_v57, %s5720_s16  ;;  %788 = vrot.lane.b32.xlu1 %v5950_v56, %s5720_s16  ;;  %v5958_v61 = vpack.c.bf16 %v689_v58, %v686_v59  ;;  %v719_v31 = vand.u32 15, %v703_v29  ;;  %v707_v59 = vadd.s32 48, %v6010_v28 }
 0x121   : > { %vm738_vm2 = vcmp.eq.s32.totalorder %v719_v31, %v6013_v32  ;;  %v723_v63 = vand.u32 15, %v707_v59 }
 0x122   : > { %v6020_v39 = vsel %vm738_vm2, 0.0, %v5722_v38 }
 0x123   : > { %796 = vrot.lane.b32.xlu0 %v5958_v61, %s5720_s16  ;;  %784 = vrot.lane.b32.xlu1 %v5938_v34, %s5720_s16  ;;  %vm742_vm6 = vcmp.eq.s32.totalorder %v723_v63, %v6013_v32 }
 0x127   : > { %790 = vrot.lane.b32.xlu0 %v5964_v0, %s5720_s16  ;;  %1112 = vrot.lane.b32.xlu1 %v5952_v57, %s5721_s23 }
 0x12b   : > { %786 = vrot.lane.b32.xlu0 %v5969_v2, %s5720_s16  ;;  %1106 = vrot.lane.b32.xlu1 %v5946_v50, %s5721_s23 }
 0x12f   : > { %1108 = vrot.lane.b32.xlu0 %v5942_v44, %s5721_s23  ;;  %1104 = vrot.lane.b32.xlu1 %v5964_v0, %s5721_s23 }
 0x133   : > { %1102 = vrot.lane.b32.xlu1 %v5950_v56, %s5721_s23 }
 0x137   : > { %1100 = vrot.lane.b32.xlu1 %v5969_v2, %s5721_s23 }
 0x13b   : > { %1098 = vrot.lane.b32.xlu1 %v5938_v34, %s5721_s23 }
 0x13f   : > { %1110 = vrot.lane.b32.xlu1 %v5958_v61, %s5721_s23  ;;  %s5730_s23 = smov 48  }
 0x189   : > { %v795_v3 = vpop.permute.xlu1 %794 }
 0x18a   : > { %v841_v14 = vsel %vm800_vm1, %v795_v3, 0 }
 0x18d   : > { %v793_v4 = vpop.permute.xlu1 %792 }
 0x18e   : > { %v838_v18 = vsel %vm800_vm1, %v793_v4, 0 }
 0x191   : > { %v799_v5 = vpop.permute.xlu0 %798  ;;  %v789_v6 = vpop.permute.xlu1 %788 }
 0x192   : > { %5148 = vmatprep.subr.msk.bf16.mxu1 %vm800_vm1, %v799_v5  ;;  %v847_v7 = vsel %vm800_vm1, %v799_v5, 0  ;;  %v832_v24 = vsel %vm800_vm1, %v789_v6, 0  ;;  %v706_v5 = vadd.s32 40, %v6010_v28 }
 0x193   : > { %4785 = vmatpush3.bf16.xpose.msra.mxu1 %v847_v7  ;;  %v711_v7 = vadd.s32 80, %v6010_v28 }
 0x195   : > { %v797_v8 = vpop.permute.xlu0 %796  ;;  %v785_v9 = vpop.permute.xlu1 %784 }
 0x196   : > { %5149 = vmatprep.subr.msk.bf16.mxu1 %vm800_vm1, %v797_v8  ;;  %v844_v11 = vsel %vm800_vm1, %v797_v8, 0  ;;  %v826_v26 = vsel %vm800_vm1, %v785_v9, 0 }
 0x199   : > { %v1113_v10 = vpop.permute.xlu1 %1112  ;;  %v791_v16 = vpop.permute.xlu0 %790 }
 0x19a   : > { %4816 = vmatprep.subr.bf16.mxu0 %v1113_v10  ;;  %v835_v22 = vsel %vm800_vm1, %v791_v16, 0 }
 0x19b   : > { %4787 = vmatpush3.bf16.xpose.msra.mxu1 %v844_v11  ;;  %4817 = vmatpush3.bf16.msra.mxu0 %v1113_v10  ;;  %v712_v10 = vadd.s32 88, %v6010_v28  ;;  %v6063_v11 = vsel %vm742_vm6, 0.0, %v5722_v38 }
 0x19c   : > { %5150 = vmatprep.subr.msk.bf16.mxu1 %vm800_vm1, %v795_v3 }
 0x19d   : > { %v1107_v12 = vpop.permute.xlu1 %1106  ;;  %v787_v19 = vpop.permute.xlu0 %786 }
 0x19e   : > { %v829_v25 = vsel %vm800_vm1, %v787_v19, 0 }
 0x1a1   : > { %v1105_v13 = vpop.permute.xlu1 %1104  ;;  %v1109_v23 = vpop.permute.xlu0 %1108 }
 0x1a3   : > { %4789 = vmatpush3.bf16.xpose.msra.mxu1 %v841_v14 }
 0x1a4   : > { %5151 = vmatprep.subr.msk.bf16.mxu1 %vm800_vm1, %v793_v4  ;;  %v724_v4 = vand.u32 15, %v708_v62  ;;  %v6136_v62 = vsel %vm751_vm15, 0.0, %v5722_v38 }
 0x1a5   : > { %v1103_v15 = vpop.permute.xlu1 %1102  ;;  %8201 = vst [vmem:[#allocation25_spill] sm:$0xff] %v6136_v62 }
 0x1a6   : > { %vm743_vm7 = vcmp.eq.s32.totalorder %v724_v4, %v6013_v32 }
 0x1a7   : > { %v6068_v14 = vsel %vm743_vm7, 0.0, %v5722_v38 }
 0x1a9   : > { %v1101_v17 = vpop.permute.xlu1 %1100 }
 0x1ab   : > { %4791 = vmatpush3.bf16.xpose.msra.mxu1 %v838_v18  ;;  %v710_v18 = vadd.s32 72, %v6010_v28 }
 0x1ac   : > { %5152 = vmatprep.subr.msk.bf16.mxu1 %vm800_vm1, %v791_v16 }
 0x1ad   : > { %v1099_v20 = vpop.permute.xlu1 %1098 }
 0x1b1   : > { %v1111_v21 = vpop.permute.xlu1 %1110 }
 0x1b2   : > { %4818 = vmatprep.subr.bf16.mxu0 %v1111_v21 }
 0x1b3   : > { %4793 = vmatpush3.bf16.xpose.msra.mxu1 %v835_v22  ;;  %4819 = vmatpush3.bf16.msra.mxu0 %v1111_v21  ;;  %v715_v22 = vadd.s32 112, %v6010_v28 }
 0x1b4   : > { %5153 = vmatprep.subr.msk.bf16.mxu1 %vm800_vm1, %v789_v6  ;;  %4820 = vmatprep.subr.bf16.mxu0 %v1109_v23  ;;  %v721_v6 = vand.u32 15, %v705_v1 }
 0x1b5   : > { %v731_v31 = vand.u32 15, %v715_v22 }
 0x1b6   : > { %vm740_vm8 = vcmp.eq.s32.totalorder %v721_v6, %v6013_v32 }
 0x1b7   : > { %4821 = vmatpush3.bf16.msra.mxu0 %v1109_v23  ;;  %vm750_vm14 = vcmp.eq.s32.totalorder %v731_v31, %v6013_v32 }
 0x1b8   : > { %4822 = vmatprep.subr.bf16.mxu0 %v1107_v12  ;;  %v6128_v59 = vsel %vm750_vm14, 0.0, %v5722_v38 }
 0x1b9   : > { %8200 = vst [vmem:[#allocation24_spill] sm:$0xff] %v6128_v59 }
 0x1bb   : > { %4795 = vmatpush3.bf16.xpose.msra.mxu1 %v832_v24  ;;  %4823 = vmatpush3.bf16.msra.mxu0 %v1107_v12  ;;  %v727_v12 = vand.u32 15, %v711_v7 }
 0x1bc   : > { %5154 = vmatprep.subr.msk.bf16.mxu1 %vm800_vm1, %v787_v19  ;;  %4824 = vmatprep.subr.bf16.mxu0 %v1105_v13  ;;  %v6076_v19 = vsel %vm740_vm8, 0.0, %v5722_v38 }
 0x1bd   : > { %vm746_vm10 = vcmp.eq.s32.totalorder %v727_v12, %v6013_v32 }
 0x1be   : > { %v6094_v29 = vsel %vm746_vm10, 0.0, %v5722_v38 }
 0x1bf   : > { %4825 = vmatpush3.bf16.msra.mxu0 %v1105_v13  ;;  %v709_v13 = vadd.s32 64, %v6010_v28  ;;  %8196 = vst [vmem:[#allocation20_spill] sm:$0xff] %v6094_v29 }
 0x1c0   : > { %4826 = vmatprep.subr.bf16.mxu0 %v1103_v15 }
 0x1c1   : > { %v725_v21 = vand.u32 15, %v709_v13 }
 0x1c3   : > { %4797 = vmatpush3.bf16.xpose.msra.mxu1 %v829_v25  ;;  %4827 = vmatpush3.bf16.msra.mxu0 %v1103_v15  ;;  %vm744_vm12 = vcmp.eq.s32.totalorder %v725_v21, %v6013_v32 }
 0x1c4   : > { %5155 = vmatprep.subr.msk.bf16.mxu1 %vm800_vm1, %v785_v9  ;;  %4828 = vmatprep.subr.bf16.mxu0 %v1101_v17  ;;  %v722_v9 = vand.u32 15, %v706_v5 }
 0x1c6   : > { %vm741_vm9 = vcmp.eq.s32.totalorder %v722_v9, %v6013_v32 }
 0x1c7   : > { %4829 = vmatpush3.bf16.msra.mxu0 %v1101_v17  ;;  %v728_v17 = vand.u32 15, %v712_v10  ;;  %v6085_v23 = vsel %vm741_vm9, 0.0, %v5722_v38 }
 0x1c8   : > { %4830 = vmatprep.subr.bf16.mxu0 %v1099_v20  ;;  %8195 = vst [vmem:[#allocation19_spill] sm:$0xff] %v6085_v23 }
 0x1c9   : > { %vm747_vm11 = vcmp.eq.s32.totalorder %v728_v17, %v6013_v32 }
 0x1ca   : > { %v6103_v35 = vsel %vm747_vm11, 0.0, %v5722_v38 }
 0x1cb   : > { %4799 = vmatpush3.bf16.xpose.msra.mxu1 %v826_v26  ;;  %4831 = vmatpush3.bf16.msra.mxu0 %v1099_v20  ;;  %v726_v26 = vand.u32 15, %v710_v18  ;;  %8197 = vst [vmem:[#allocation21_spill] sm:$0xff] %v6103_v35 }
 0x1cd   : > { %vm745_vm13 = vcmp.eq.s32.totalorder %v726_v26, %v6013_v32 }
 0x1d2   : > { %4801 = vmatmul.mubr.msk.bf16.vlgmr.msra.gmra.mxu1 %vm800_vm1, %v5969_v2 }
 0x1d3   : > { %4804 = vmatprep.mubr.msk.bf16.mxu1 %vm800_vm1, %v5950_v56 }
 0x1da   : > { %4805 = vmatmul.mubr.msk.bf16.gmra.mxu1 %vm800_vm1, %v5964_v0 }
 0x1db   : > { %4808 = vmatprep.mubr.msk.bf16.mxu1 %vm800_vm1, %v5946_v50 }
 0x1e2   : > { %4809 = vmatmul.mubr.msk.bf16.gmra.mxu1 %vm800_vm1, %v5942_v44 }
 0x1e3   : > { %4812 = vmatprep.mubr.msk.bf16.mxu1 %vm800_vm1, %v5958_v61 }
 0x1ea   : > { %4813 = vmatmul.mubr.msk.bf16.gmra.mxu1 %vm800_vm1, %v5952_v57 }
 0x292   : > { %v4802_v41 = vpop.f32.mrf.mxu1 }
 0x293   : > { %v6024_v42 = vadd.f32 %v4802_v41, %v6020_v39  ;;  %v714_v41 = vadd.s32 104, %v6010_v28 }
 0x294   : > { %v883_v45 = vpop.f32.mrf.mxu1 }
 0x295   : > { %950 = vmax.xlane.f32.xlu0 %v6024_v42  ;;  %v6036_v48 = vadd.f32 %v883_v45, %v6028_v43  ;;  %v6112_v45 = vsel %vm744_vm12, 0.0, %v5722_v38  ;;  %v730_v28 = vand.u32 15, %v714_v41 }
 0x296   : > { %v4803_v46 = vpop.f32.mrf.mxu1  ;;  %8198 = vst [vmem:[#allocation22_spill] sm:$0xff] %v6112_v45 }
 0x297   : > { %v6046_v53 = vadd.f32 %v4803_v46, %v6039_v49  ;;  %vm749_vm3 = vcmp.eq.s32.totalorder %v730_v28, %v6013_v32 }
 0x298   : > { %v886_v51 = vpop.f32.mrf.mxu1  ;;  %v6151_v5 = vsel %vm749_vm3, 0.0, %v5722_v38 }
 0x299   : > { %v6042_v52 = vadd.f32 %v886_v51, %v6033_v47  ;;  %946 = vmax.xlane.f32.xlu0 %v6036_v48  ;;  %v729_v51 = vand.u32 15, %v713_v33  ;;  %8203 = vst [vmem:[#allocation27_spill] sm:$0xff] %v6151_v5 }
 0x29a   : > { %v4806_v54 = vpop.f32.mrf.mxu1 }
 0x29b   : > { %948 = vmax.xlane.f32.xlu1 %v6042_v52  ;;  %v6071_v16 = vadd.f32 %v4806_v54, %v6063_v11  ;;  %v6120_v54 = vsel %vm745_vm13, 0.0, %v5722_v38  ;;  %vm748_vm2 = vcmp.eq.s32.totalorder %v729_v51, %v6013_v32 }
 0x29c   : > { %v899_v55 = vpop.f32.mrf.mxu1  ;;  %8199 = vst [vmem:[#allocation23_spill] sm:$0xff] %v6120_v54 }
 0x29d   : > { %952 = vmax.xlane.f32.xlu0 %v6046_v53  ;;  %v6088_v25 = vadd.f32 %v899_v55, %v6076_v19 }
 0x29e   : > { %v4807_v58 = vpop.f32.mrf.mxu1 }
 0x29f   : > { %v6079_v20 = vadd.f32 %v4807_v58, %v6068_v14 }
 0x2a0   : > { %v902_v60 = vpop.f32.mrf.mxu1 }
 0x2a1   : > { %v6097_v30 = vadd.f32 %v902_v60, %v6085_v23 }
 0x2a2   : > { %v4810_v3 = vpop.f32.mrf.mxu1 }
 0x2a3   : > { %v6106_v37 = vadd.f32 %v4810_v3, %v6094_v29  ;;  %v6144_v3 = vsel %vm748_vm2, 0.0, %v5722_v38 }
 0x2a4   : > { %v915_v8 = vpop.f32.mrf.mxu1  ;;  %8202 = vst [vmem:[#allocation26_spill] sm:$0xff] %v6144_v3 }
 0x2a5   : > { %v6123_v58 = vadd.f32 %v915_v8, %v6112_v45 }
 0x2a6   : > { %v4811_v15 = vpop.f32.mrf.mxu1 }
 0x2a7   : > { %v6115_v46 = vadd.f32 %v4811_v15, %v6103_v35 }
 0x2a8   : > { %v918_v24 = vpop.f32.mrf.mxu1 }
 0x2a9   : > { %v6131_v60 = vadd.f32 %v918_v24, %v6120_v54 }
 0x2aa   : > { %v4814_v36 = vpop.f32.mrf.mxu1 }
 0x2ab   : > { %v6139_v1 = vadd.f32 %v4814_v36, %v6128_v59 }
 0x2ac   : > { %1256 = vrot.lane.b32.xlu1 %v5958_v61, %s5723_s24  ;;  %v931_v55 = vpop.f32.mrf.mxu1 }
 0x2ad   : > { %v6154_v7 = vadd.f32 %v931_v55, %v6144_v3 }
 0x2ae   : > { %v4815_v63 = vpop.f32.mrf.mxu1 }
 0x2af   : > { %v6147_v4 = vadd.f32 %v4815_v63, %v6136_v62 }
 0x2b0   : > { %v934_v6 = vpop.f32.mrf.mxu1 }
 0x2b1   : > { %v6158_v32 = vadd.f32 %v934_v6, %v6151_v5 }
 0x2b3   : > { %1258 = vrot.lane.b32.xlu0 %v5952_v57, %s5723_s24 }
 0x2d0   : > { %958 = vmax.xlane.f32.xlu1 %v6071_v16 }
 0x2d2   : > { %960 = vmax.xlane.f32.xlu0 %v6079_v20 }
 0x2d4   : > { %954 = vmax.xlane.f32.xlu1 %v6088_v25 }
 0x2d6   : > { %956 = vmax.xlane.f32.xlu0 %v6097_v30 }
 0x2d8   : > { %966 = vmax.xlane.f32.xlu1 %v6106_v37 }
 0x2da   : > { %968 = vmax.xlane.f32.xlu0 %v6115_v46 }
 0x2dc   : > { %962 = vmax.xlane.f32.xlu1 %v6123_v58 }
 0x2de   : > { %964 = vmax.xlane.f32.xlu0 %v6131_v60 }
 0x2e0   : > { %974 = vmax.xlane.f32.xlu1 %v6139_v1 }
 0x2e2   : > { %976 = vmax.xlane.f32.xlu0 %v6147_v4 }
 0x2e4   : > { %970 = vmax.xlane.f32.xlu1 %v6154_v7 }
 0x2e6   : > { %972 = vmax.xlane.f32.xlu0 %v6158_v32 }
 0x2f5   : > { %1254 = vrot.lane.b32.xlu1 %v5942_v44, %s5723_s24 }
 0x31e   : > { %v951_v8 = vpop.xlane.xlu0 %950 }
 0x31f   : > { %v980_v38 = vsub.f32 %v6024_v42, %v951_v8 }
 0x321   : > { %v998_v9 = vmul.f32 1.442695, %v980_v38 }
 0x322   : > { %v947_v10 = vpop.xlane.xlu0 %946 }
 0x323   : > { %5270 = vpow2.f32 %v998_v9  ;;  %v978_v12 = vsub.f32 %v6036_v48, %v947_v10 }
 0x324   : > { %v949_v13 = vpop.xlane.xlu1 %948 }
 0x325   : > { %v994_v15 = vmul.f32 1.442695, %v978_v12  ;;  %v979_v18 = vsub.f32 %v6042_v52, %v949_v13 }
 0x326   : > { %v953_v17 = vpop.xlane.xlu0 %952 }
 0x327   : > { %5272 = vpow2.f32 %v994_v15  ;;  %v981_v21 = vsub.f32 %v6046_v53, %v953_v17  ;;  %v996_v26 = vmul.f32 1.442695, %v979_v18 }
 0x328   : > { %v6184_v27 = vpop.permute.xlu1 %1256 }
 0x329   : > { %v1000_v22 = vmul.f32 1.442695, %v981_v21 }
 0x32a   : > { %v6168_v24 = vpop.permute.xlu0 %1258 }
 0x32b   : > { %5274 = vpow2.f32 %v1000_v22  ;;  %5156 = vmatprep.subr.msk.bf16.mxu0 %vm800_vm1, %v6168_v24 }
 0x32c   : > { %5276 = vpow2.f32 %v996_v26 }
 0x330   : > { %v6172_v42 = vpop.eup %5270 }
 0x331   : > { %1030 = vadd.xlane.f32.xlu0 %v6172_v42 }
 0x334   : > { %v6175_v48 = vpop.eup %5272 }
 0x335   : > { %1026 = vadd.xlane.f32.xlu0 %v6175_v48 }
 0x338   : > { %v6178_v52 = vpop.eup %5274 }
 0x339   : > { %1032 = vadd.xlane.f32.xlu0 %v6178_v52  ;;  %v6181_v53 = vpop.eup %5276 }
 0x33d   : > { %1028 = vadd.xlane.f32.xlu0 %v6181_v53 }
 0x359   : > { %v959_v31 = vpop.xlane.xlu1 %958 }
 0x35a   : > { %v984_v33 = vsub.f32 %v6071_v16, %v959_v31 }
 0x35b   : > { %v961_v36 = vpop.xlane.xlu0 %960 }
 0x35c   : > { %v1006_v40 = vmul.f32 1.442695, %v984_v33  ;;  %v985_v51 = vsub.f32 %v6079_v20, %v961_v36 }
 0x35d   : > { %v955_v41 = vpop.xlane.xlu1 %954 }
 0x35e   : > { %5278 = vpow2.f32 %v1006_v40  ;;  %v982_v55 = vsub.f32 %v6088_v25, %v955_v41  ;;  %v1008_v8 = vmul.f32 1.442695, %v985_v51 }
 0x35f   : > { %v957_v28 = vpop.xlane.xlu0 %956 }
 0x360   : > { %v1002_v63 = vmul.f32 1.442695, %v982_v55  ;;  %v983_v6 = vsub.f32 %v6097_v30, %v957_v28 }
 0x361   : > { %v967_v17 = vpop.xlane.xlu1 %966 }
 0x362   : > { %5280 = vpow2.f32 %v1002_v63  ;;  %v1004_v38 = vmul.f32 1.442695, %v983_v6  ;;  %v988_v21 = vsub.f32 %v6106_v37, %v967_v17 }
 0x363   : > { %v969_v30 = vpop.xlane.xlu0 %968 }
 0x364   : > { %5282 = vpow2.f32 %v1004_v38  ;;  %v1014_v26 = vmul.f32 1.442695, %v988_v21  ;;  %v989_v33 = vsub.f32 %v6115_v46, %v969_v30 }
 0x365   : > { %5284 = vpow2.f32 %v1008_v8  ;;  %v963_v22 = vpop.xlane.xlu1 %962 }
 0x366   : > { %v986_v31 = vsub.f32 %v6123_v58, %v963_v22  ;;  %v1016_v41 = vmul.f32 1.442695, %v989_v33 }
 0x367   : > { %v965_v10 = vpop.xlane.xlu0 %964 }
 0x368   : > { %v1010_v36 = vmul.f32 1.442695, %v986_v31  ;;  %v987_v51 = vsub.f32 %v6131_v60, %v965_v10 }
 0x369   : > { %v975_v40 = vpop.xlane.xlu1 %974 }
 0x36a   : > { %v992_v37 = vsub.f32 %v6139_v1, %v975_v40 }
 0x36b   : > { %v6190_v9 = vpop.eup %5278  ;;  %v977_v12 = vpop.xlane.xlu0 %976 }
 0x36c   : > { %1038 = vadd.xlane.f32.xlu0 %v6190_v9  ;;  %v1022_v58 = vmul.f32 1.442695, %v992_v37  ;;  %v993_v60 = vsub.f32 %v6147_v4, %v977_v12 }
 0x36d   : > { %v971_v28 = vpop.xlane.xlu1 %970 }
 0x36e   : > { %v990_v63 = vsub.f32 %v6154_v7, %v971_v28  ;;  %v1024_v1 = vmul.f32 1.442695, %v993_v60 }
 0x36f   : > { %v6193_v16 = vpop.eup %5280  ;;  %v973_v13 = vpop.xlane.xlu0 %972 }
 0x370   : > { %1034 = vadd.xlane.f32.xlu0 %v6193_v16  ;;  %v991_v15 = vsub.f32 %v6158_v32, %v973_v13  ;;  %v1012_v32 = vmul.f32 1.442695, %v987_v51  ;;  %v1018_v6 = vmul.f32 1.442695, %v990_v63 }
 0x371   : > { %v6196_v20 = vpop.eup %5282 }
 0x372   : > { %1036 = vadd.xlane.f32.xlu1 %v6196_v20  ;;  %v6199_v25 = vpop.eup %5284  ;;  %v1020_v18 = vmul.f32 1.442695, %v991_v15 }
 0x374   : > { %1040 = vadd.xlane.f32.xlu0 %v6199_v25  ;;  %5286 = vpow2.f32 %v1020_v18 }
 0x375   : > { %5288 = vpow2.f32 %v1014_v26 }
 0x376   : > { %5290 = vpow2.f32 %v1010_v36 }
 0x377   : > { %5292 = vpow2.f32 %v1016_v41 }
 0x378   : > { %5294 = vpow2.f32 %v1012_v32  ;;  %v1306_v32 = vsel %vm800_vm1, %v6168_v24, 0 }
 0x379   : > { %5296 = vpow2.f32 %v1022_v58 }
 0x37a   : > { %5298 = vpow2.f32 %v1018_v6 }
 0x37b   : > { %5300 = vpow2.f32 %v1024_v1 }
 0x381   : > { %v6213_v55 = vpop.eup %5286 }
 0x382   : > { %v6218_v46 = vpop.eup %5288 }
 0x383   : > { %1252 = vrot.lane.b32.xlu1 %v5946_v50, %s5723_s24  ;;  %v6222_v8 = vpop.eup %5290 }
 0x384   : > { %v6225_v38 = vpop.eup %5292 }
 0x385   : > { %v6228_v7 = vpop.eup %5294 }
 0x386   : > { %v6233_v30 = vpop.eup %5296 }
 0x387   : > { %v6238_v12 = vpop.eup %5298 }
 0x388   : > { %v6243_v15 = vpop.eup %5300 }
 0x38a   : > { %1250 = vrot.lane.b32.xlu0 %v5964_v0, %s5723_s24 }
 0x38e   : > { %1248 = vrot.lane.b32.xlu0 %v5950_v56, %s5723_s24 }
 0x3a7   : > { %1052 = vadd.xlane.f32.xlu1 %v6213_v55 }
 0x3ad   : > { %1046 = vadd.xlane.f32.xlu0 %v6218_v46 }
 0x3b1   : > { %1042 = vadd.xlane.f32.xlu0 %v6222_v8 }
 0x3b5   : > { %1048 = vadd.xlane.f32.xlu0 %v6225_v38 }
 0x3b8   : > { %1244 = vrot.lane.b32.xlu1 %v5938_v34, %s5723_s24 }
 0x3b9   : > { %1044 = vadd.xlane.f32.xlu0 %v6228_v7 }
 0x3ba   : > { %v1031_v4 = vpop.xlane.xlu0 %1030 }
 0x3bc   : > { %1236 = vrot.lane.b32.xlu1 %v5946_v50, %s5724_s14 }
 0x3bd   : > { %1054 = vadd.xlane.f32.xlu0 %v6233_v30 }
 0x3be   : > { %v1027_v10 = vpop.xlane.xlu0 %1026 }
 0x3c0   : > { %1240 = vrot.lane.b32.xlu1 %v5958_v61, %s5724_s14 }
 0x3c1   : > { %1050 = vadd.xlane.f32.xlu0 %v6238_v12 }
 0x3c2   : > { %v1033_v13 = vpop.xlane.xlu0 %1032 }
 0x3c3   : > { %5302 = vrcp.f32 %v1033_v13 }
 0x3c4   : > { %5304 = vrcp.f32 %v1027_v10 }
 0x3c5   : > { %1056 = vadd.xlane.f32.xlu0 %v6243_v15  ;;  %5306 = vrcp.f32 %v1031_v4 }
 0x3c6   : > { %v1029_v17 = vpop.xlane.xlu0 %1028 }
 0x3c7   : > { %5308 = vrcp.f32 %v1029_v17 }
 0x3d0   : > { %v5303_v18 = vpop.eup %5302 }
 0x3d1   : > { %v5305_v21 = vpop.eup %5304  ;;  %v1077_v31 = vmul.f32 %v5303_v18, %v6178_v52 }
 0x3d2   : > { %v5307_v22 = vpop.eup %5306  ;;  %v1074_v33 = vmul.f32 %v5305_v21, %v6175_v48  ;;  %v1255_v48 = vpop.permute.xlu1 %1254 }
 0x3d3   : > { %v1076_v40 = vmul.f32 %v5307_v22, %v6172_v42  ;;  %v1303_v42 = vsel %vm800_vm1, %v6184_v27, 0  ;;  %v1300_v24 = vsel %vm800_vm1, %v1255_v48, 0 }
 0x3d4   : > { %v5309_v26 = vpop.eup %5308 }
 0x3d5   : > { %v1075_v36 = vmul.f32 %v5309_v26, %v6181_v53  ;;  %v1091_v51 = vpack.c.bf16 %v1077_v31, %v1076_v40 }
 0x3d7   : > { %v1090_v41 = vpack.c.bf16 %v1075_v36, %v1074_v33 }
 0x3d9   : > { %4832 = vmatprep.mubr.bf16.mxu0 %v1090_v41 }
 0x3da   : > { %4833 = vmatmul.mubr.bf16.vlgmr.msra.gmra.mxu0 %v1091_v51 }
 0x3db   : > { %4849 = vmatpush3.bf16.xpose.msra.mxu0 %v1306_v32  ;;  %1246 = vrot.lane.b32.xlu0 %v5969_v2, %s5723_s24  ;;  %s5731_s24 = smov 40  }
 0x3dc   : > { %5157 = vmatprep.subr.msk.bf16.mxu0 %vm800_vm1, %v6184_v27 }
 0x3df   : > { %1228 = vrot.lane.b32.xlu0 %v5938_v34, %s5724_s14 }
 0x3e3   : > { %4851 = vmatpush3.bf16.xpose.msra.mxu0 %v1303_v42  ;;  %1230 = vrot.lane.b32.xlu0 %v5969_v2, %s5724_s14 }
 0x3e4   : > { %5158 = vmatprep.subr.msk.bf16.mxu0 %vm800_vm1, %v1255_v48 }
 0x3e7   : > { %1232 = vrot.lane.b32.xlu0 %v5950_v56, %s5724_s14 }
 0x3eb   : > { %4853 = vmatpush3.bf16.xpose.msra.mxu0 %v1300_v24  ;;  %1234 = vrot.lane.b32.xlu0 %v5964_v0, %s5724_s14 }
 0x3ef   : > { %1238 = vrot.lane.b32.xlu0 %v5942_v44, %s5724_s14 }
 0x3f3   : > { %1242 = vrot.lane.b32.xlu0 %v5952_v57, %s5724_s14  ;;  %s8246_s14 = sld [smem:[#allocation41_spill]] }
 0x3f5   : > { %v1039_v52 = vpop.xlane.xlu0 %1038 }
 0x3f9   : > { %v1035_v53 = vpop.xlane.xlu0 %1034 }
 0x3fa   : > { %5310 = vrcp.f32 %v1035_v53 }
 0x3fb   : > { %5312 = vrcp.f32 %v1039_v52  ;;  %v1037_v27 = vpop.xlane.xlu1 %1036 }
 0x3fc   : > { %5314 = vrcp.f32 %v1037_v27 }
 0x3fd   : > { %v1041_v37 = vpop.xlane.xlu0 %1040 }
 0x3fe   : > { %5316 = vrcp.f32 %v1041_v37 }
 0x3ff   : > { %v1253_v28 = vpop.permute.xlu1 %1252 }
 0x400   : > { %5159 = vmatprep.subr.msk.bf16.mxu0 %vm800_vm1, %v1253_v28  ;;  %v1297_v58 = vsel %vm800_vm1, %v1253_v28, 0 }
 0x401   : > { %4855 = vmatpush3.bf16.xpose.msra.mxu0 %v1297_v58  ;;  %v1251_v63 = vpop.permute.xlu0 %1250 }
 0x402   : > { %5160 = vmatprep.subr.msk.bf16.mxu0 %vm800_vm1, %v1251_v63  ;;  %v1294_v1 = vsel %vm800_vm1, %v1251_v63, 0 }
 0x405   : > { %v1249_v10 = vpop.permute.xlu0 %1248 }
 0x406   : > { %v1291_v33 = vsel %vm800_vm1, %v1249_v10, 0 }
 0x407   : > { %v5311_v60 = vpop.eup %5310 }
 0x408   : > { %v5313_v6 = vpop.eup %5312  ;;  %v1078_v13 = vmul.f32 %v5311_v60, %v6193_v16 }
 0x409   : > { %v5315_v4 = vpop.eup %5314  ;;  %4857 = vmatpush3.bf16.xpose.msra.mxu0 %v1294_v1  ;;  %v1080_v22 = vmul.f32 %v5313_v6, %v6190_v9 }
 0x40a   : > { %5161 = vmatprep.subr.msk.bf16.mxu0 %vm800_vm1, %v1249_v10  ;;  %v1079_v17 = vmul.f32 %v5315_v4, %v6196_v20 }
 0x40b   : > { %v5317_v18 = vpop.eup %5316 }
 0x40c   : > { %v1092_v21 = vpack.c.bf16 %v1079_v17, %v1078_v13  ;;  %v1081_v26 = vmul.f32 %v5317_v18, %v6199_v25 }
 0x40e   : > { %4836 = vmatprep.mubr.bf16.mxu0 %v1092_v21  ;;  %v1093_v31 = vpack.c.bf16 %v1081_v26, %v1080_v22 }
 0x410   : > { %4837 = vmatmul.mubr.bf16.gmra.mxu0 %v1093_v31 }
 0x411   : > { %4859 = vmatpush3.bf16.xpose.msra.mxu0 %v1291_v33 }
 0x430   : > { %v1053_v20 = vpop.xlane.xlu1 %1052 }
 0x434   : > { %v1245_v60 = vpop.permute.xlu1 %1244 }
 0x436   : > { %v1047_v36 = vpop.xlane.xlu0 %1046 }
 0x438   : > { %v1237_v31 = vpop.permute.xlu1 %1236 }
 0x43a   : > { %v1043_v40 = vpop.xlane.xlu0 %1042 }
 0x43e   : > { %v1049_v41 = vpop.xlane.xlu0 %1048 }
 0x43f   : > { %5318 = vrcp.f32 %v1049_v41 }
 0x440   : > { %5320 = vrcp.f32 %v1043_v40 }
 0x441   : > { %5322 = vrcp.f32 %v1047_v36 }
 0x442   : > { %v1045_v16 = vpop.xlane.xlu0 %1044 }
 0x443   : > { %5324 = vrcp.f32 %v1045_v16 }
 0x444   : > { %5326 = vrcp.f32 %v1053_v20 }
 0x446   : > { %v1055_v51 = vpop.xlane.xlu0 %1054 }
 0x44a   : > { %v1051_v9 = vpop.xlane.xlu0 %1050 }
 0x44b   : > { %5328 = vrcp.f32 %v1051_v9 }
 0x44c   : > { %v5319_v25 = vpop.eup %5318  ;;  %5330 = vrcp.f32 %v1055_v51 }
 0x44d   : > { %v5321_v32 = vpop.eup %5320  ;;  %v1085_v52 = vmul.f32 %v5319_v25, %v6225_v38 }
 0x44e   : > { %v1057_v42 = vpop.xlane.xlu0 %1056  ;;  %v5323_v48 = vpop.eup %5322  ;;  %v1082_v53 = vmul.f32 %v5321_v32, %v6222_v8 }
 0x44f   : > { %5332 = vrcp.f32 %v1057_v42  ;;  %v1084_v28 = vmul.f32 %v5323_v48, %v6218_v46  ;;  %v1285_v46 = vsel %vm800_vm1, %v1245_v60, 0 }
 0x450   : > { %v5325_v24 = vpop.eup %5324 }
 0x451   : > { %v1083_v27 = vmul.f32 %v5325_v24, %v6228_v7  ;;  %v1095_v6 = vpack.c.bf16 %v1085_v52, %v1084_v28  ;;  %v5327_v1 = vpop.eup %5326 }
 0x452   : > { %v1247_v37 = vpop.permute.xlu0 %1246  ;;  %v1087_v7 = vmul.f32 %v5327_v1, %v6213_v55 }
 0x453   : > { %5162 = vmatprep.subr.msk.bf16.mxu0 %vm800_vm1, %v1247_v37  ;;  %v1288_v58 = vsel %vm800_vm1, %v1247_v37, 0  ;;  %v1094_v63 = vpack.c.bf16 %v1083_v27, %v1082_v53 }
 0x454   : > { %4861 = vmatpush3.bf16.xpose.msra.mxu0 %v1288_v58 }
 0x455   : > { %4840 = vmatprep.mubr.bf16.mxu0 %v1094_v63  ;;  %5163 = vmatprep.subr.msk.bf16.mxu0 %vm800_vm1, %v1245_v60 }
 0x456   : > { %4841 = vmatmul.mubr.bf16.gmra.mxu0 %v1095_v6  ;;  %v1229_v17 = vpop.permute.xlu0 %1228 }
 0x458   : > { %v5329_v38 = vpop.eup %5328 }
 0x459   : > { %v1086_v8 = vmul.f32 %v5329_v38, %v6238_v12  ;;  %v5331_v4 = vpop.eup %5330 }
 0x45a   : > { %v1088_v18 = vmul.f32 %v5331_v4, %v6233_v30  ;;  %v1231_v26 = vpop.permute.xlu0 %1230  ;;  %v1241_v30 = vpop.permute.xlu1 %1240 }
 0x45b   : > { %v1096_v10 = vpack.c.bf16 %v1087_v7, %v1086_v8 }
 0x45c   : > { %v5333_v13 = vpop.eup %5332  ;;  %4863 = vmatpush3.bf16.xpose.msra.mxu0 %v1285_v46 }
 0x45d   : > { %4844 = vmatprep.mubr.bf16.mxu0 %v1096_v10  ;;  %v1089_v21 = vmul.f32 %v5333_v13, %v6243_v15 }
 0x45e   : > { %v1233_v12 = vpop.permute.xlu0 %1232 }
 0x45f   : > { %v1097_v22 = vpack.c.bf16 %v1089_v21, %v1088_v18 }
 0x461   : > { %4845 = vmatmul.mubr.bf16.gmra.mxu0 %v1097_v22 }
 0x462   : > { %4864 = vmatprep.mubr.msk.bf16.mxu0 %vm800_vm1, %v1229_v17  ;;  %v1235_v55 = vpop.permute.xlu0 %1234 }
 0x466   : > { %v1239_v33 = vpop.permute.xlu0 %1238 }
 0x469   : > { %4865 = vmatmul.mubr.msk.bf16.vlgmr.msra.gmra.mxu0 %vm800_vm1, %v1231_v26 }
 0x46a   : > { %4868 = vmatprep.mubr.msk.bf16.mxu0 %vm800_vm1, %v1233_v12  ;;  %v1243_v15 = vpop.permute.xlu0 %1242 }
 0x471   : > { %4869 = vmatmul.mubr.msk.bf16.gmra.mxu0 %vm800_vm1, %v1235_v55 }
 0x472   : > { %4872 = vmatprep.mubr.msk.bf16.mxu0 %vm800_vm1, %v1237_v31 }
 0x479   : > { %4873 = vmatmul.mubr.msk.bf16.gmra.mxu0 %vm800_vm1, %v1239_v33 }
 0x47a   : > { %4876 = vmatprep.mubr.msk.bf16.mxu0 %vm800_vm1, %v1241_v30 }
 0x481   : > { %4877 = vmatmul.mubr.msk.bf16.gmra.mxu0 %vm800_vm1, %v1243_v15 }
 0x49a   : > { %v6302_v36 = vpop.f32.mrf.mxu0 }
 0x49c   : > { %v6304_v40 = vpop.f32.mrf.mxu0 }
 0x49e   : > { %v6306_v41 = vpop.f32.mrf.mxu0 }
 0x4a0   : > { %v6310_v20 = vpop.f32.mrf.mxu0 }
 0x4d0   : > { %v6312_v51 = vpop.f32.mrf.mxu0 }
 0x4d2   : > { %v6314_v9 = vpop.f32.mrf.mxu0 }
 0x4d4   : > { %v6316_v25 = vpop.f32.mrf.mxu0 }
 0x4d6   : > { %v6320_v42 = vpop.f32.mrf.mxu0 }
 0x516   : > { %v6324_v24 = vpop.f32.mrf.mxu0 }
 0x518   : > { %v6326_v52 = vpop.f32.mrf.mxu0 }
 0x51a   : > { %v6328_v53 = vpop.f32.mrf.mxu0 }
 0x51c   : > { %v6332_v37 = vpop.f32.mrf.mxu0 }
 0x521   : > { %v6336_v58 = vpop.f32.mrf.mxu0 }
 0x523   : > { %v6338_v63 = vpop.f32.mrf.mxu0 }
 0x525   : > { %v6340_v60 = vpop.f32.mrf.mxu0 }
 0x527   : > { %v6344_v1 = vpop.f32.mrf.mxu0 }
 0x529   : > { %v4866_v8 = vpop.f32.mrf.mxu0 }
 0x52a   : > { %v1351_v7 = vadd.f32 %v4866_v8, %v6020_v39 }
 0x52b   : > { %v1342_v4 = vpop.f32.mrf.mxu0 }
 0x52c   : > { %v1343_v46 = vadd.f32 %v1342_v4, %v6028_v43  ;;  %1409 = vmax.xlane.f32.xlu0 %v1351_v7 }
 0x52d   : > { %v4867_v10 = vpop.f32.mrf.mxu0 }
 0x52e   : > { %1405 = vmax.xlane.f32.xlu1 %v1343_v46  ;;  %v1354_v17 = vadd.f32 %v4867_v10, %v6039_v49 }
 0x52f   : > { %v1345_v13 = vpop.f32.mrf.mxu0 }
 0x530   : > { %v6352_v18 = vadd.f32 %v1345_v13, %v6033_v47 }
 0x531   : > { %v4870_v21 = vpop.f32.mrf.mxu0 }
 0x532   : > { %1407 = vmax.xlane.f32.xlu0 %v6352_v18  ;;  %1411 = vmax.xlane.f32.xlu1 %v1354_v17  ;;  %v6360_v30 = vadd.f32 %v4870_v21, %v6063_v11 }
 0x533   : > { %v1358_v22 = vpop.f32.mrf.mxu0 }
 0x534   : > { %v6368_v4 = vadd.f32 %v1358_v22, %v6076_v19 }
 0x535   : > { %v4871_v26 = vpop.f32.mrf.mxu0 }
 0x536   : > { %v6363_v15 = vadd.f32 %v4871_v26, %v6068_v14 }
 0x537   : > { %v1361_v12 = vpop.f32.mrf.mxu0 }
 0x538   : > { %v6371_v10 = vadd.f32 %v1361_v12, %v6085_v23 }
 0x539   : > { %v4874_v55 = vpop.f32.mrf.mxu0 }
 0x53a   : > { %v6376_v21 = vadd.f32 %v4874_v55, %v6094_v29 }
 0x53b   : > { %v1374_v31 = vpop.f32.mrf.mxu0 }
 0x53c   : > { %v6384_v22 = vadd.f32 %v1374_v31, %v6112_v45 }
 0x53d   : > { %v4875_v33 = vpop.f32.mrf.mxu0 }
 0x53e   : > { %v6379_v26 = vadd.f32 %v4875_v33, %v6103_v35 }
 0x53f   : > { %v1377_v8 = vpop.f32.mrf.mxu0 }
 0x540   : > { %v6387_v12 = vadd.f32 %v1377_v8, %v6120_v54 }
 0x541   : > { %v4878_v13 = vpop.f32.mrf.mxu0 }
 0x542   : > { %v6392_v55 = vadd.f32 %v4878_v13, %v6128_v59 }
 0x543   : > { %1569 = vrot.lane.b32.xlu1 %v5958_v61, %s5725_s17  ;;  %v1390_v6 = vpop.f32.mrf.mxu0 }
 0x544   : > { %v6400_v31 = vadd.f32 %v1390_v6, %v6144_v3 }
 0x545   : > { %v4879_v38 = vpop.f32.mrf.mxu0 }
 0x546   : > { %v6395_v33 = vadd.f32 %v4879_v38, %v6136_v62 }
 0x547   : > { %v1393_v27 = vpop.f32.mrf.mxu0 }
 0x548   : > { %1571 = vrot.lane.b32.xlu0 %v5952_v57, %s5725_s17  ;;  %v6403_v8 = vadd.f32 %v1393_v27, %v6151_v5 }
 0x567   : > { %1417 = vmax.xlane.f32.xlu0 %v6360_v30  ;;  %1419 = vmax.xlane.f32.xlu1 %v6363_v15 }
 0x56b   : > { %1415 = vmax.xlane.f32.xlu1 %v6371_v10  ;;  %1413 = vmax.xlane.f32.xlu0 %v6368_v4 }
 0x56f   : > { %1425 = vmax.xlane.f32.xlu0 %v6376_v21  ;;  %1427 = vmax.xlane.f32.xlu1 %v6379_v26 }
 0x573   : > { %1423 = vmax.xlane.f32.xlu1 %v6387_v12  ;;  %1421 = vmax.xlane.f32.xlu0 %v6384_v22 }
 0x577   : > { %1433 = vmax.xlane.f32.xlu0 %v6392_v55  ;;  %1435 = vmax.xlane.f32.xlu1 %v6395_v33 }
 0x57b   : > { %1431 = vmax.xlane.f32.xlu1 %v6403_v8  ;;  %1429 = vmax.xlane.f32.xlu0 %v6400_v31 }
 0x591   : > { %1567 = vrot.lane.b32.xlu0 %v5942_v44, %s5725_s17 }
 0x595   : > { %1565 = vrot.lane.b32.xlu0 %v5946_v50, %s5725_s17 }
 0x599   : > { %1563 = vrot.lane.b32.xlu0 %v5964_v0, %s5725_s17 }
 0x59d   : > { %1561 = vrot.lane.b32.xlu0 %v5950_v56, %s5725_s17 }
 0x5a1   : > { %1557 = vrot.lane.b32.xlu0 %v5938_v34, %s5725_s17 }
 0x5b5   : > { %v1410_v27 = vpop.xlane.xlu0 %1409 }
 0x5b6   : > { %v1439_v6 = vsub.f32 %v1351_v7, %v1410_v27 }
 0x5b7   : > { %v1406_v38 = vpop.xlane.xlu1 %1405 }
 0x5b8   : > { %v1457_v13 = vmul.f32 1.442695, %v1439_v6  ;;  %v1437_v28 = vsub.f32 %v1343_v46, %v1406_v38 }
 0x5ba   : > { %5334 = vpow2.f32 %v1457_v13  ;;  %v1453_v32 = vmul.f32 1.442695, %v1437_v28 }
 0x5bb   : > { %v1412_v48 = vpop.xlane.xlu1 %1411  ;;  %v1408_v16 = vpop.xlane.xlu0 %1407 }
 0x5bc   : > { %v1440_v5 = vsub.f32 %v1354_v17, %v1412_v48  ;;  %5336 = vpow2.f32 %v1453_v32  ;;  %v1438_v3 = vsub.f32 %v6352_v18, %v1408_v16 }
 0x5be   : > { %v1459_v62 = vmul.f32 1.442695, %v1440_v5  ;;  %v1455_v7 = vmul.f32 1.442695, %v1438_v3 }
 0x5bf   : > { %v1572_v59 = vpop.permute.xlu0 %1571  ;;  %v1570_v54 = vpop.permute.xlu1 %1569 }
 0x5c0   : > { %4880 = vmatprep.subr.bf16.mxu0 %v1572_v59  ;;  %5132 = vmatprep.subr.bf16.mxu1 %v1572_v59  ;;  %5338 = vpow2.f32 %v1459_v62 }
 0x5c1   : > { %4881 = vmatpush3.bf16.msra.mxu0 %v1572_v59  ;;  %5140 = vmatpush3.bf16.msra.mxu1 %v1572_v59  ;;  %5340 = vpow2.f32 %v1455_v7 }
 0x5c2   : > { %4882 = vmatprep.subr.bf16.mxu0 %v1570_v54  ;;  %5133 = vmatprep.subr.bf16.mxu1 %v1570_v54 }
 0x5c5   : > { %4883 = vmatpush3.bf16.msra.mxu0 %v1570_v54  ;;  %5141 = vmatpush3.bf16.msra.mxu1 %v1570_v54 }
 0x5c7   : > { %v6418_v28 = vpop.eup %5334 }
 0x5c8   : > { %1489 = vadd.xlane.f32.xlu1 %v6418_v28 }
 0x5c9   : > { %v6421_v5 = vpop.eup %5336 }
 0x5cc   : > { %1485 = vadd.xlane.f32.xlu1 %v6421_v5 }
 0x5cd   : > { %v6424_v16 = vpop.eup %5338 }
 0x5ce   : > { %v6427_v59 = vpop.eup %5340 }
 0x5d0   : > { %1491 = vadd.xlane.f32.xlu1 %v6424_v16 }
 0x5d4   : > { %1487 = vadd.xlane.f32.xlu1 %v6427_v59 }
 0x5e5   : > { %1559 = vrot.lane.b32.xlu1 %v5969_v2, %s5725_s17 }
 0x5f0   : > { %v1420_v54 = vpop.xlane.xlu1 %1419  ;;  %v1418_v62 = vpop.xlane.xlu0 %1417 }
 0x5f1   : > { %v1443_v48 = vsub.f32 %v6360_v30, %v1418_v62  ;;  %v1444_v18 = vsub.f32 %v6363_v15, %v1420_v54 }
 0x5f3   : > { %v1465_v7 = vmul.f32 1.442695, %v1443_v48  ;;  %v1467_v45 = vmul.f32 1.442695, %v1444_v18 }
 0x5f4   : > { %v1416_v3 = vpop.xlane.xlu1 %1415  ;;  %v1414_v32 = vpop.xlane.xlu0 %1413 }
 0x5f5   : > { %v1442_v46 = vsub.f32 %v6371_v10, %v1416_v3  ;;  %v1441_v17 = vsub.f32 %v6368_v4, %v1414_v32 }
 0x5f7   : > { %v1463_v27 = vmul.f32 1.442695, %v1442_v46  ;;  %v1461_v6 = vmul.f32 1.442695, %v1441_v17 }
 0x5f8   : > { %v1428_v38 = vpop.xlane.xlu1 %1427  ;;  %v1426_v13 = vpop.xlane.xlu0 %1425 }
 0x5f9   : > { %5342 = vpow2.f32 %v1463_v27  ;;  %v1447_v10 = vsub.f32 %v6376_v21, %v1426_v13  ;;  %v1448_v15 = vsub.f32 %v6379_v26, %v1428_v38 }
 0x5fa   : > { %5344 = vpow2.f32 %v1461_v6 }
 0x5fb   : > { %5346 = vpow2.f32 %v1465_v7  ;;  %v1473_v32 = vmul.f32 1.442695, %v1447_v10  ;;  %v1475_v48 = vmul.f32 1.442695, %v1448_v15 }
 0x5fc   : > { %v1424_v35 = vpop.xlane.xlu1 %1423  ;;  %v1422_v29 = vpop.xlane.xlu0 %1421  ;;  %5348 = vpow2.f32 %v1467_v45 }
 0x5fd   : > { %v1446_v23 = vsub.f32 %v6387_v12, %v1424_v35  ;;  %v1445_v30 = vsub.f32 %v6384_v22, %v1422_v29 }
 0x5ff   : > { %v1471_v4 = vmul.f32 1.442695, %v1446_v23  ;;  %v1469_v54 = vmul.f32 1.442695, %v1445_v30 }
 0x600   : > { %v1436_v62 = vpop.xlane.xlu1 %1435  ;;  %v1434_v3 = vpop.xlane.xlu0 %1433 }
 0x601   : > { %5350 = vpow2.f32 %v1469_v54  ;;  %v1451_v45 = vsub.f32 %v6392_v55, %v1434_v3  ;;  %v1452_v23 = vsub.f32 %v6395_v33, %v1436_v62 }
 0x602   : > { %5352 = vpow2.f32 %v1471_v4 }
 0x603   : > { %5354 = vpow2.f32 %v1473_v32  ;;  %v1483_v55 = vmul.f32 1.442695, %v1452_v23 }
 0x604   : > { %v1432_v46 = vpop.xlane.xlu1 %1431  ;;  %v1430_v17 = vpop.xlane.xlu0 %1429  ;;  %5356 = vpow2.f32 %v1475_v48 }
 0x605   : > { %v1450_v18 = vsub.f32 %v6403_v8, %v1432_v46  ;;  %v1449_v35 = vsub.f32 %v6400_v31, %v1430_v17  ;;  %v1481_v31 = vmul.f32 1.442695, %v1451_v45  ;;  %v6520_v45 = vld [vmem:[%s8147_s3 + $0x4] sm:$0xf] }
 0x606   : > { %v6442_v29 = vpop.eup %5342 }
 0x607   : > { %v1479_v21 = vmul.f32 1.442695, %v1450_v18  ;;  %v1477_v26 = vmul.f32 1.442695, %v1449_v35  ;;  %1495 = vadd.xlane.f32.xlu0 %v6442_v29  ;;  %v6447_v22 = vpop.eup %5344  ;;  %v1227_v35 = vld [vmem:[%s8147_s3] sm:$0xf] }
 0x608   : > { %v1568_v12 = vpop.permute.xlu0 %1567  ;;  %v6450_v8 = vpop.eup %5346 }
 0x609   : > { %1493 = vadd.xlane.f32.xlu1 %v6447_v22  ;;  %4884 = vmatprep.subr.bf16.mxu0 %v1568_v12  ;;  %5358 = vpow2.f32 %v1477_v26  ;;  %v6453_v33 = vpop.eup %5348 }
 0x60a   : > { %5134 = vmatprep.subr.bf16.mxu1 %v1568_v12  ;;  %4885 = vmatpush3.bf16.msra.mxu0 %v1568_v12  ;;  %5360 = vpow2.f32 %v1479_v21 }
 0x60b   : > { %5142 = vmatpush3.bf16.msra.mxu1 %v1568_v12  ;;  %1497 = vadd.xlane.f32.xlu0 %v6450_v8  ;;  %5362 = vpow2.f32 %v1481_v31 }
 0x60c   : > { %v1566_v27 = vpop.permute.xlu0 %1565  ;;  %5364 = vpow2.f32 %v1483_v55 }
 0x60d   : > { %1499 = vadd.xlane.f32.xlu1 %v6453_v33  ;;  %4886 = vmatprep.subr.bf16.mxu0 %v1566_v27 }
 0x60e   : > { %5135 = vmatprep.subr.bf16.mxu1 %v1566_v27  ;;  %4887 = vmatpush3.bf16.msra.mxu0 %v1566_v27  ;;  %v6456_v6 = vpop.eup %5350 }
 0x60f   : > { %5143 = vmatpush3.bf16.msra.mxu1 %v1566_v27  ;;  %v6458_v38 = vpop.eup %5352  ;;  %1501 = vadd.xlane.f32.xlu0 %v6456_v6 }
 0x610   : > { %v1564_v13 = vpop.permute.xlu0 %1563  ;;  %v6462_v7 = vpop.eup %5354 }
 0x611   : > { %1503 = vadd.xlane.f32.xlu1 %v6458_v38  ;;  %4888 = vmatprep.subr.bf16.mxu0 %v1564_v13  ;;  %v6464_v30 = vpop.eup %5356 }
 0x612   : > { %5136 = vmatprep.subr.bf16.mxu1 %v1564_v13  ;;  %4889 = vmatpush3.bf16.msra.mxu0 %v1564_v13 }
 0x613   : > { %5144 = vmatpush3.bf16.msra.mxu1 %v1564_v13  ;;  %1505 = vadd.xlane.f32.xlu0 %v6462_v7 }
 0x614   : > { %v1562_v10 = vpop.permute.xlu0 %1561 }
 0x615   : > { %1507 = vadd.xlane.f32.xlu1 %v6464_v30  ;;  %4890 = vmatprep.subr.bf16.mxu0 %v1562_v10 }
 0x616   : > { %5137 = vmatprep.subr.bf16.mxu1 %v1562_v10  ;;  %4891 = vmatpush3.bf16.msra.mxu0 %v1562_v10  ;;  %v6468_v15 = vpop.eup %5358 }
 0x617   : > { %5145 = vmatpush3.bf16.msra.mxu1 %v1562_v10  ;;  %v6470_v4 = vpop.eup %5360  ;;  %1509 = vadd.xlane.f32.xlu0 %v6468_v15 }
 0x618   : > { %v6474_v54 = vpop.eup %5362  ;;  %v1558_v18 = vpop.permute.xlu0 %1557 }
 0x619   : > { %1511 = vadd.xlane.f32.xlu1 %v6470_v4  ;;  %v6476_v62 = vpop.eup %5364 }
 0x61b   : > { %1513 = vadd.xlane.f32.xlu0 %v6474_v54 }
 0x61d   : > { %1515 = vadd.xlane.f32.xlu1 %v6476_v62 }
 0x62e   : > { %1965 = vrot.lane.b32.xlu1 %v5958_v61, %s5726_s30 }
 0x631   : > { %1967 = vrot.lane.b32.xlu0 %v5952_v57, %s5726_s30 }
 0x632   : > { %1963 = vrot.lane.b32.xlu1 %v5942_v44, %s5726_s30 }
 0x635   : > { %1961 = vrot.lane.b32.xlu0 %v5946_v50, %s5726_s30 }
 0x636   : > { %1959 = vrot.lane.b32.xlu1 %v5964_v0, %s5726_s30 }
 0x639   : > { %1957 = vrot.lane.b32.xlu0 %v5950_v56, %s5726_s30 }
 0x63a   : > { %1955 = vrot.lane.b32.xlu1 %v5969_v2, %s5726_s30 }
 0x63d   : > { %1953 = vrot.lane.b32.xlu0 %v5938_v34, %s5726_s30  ;;  %s8060_s30 = scalar_lea.vmem [#allocation5], %s4457_s12  ;;  %s4315_s12 = scalar_lea.sflag [#allocation4], %s5893_s13 }
 0x63e   : > { %1937 = vrot.lane.b32.xlu1 %v5938_v34, %s5727_s25 }
 0x641   : > { %1939 = vrot.lane.b32.xlu0 %v5969_v2, %s5727_s25 }
 0x642   : > { %1941 = vrot.lane.b32.xlu1 %v5950_v56, %s5727_s25 }
 0x645   : > { %1943 = vrot.lane.b32.xlu0 %v5964_v0, %s5727_s25 }
 0x646   : > { %1945 = vrot.lane.b32.xlu1 %v5946_v50, %s5727_s25 }
 0x649   : > { %1947 = vrot.lane.b32.xlu0 %v5942_v44, %s5727_s25 }
 0x64a   : > { %1949 = vrot.lane.b32.xlu1 %v5958_v61, %s5727_s25 }
 0x64d   : > { %1951 = vrot.lane.b32.xlu0 %v5952_v57, %s5727_s25 }
 0x64e   : > { %2567 = vrot.lane.b32.xlu1 %v5952_v57, %s5728_s18 }
 0x651   : > { %v1490_v3 = vpop.xlane.xlu1 %1489  ;;  %2565 = vrot.lane.b32.xlu0 %v5958_v61, %s5728_s18 }
 0x652   : > { %2563 = vrot.lane.b32.xlu1 %v5942_v44, %s5728_s18 }
 0x655   : > { %v1486_v32 = vpop.xlane.xlu1 %1485  ;;  %2561 = vrot.lane.b32.xlu0 %v5946_v50, %s5728_s18 }
 0x656   : > { %2559 = vrot.lane.b32.xlu1 %v5964_v0, %s5728_s18 }
 0x659   : > { %v1492_v48 = vpop.xlane.xlu1 %1491  ;;  %2557 = vrot.lane.b32.xlu0 %v5950_v56, %s5728_s18 }
 0x65a   : > { %2555 = vrot.lane.b32.xlu1 %v5969_v2, %s5728_s18  ;;  %5366 = vrcp.f32 %v1492_v48 }
 0x65b   : > { %5368 = vrcp.f32 %v1486_v32  ;;  %v1219_v32 = vpack.c.bf16 %v6310_v20, %v6304_v40  ;;  %v8206_v40 = vpack.c.bf16 %v6316_v25, %v6312_v51  ;;  %v8207_v20 = vpack.c.bf16 %v6332_v37, %v6326_v52 }
 0x65c   : > { %5370 = vrcp.f32 %v1490_v3  ;;  %v8210_v51 = vpack.c.bf16 %v6340_v60, %v6336_v58 }
 0x65d   : > { %v1488_v46 = vpop.xlane.xlu1 %1487  ;;  %2553 = vrot.lane.b32.xlu0 %v5938_v34, %s5728_s18 }
 0x65e   : > { %5372 = vrcp.f32 %v1488_v46  ;;  %2537 = vrot.lane.b32.xlu1 %v5938_v34, %s5729_s20 }
 0x661   : > { %v1560_v17 = vpop.permute.xlu1 %1559  ;;  %2539 = vrot.lane.b32.xlu0 %v5969_v2, %s5729_s20 }
 0x662   : > { %2541 = vrot.lane.b32.xlu1 %v5950_v56, %s5729_s20  ;;  %4892 = vmatprep.subr.bf16.mxu0 %v1560_v17 }
 0x663   : > { %5138 = vmatprep.subr.bf16.mxu1 %v1560_v17  ;;  %4893 = vmatpush3.bf16.msra.mxu0 %v1560_v17 }
 0x664   : > { %5146 = vmatpush3.bf16.msra.mxu1 %v1560_v17  ;;  %4894 = vmatprep.subr.bf16.mxu0 %v1558_v18 }
 0x665   : > { %5139 = vmatprep.subr.bf16.mxu1 %v1558_v18  ;;  %2543 = vrot.lane.b32.xlu0 %v5964_v0, %s5729_s20 }
 0x666   : > { %2545 = vrot.lane.b32.xlu1 %v5946_v50, %s5729_s20 }
 0x667   : > { %v5367_v23 = vpop.eup %5366  ;;  %4895 = vmatpush3.bf16.msra.mxu0 %v1558_v18 }
 0x668   : > { %5147 = vmatpush3.bf16.msra.mxu1 %v1558_v18  ;;  %v5369_v21 = vpop.eup %5368  ;;  %5165 = vmatprep.subr.msk.bf16.mxu0 %vm1712_vm4, %v1227_v35  ;;  %v1536_v31 = vmul.f32 %v5367_v23, %v6424_v16  ;;  %v1838_v16 = vsel %vm1712_vm4, %v1227_v35, 0 }
 0x669   : > { %5164 = vmatprep.subr.msk.bf16.mxu1 %vm1712_vm4, %v6520_v45  ;;  %v5371_v26 = vpop.eup %5370  ;;  %2547 = vrot.lane.b32.xlu0 %v5942_v44, %s5729_s20  ;;  %v1533_v55 = vmul.f32 %v5369_v21, %v6421_v5  ;;  %v8205_v5 = vpack.c.bf16 %v6320_v42, %v6314_v9 }
 0x66a   : > { %2549 = vrot.lane.b32.xlu1 %v5958_v61, %s5729_s20  ;;  %v1535_v13 = vmul.f32 %v5371_v26, %v6418_v28  ;;  %v8204_v28 = vpack.c.bf16 %v6306_v41, %v6302_v36  ;;  %v8208_v36 = vpack.c.bf16 %v6328_v53, %v6324_v24  ;;  %v8209_v41 = vpack.c.bf16 %v6344_v1, %v6338_v63 }
 0x66b   : > { %v5373_v12 = vpop.eup %5372 }
 0x66c   : > { %v1534_v27 = vmul.f32 %v5373_v12, %v6427_v59  ;;  %v1550_v3 = vpack.c.bf16 %v1536_v31, %v1535_v13 }
 0x66d   : > { %2551 = vrot.lane.b32.xlu0 %v5952_v57, %s5729_s20 }
 0x66e   : > { %2278 = vrot.lane.b32.xlu1 %v5958_v61, %s5730_s23  ;;  %v1549_v10 = vpack.c.bf16 %v1534_v27, %v1533_v55 }
 0x670   : > { %4896 = vmatprep.mubr.bf16.mxu0 %v1549_v10 }
 0x671   : > { %4897 = vmatmul.mubr.bf16.vlgmr.msra.gmra.mxu0 %v1550_v3  ;;  %2280 = vrot.lane.b32.xlu0 %v5952_v57, %s5730_s23 }
 0x672   : > { %4932 = vmatprep.mubr.msk.bf16.mxu0 %vm800_vm1, %v1219_v32  ;;  %4931 = vmatpush3.bf16.msra.mxu0 %v1838_v16 }
 0x679   : > { %4933 = vmatmul.mubr.msk.bf16.vlgmr.msra.gmra.mxu0 %vm800_vm1, %v8204_v28 }
 0x67a   : > { %4936 = vmatprep.mubr.msk.bf16.mxu0 %vm800_vm1, %v8205_v5 }
 0x681   : > { %4937 = vmatmul.mubr.msk.bf16.gmra.mxu0 %vm800_vm1, %v8206_v40 }
 0x682   : > { %4940 = vmatprep.mubr.msk.bf16.mxu0 %vm800_vm1, %v8207_v20 }
 0x689   : > { %4941 = vmatmul.mubr.msk.bf16.gmra.mxu0 %vm800_vm1, %v8208_v36 }
 0x68a   : > { %4944 = vmatprep.mubr.msk.bf16.mxu0 %vm800_vm1, %v8209_v41 }
 0x690   : > { %v1496_v9 = vpop.xlane.xlu0 %1495 }
 0x691   : > { %5374 = vrcp.f32 %v1496_v9  ;;  %4945 = vmatmul.mubr.msk.bf16.gmra.mxu0 %vm800_vm1, %v8210_v51 }
 0x692   : > { %v1494_v25 = vpop.xlane.xlu1 %1493 }
 0x693   : > { %5376 = vrcp.f32 %v1494_v25 }
 0x694   : > { %v1498_v42 = vpop.xlane.xlu0 %1497 }
 0x695   : > { %5378 = vrcp.f32 %v1498_v42 }
 0x696   : > { %v1500_v52 = vpop.xlane.xlu1 %1499 }
 0x697   : > { %5380 = vrcp.f32 %v1500_v52 }
 0x698   : > { %v1502_v24 = vpop.xlane.xlu0 %1501 }
 0x699   : > { %5382 = vrcp.f32 %v1502_v24 }
 0x69a   : > { %v1504_v53 = vpop.xlane.xlu1 %1503 }
 0x69b   : > { %5384 = vrcp.f32 %v1504_v53 }
 0x69c   : > { %v1506_v37 = vpop.xlane.xlu0 %1505 }
 0x69d   : > { %5386 = vrcp.f32 %v1506_v37 }
 0x69e   : > { %v5375_v63 = vpop.eup %5374  ;;  %v1508_v1 = vpop.xlane.xlu1 %1507 }
 0x69f   : > { %5388 = vrcp.f32 %v1508_v1  ;;  %v1538_v60 = vmul.f32 %v5375_v63, %v6442_v29  ;;  %v1714_v29 = vsel %vm1712_vm4, %v6520_v45, 0 }
 0x6a0   : > { %v5377_v59 = vpop.eup %5376  ;;  %v1510_v48 = vpop.xlane.xlu0 %1509 }
 0x6a1   : > { %v1537_v58 = vmul.f32 %v5377_v59, %v6447_v22  ;;  %5390 = vrcp.f32 %v1510_v48 }
 0x6a2   : > { %v5379_v46 = vpop.eup %5378  ;;  %v1512_v17 = vpop.xlane.xlu1 %1511 }
 0x6a3   : > { %5392 = vrcp.f32 %v1512_v17  ;;  %v1551_v18 = vpack.c.bf16 %v1538_v60, %v1537_v58  ;;  %v1539_v21 = vmul.f32 %v5379_v46, %v6450_v8 }
 0x6a4   : > { %v5381_v35 = vpop.eup %5380  ;;  %v1514_v23 = vpop.xlane.xlu0 %1513 }
 0x6a5   : > { %4900 = vmatprep.mubr.bf16.mxu1 %v1551_v18  ;;  %v1540_v26 = vmul.f32 %v5381_v35, %v6453_v33  ;;  %5394 = vrcp.f32 %v1514_v23 }
 0x6a6   : > { %v1516_v12 = vpop.xlane.xlu1 %1515  ;;  %v5383_v31 = vpop.eup %5382 }
 0x6a7   : > { %5396 = vrcp.f32 %v1516_v12  ;;  %v1552_v55 = vpack.c.bf16 %v1540_v26, %v1539_v21  ;;  %v1541_v13 = vmul.f32 %v5383_v31, %v6456_v6 }
 0x6a8   : > { %v5385_v22 = vpop.eup %5384  ;;  %v6577_v27 = vpop.permute.xlu0 %1967 }
 0x6a9   : > { %4901 = vmatmul.mubr.bf16.vlgmr.msra.gmra.mxu1 %v1552_v55  ;;  %v1542_v10 = vmul.f32 %v5385_v22, %v6458_v38 }
 0x6aa   : > { %4913 = vmatpush3.bf16.msra.mxu1 %v1714_v29  ;;  %v6581_v8 = vpop.permute.xlu1 %1965  ;;  %v5387_v33 = vpop.eup %5386 }
 0x6ab   : > { %5166 = vmatprep.subr.msk.bf16.mxu1 %vm800_vm1, %v6577_v27  ;;  %v1553_v3 = vpack.c.bf16 %v1542_v10, %v1541_v13  ;;  %v1543_v45 = vmul.f32 %v5387_v33, %v6462_v7 }
 0x6ac   : > { %v5389_v32 = vpop.eup %5388  ;;  %v6585_v16 = vpop.permute.xlu0 %1961 }
 0x6ad   : > { %4904 = vmatprep.mubr.bf16.mxu1 %v1553_v3  ;;  %v1544_v28 = vmul.f32 %v5389_v32, %v6464_v30 }
 0x6ae   : > { %v6589_v5 = vpop.permute.xlu1 %1963  ;;  %v5391_v6 = vpop.eup %5390 }
 0x6af   : > { %v1554_v38 = vpack.c.bf16 %v1544_v28, %v1543_v45  ;;  %v1545_v36 = vmul.f32 %v5391_v6, %v6468_v15 }
 0x6b0   : > { %v5393_v40 = vpop.eup %5392  ;;  %v6591_v20 = vpop.permute.xlu0 %1957 }
 0x6b1   : > { %4905 = vmatmul.mubr.bf16.gmra.mxu1 %v1554_v38  ;;  %v1546_v41 = vmul.f32 %v5393_v40, %v6470_v4  ;;  %v2015_v40 = vsel %vm800_vm1, %v6577_v27, 0  ;;  %v2006_v27 = vsel %vm800_vm1, %v6585_v16, 0 }
 0x6b2   : > { %v1960_v9 = vpop.permute.xlu1 %1959  ;;  %v5395_v51 = vpop.eup %5394 }
 0x6b3   : > { %v1555_v25 = vpack.c.bf16 %v1546_v41, %v1545_v36  ;;  %v1547_v7 = vmul.f32 %v5395_v51, %v6474_v54  ;;  %v2012_v36 = vsel %vm800_vm1, %v6581_v8, 0  ;;  %v2009_v41 = vsel %vm800_vm1, %v6589_v5, 0 }
 0x6b4   : > { %v5397_v42 = vpop.eup %5396  ;;  %v6595_v52 = vpop.permute.xlu0 %1953  ;;  %v2003_v51 = vsel %vm800_vm1, %v1960_v9, 0 }
 0x6b5   : > { %4908 = vmatprep.mubr.bf16.mxu1 %v1555_v25  ;;  %v1548_v30 = vmul.f32 %v5397_v42, %v6476_v62 }
 0x6b6   : > { %v1956_v24 = vpop.permute.xlu1 %1955 }
 0x6b7   : > { %v1556_v53 = vpack.c.bf16 %v1548_v30, %v1547_v7  ;;  %v1997_v42 = vsel %vm800_vm1, %v1956_v24, 0 }
 0x6b8   : > { %v6599_v37 = vpop.permute.xlu0 %1939 }
 0x6b9   : > { %4909 = vmatmul.mubr.bf16.gmra.mxu1 %v1556_v53 }
 0x6ba   : > { %v6601_v63 = vpop.permute.xlu1 %1937 }
 0x6bc   : > { %v6603_v15 = vpop.permute.xlu0 %1943 }
 0x6be   : > { %v6605_v4 = vpop.permute.xlu1 %1941 }
 0x6c0   : > { %v6607_v1 = vpop.permute.xlu0 %1947 }
 0x6c2   : > { %v6609_v59 = vpop.permute.xlu1 %1945 }
 0x6c4   : > { %v6611_v48 = vpop.permute.xlu0 %1951 }
 0x6c6   : > { %v6613_v54 = vpop.permute.xlu1 %1949 }
 0x6c8   : > { %v6615_v62 = vpop.permute.xlu0 %2565 }
 0x6ca   : > { %v6617_v58 = vpop.permute.xlu1 %2567 }
 0x6cc   : > { %v6619_v60 = vpop.permute.xlu0 %2561 }
 0x6ce   : > { %v6621_v46 = vpop.permute.xlu1 %2563 }
 0x6d0   : > { %v6623_v17 = vpop.permute.xlu0 %2557 }
 0x6d2   : > { %v6625_v18 = vpop.permute.xlu1 %2559 }
 0x6d4   : > { %v6627_v35 = vpop.permute.xlu0 %2553 }
 0x6d6   : > { %v6629_v23 = vpop.permute.xlu1 %2555 }
 0x6d8   : > { %v6631_v21 = vpop.permute.xlu0 %2539 }
 0x6da   : > { %v6633_v26 = vpop.permute.xlu1 %2537 }
 0x6dc   : > { %v6635_v12 = vpop.permute.xlu0 %2543 }
 0x6de   : > { %v6637_v31 = vpop.permute.xlu1 %2541 }
 0x6e0   : > { %v6639_v55 = vpop.permute.xlu0 %2547 }
 0x6e2   : > { %v6641_v29 = vpop.permute.xlu1 %2545 }
 0x6e4   : > { %v6643_v22 = vpop.permute.xlu0 %2551 }
 0x6e6   : > { %v6645_v13 = vpop.permute.xlu1 %2549 }
 0x6e8   : > { %v2281_v10 = vpop.permute.xlu0 %2280 }
 0x6e9   : > { %4980 = vmatprep.subr.bf16.mxu0 %v2281_v10 }
 0x6ea   : > { %v2279_v33 = vpop.permute.xlu1 %2278  ;;  %4981 = vmatpush3.bf16.msra.mxu0 %v2281_v10 }
 0x6eb   : > { %4982 = vmatprep.subr.bf16.mxu0 %v2279_v33 }
 0x6ee   : > { %4983 = vmatpush3.bf16.msra.mxu0 %v2279_v33 }
 0x731   : > { %v4898_v3 = vpop.f32.mrf.mxu0 }
 0x733   : > { %v1615_v32 = vpop.f32.mrf.mxu0 }
 0x735   : > { %v4899_v45 = vpop.f32.mrf.mxu0 }
 0x736   : > { %v1679_v38 = vpack.c.bf16 %v4899_v45, %v4898_v3 }
 0x737   : > { %v1618_v28 = vpop.f32.mrf.mxu0 }
 0x738   : > { %v1678_v6 = vpack.c.bf16 %v1618_v28, %v1615_v32 }
 0x73a   : > { %4914 = vmatprep.mubr.msk.bf16.mxu1 %vm800_vm1, %v1678_v6 }
 0x73b   : > { %4915 = vmatmul.mubr.msk.bf16.vlgmr.msra.gmra.mxu1 %vm800_vm1, %v1679_v38 }
 0x73c   : > { %4949 = vmatpush3.bf16.xpose.msra.mxu1 %v2015_v40 }
 0x73d   : > { %5167 = vmatprep.subr.msk.bf16.mxu1 %vm800_vm1, %v6581_v8  ;;  %v2000_v8 = vsel %vm800_vm1, %v6591_v20, 0 }
 0x744   : > { %4951 = vmatpush3.bf16.xpose.msra.mxu1 %v2012_v36 }
 0x745   : > { %5168 = vmatprep.subr.msk.bf16.mxu1 %vm800_vm1, %v6589_v5 }
 0x74c   : > { %4953 = vmatpush3.bf16.xpose.msra.mxu1 %v2009_v41  ;;  %v2612_v41 = vsel %vm800_vm1, %v6615_v62, 0 }
 0x74d   : > { %5169 = vmatprep.subr.msk.bf16.mxu1 %vm800_vm1, %v6585_v16 }
 0x754   : > { %4955 = vmatpush3.bf16.xpose.msra.mxu1 %v2006_v27 }
 0x755   : > { %5170 = vmatprep.subr.msk.bf16.mxu1 %vm800_vm1, %v1960_v9 }
 0x75c   : > { %4957 = vmatpush3.bf16.xpose.msra.mxu1 %v2003_v51 }
 0x75d   : > { %5171 = vmatprep.subr.msk.bf16.mxu1 %vm800_vm1, %v6591_v20  ;;  %v1994_v20 = vsel %vm800_vm1, %v6595_v52, 0 }
 0x764   : > { %4959 = vmatpush3.bf16.xpose.msra.mxu1 %v2000_v8 }
 0x765   : > { %5172 = vmatprep.subr.msk.bf16.mxu1 %vm800_vm1, %v1956_v24 }
 0x769   : > { %v4902_v5 = vpop.f32.mrf.mxu1 }
 0x76b   : > { %v1631_v25 = vpop.f32.mrf.mxu1 }
 0x76c   : > { %4961 = vmatpush3.bf16.xpose.msra.mxu1 %v1997_v42 }
 0x76d   : > { %5173 = vmatprep.subr.msk.bf16.mxu1 %vm800_vm1, %v6595_v52  ;;  %v4903_v16 = vpop.f32.mrf.mxu1  ;;  %v2615_v52 = vsel %vm800_vm1, %v6617_v58, 0 }
 0x76e   : > { %v1681_v30 = vpack.c.bf16 %v4903_v16, %v4902_v5 }
 0x76f   : > { %v1634_v9 = vpop.f32.mrf.mxu1 }
 0x770   : > { %v1680_v7 = vpack.c.bf16 %v1634_v9, %v1631_v25 }
 0x771   : > { %v4906_v53 = vpop.f32.mrf.mxu1 }
 0x772   : > { %4918 = vmatprep.mubr.msk.bf16.mxu1 %vm800_vm1, %v1680_v7 }
 0x773   : > { %v1647_v10 = vpop.f32.mrf.mxu1  ;;  %4919 = vmatmul.mubr.msk.bf16.gmra.mxu1 %vm800_vm1, %v1681_v30 }
 0x774   : > { %4963 = vmatpush3.bf16.xpose.msra.mxu1 %v1994_v20 }
 0x775   : > { %5175 = vmatprep.subr.msk.bf16.mxu1 %vm800_vm1, %v6617_v58  ;;  %v4907_v24 = vpop.f32.mrf.mxu1 }
 0x776   : > { %v1683_v32 = vpack.c.bf16 %v4907_v24, %v4906_v53 }
 0x777   : > { %v1650_v33 = vpop.f32.mrf.mxu1 }
 0x778   : > { %v1682_v3 = vpack.c.bf16 %v1650_v33, %v1647_v10  ;;  %v8224_v33 = vld [vmem:[#allocation19_spill] sm:$0xff] }
 0x779   : > { %v4910_v45 = vpop.f32.mrf.mxu1 }
 0x77a   : > { %4922 = vmatprep.mubr.msk.bf16.mxu1 %vm800_vm1, %v1682_v3 }
 0x77b   : > { %v1663_v28 = vpop.f32.mrf.mxu1  ;;  %4923 = vmatmul.mubr.msk.bf16.gmra.mxu1 %vm800_vm1, %v1683_v32 }
 0x77d   : > { %v4911_v6 = vpop.f32.mrf.mxu1 }
 0x77e   : > { %v1685_v36 = vpack.c.bf16 %v4911_v6, %v4910_v45  ;;  %v8225_v45 = vld [vmem:[#allocation20_spill] sm:$0xff] }
 0x77f   : > { %v1666_v38 = vpop.f32.mrf.mxu1 }
 0x780   : > { %v1684_v40 = vpack.c.bf16 %v1666_v38, %v1663_v28  ;;  %v8226_v38 = vld [vmem:[#allocation21_spill] sm:$0xff] }
 0x782   : > { %4926 = vmatprep.mubr.msk.bf16.mxu1 %vm800_vm1, %v1684_v40 }
 0x783   : > { %4927 = vmatmul.mubr.msk.bf16.gmra.mxu1 %vm800_vm1, %v1685_v36 }
 0x784   : > { %4964 = vmatprep.mubr.msk.bf16.mxu1 %vm800_vm1, %v6601_v63  ;;  %v2606_v63 = vsel %vm800_vm1, %v6619_v60, 0 }
 0x78b   : > { %4965 = vmatmul.mubr.msk.bf16.vlgmr.msra.gmra.mxu1 %vm800_vm1, %v6599_v37  ;;  %v2609_v37 = vsel %vm800_vm1, %v6621_v46, 0 }
 0x78c   : > { %5031 = vmatpush3.bf16.xpose.msra.mxu1 %v2615_v52  ;;  %4968 = vmatprep.mubr.msk.bf16.mxu1 %vm800_vm1, %v6605_v4  ;;  %v2600_v4 = vsel %vm800_vm1, %v6623_v17, 0  ;;  %v8227_v52 = vld [vmem:[#allocation22_spill] sm:$0xff] }
 0x78d   : > { %5176 = vmatprep.subr.msk.bf16.mxu1 %vm800_vm1, %v6615_v62 }
 0x793   : > { %4969 = vmatmul.mubr.msk.bf16.gmra.mxu1 %vm800_vm1, %v6603_v15  ;;  %v2603_v15 = vsel %vm800_vm1, %v6625_v18, 0 }
 0x794   : > { %5033 = vmatpush3.bf16.xpose.msra.mxu1 %v2612_v41  ;;  %4972 = vmatprep.mubr.msk.bf16.mxu1 %vm800_vm1, %v6609_v59  ;;  %v2594_v59 = vsel %vm800_vm1, %v6627_v35, 0 }
 0x795   : > { %5177 = vmatprep.subr.msk.bf16.mxu1 %vm800_vm1, %v6621_v46 }
 0x79b   : > { %4973 = vmatmul.mubr.msk.bf16.gmra.mxu1 %vm800_vm1, %v6607_v1  ;;  %v2597_v1 = vsel %vm800_vm1, %v6629_v23, 0 }
 0x79c   : > { %5035 = vmatpush3.bf16.xpose.msra.mxu1 %v2609_v37  ;;  %4976 = vmatprep.mubr.msk.bf16.mxu1 %vm800_vm1, %v6613_v54 }
 0x79d   : > { %5178 = vmatprep.subr.msk.bf16.mxu1 %vm800_vm1, %v6619_v60 }
 0x7a3   : > { %4977 = vmatmul.mubr.msk.bf16.gmra.mxu1 %vm800_vm1, %v6611_v48 }
 0x7a4   : > { %5037 = vmatpush3.bf16.xpose.msra.mxu1 %v2606_v63  ;;  %5046 = vmatprep.mubr.msk.bf16.mxu1 %vm800_vm1, %v6633_v26  ;;  %v8228_v63 = vld [vmem:[#allocation23_spill] sm:$0xff] }
 0x7a5   : > { %5179 = vmatprep.subr.msk.bf16.mxu1 %vm800_vm1, %v6625_v18 }
 0x7ac   : > { %5039 = vmatpush3.bf16.xpose.msra.mxu1 %v2603_v15 }
 0x7ad   : > { %5180 = vmatprep.subr.msk.bf16.mxu1 %vm800_vm1, %v6623_v17 }
 0x7b4   : > { %5041 = vmatpush3.bf16.xpose.msra.mxu1 %v2600_v4  ;;  %v8229_v4 = vld [vmem:[#allocation24_spill] sm:$0xff] }
 0x7b5   : > { %5181 = vmatprep.subr.msk.bf16.mxu1 %vm800_vm1, %v6629_v23 }
 0x7bc   : > { %5043 = vmatpush3.bf16.xpose.msra.mxu1 %v2597_v1 }
 0x7bd   : > { %5182 = vmatprep.subr.msk.bf16.mxu1 %vm800_vm1, %v6627_v35 }
 0x7c4   : > { %5045 = vmatpush3.bf16.xpose.msra.mxu1 %v2594_v59 }
 0x7cb   : > { %5047 = vmatmul.mubr.msk.bf16.vlgmr.msra.gmra.mxu1 %vm800_vm1, %v6631_v21 }
 0x7cc   : > { %5050 = vmatprep.mubr.msk.bf16.mxu1 %vm800_vm1, %v6637_v31 }
 0x7d3   : > { %5051 = vmatmul.mubr.msk.bf16.gmra.mxu1 %vm800_vm1, %v6635_v12 }
 0x7d4   : > { %5054 = vmatprep.mubr.msk.bf16.mxu1 %vm800_vm1, %v6641_v29 }
 0x7db   : > { %5055 = vmatmul.mubr.msk.bf16.gmra.mxu1 %vm800_vm1, %v6639_v55 }
 0x7dc   : > { %5058 = vmatprep.mubr.msk.bf16.mxu1 %vm800_vm1, %v6645_v13 }
 0x7e3   : > { %5059 = vmatmul.mubr.msk.bf16.gmra.mxu1 %vm800_vm1, %v6643_v22 }
 0x7fb   : > { %v6745_v48 = vpop.f32.mrf.mxu1 }
 0x7fd   : > { %v6747_v54 = vpop.f32.mrf.mxu1 }
 0x7ff   : > { %v6749_v62 = vpop.f32.mrf.mxu1 }
 0x801   : > { %v6751_v58 = vpop.f32.mrf.mxu1 }
 0x802   : > { %8211 = vst [vmem:[#allocation28_spill] sm:$0xff] %v6751_v58 }
 0x833   : > { %v6753_v60 = vpop.f32.mrf.mxu1 }
 0x834   : > { %8212 = vst [vmem:[#allocation29_spill] sm:$0xff] %v6753_v60 }
 0x835   : > { %v6755_v46 = vpop.f32.mrf.mxu1 }
 0x836   : > { %8213 = vst [vmem:[#allocation30_spill] sm:$0xff] %v6755_v46 }
 0x837   : > { %v6757_v17 = vpop.f32.mrf.mxu1 }
 0x838   : > { %8214 = vst [vmem:[#allocation31_spill] sm:$0xff] %v6757_v17 }
 0x839   : > { %v6759_v18 = vpop.f32.mrf.mxu1 }
 0x83a   : > { %8215 = vst [vmem:[#allocation32_spill] sm:$0xff] %v6759_v18 }
 0x83b   : > { %v6761_v35 = vpop.f32.mrf.mxu1 }
 0x83c   : > { %8216 = vst [vmem:[#allocation33_spill] sm:$0xff] %v6761_v35 }
 0x83d   : > { %v6763_v23 = vpop.f32.mrf.mxu1 }
 0x83e   : > { %8217 = vst [vmem:[#allocation34_spill] sm:$0xff] %v6763_v23 }
 0x83f   : > { %v6765_v21 = vpop.f32.mrf.mxu1 }
 0x840   : > { %8218 = vst [vmem:[#allocation35_spill] sm:$0xff] %v6765_v21 }
 0x841   : > { %v6767_v26 = vpop.f32.mrf.mxu1 }
 0x842   : > { %8219 = vst [vmem:[#allocation36_spill] sm:$0xff] %v6767_v26 }
 0x843   : > { %v6769_v12 = vpop.f32.mrf.mxu1 }
 0x844   : > { %8220 = vst [vmem:[#allocation37_spill] sm:$0xff] %v6769_v12 }
 0x845   : > { %v6771_v31 = vpop.f32.mrf.mxu1 }
 0x846   : > { %8221 = vst [vmem:[#allocation38_spill] sm:$0xff] %v6771_v31 }
 0x847   : > { %v6773_v55 = vpop.f32.mrf.mxu1 }
 0x848   : > { %8222 = vst [vmem:[#allocation39_spill] sm:$0xff] %v6773_v55 }
 0x849   : > { %v6775_v29 = vpop.f32.mrf.mxu1 }
 0x84a   : > { %8223 = vst [vmem:[#allocation40_spill] sm:$0xff] %v6775_v29 }
 0x84b   : > { %v4966_v22 = vpop.f32.mrf.mxu1 }
 0x84c   : > { %v2060_v13 = vadd.f32 %v4966_v22, %v6020_v39  ;;  %v8230_v22 = vld [vmem:[#allocation26_spill] sm:$0xff] }
 0x84d   : > { %v2051_v27 = vpop.f32.mrf.mxu1 }
 0x84e   : > { %v2052_v51 = vadd.f32 %v2051_v27, %v6028_v43  ;;  %2118 = vmax.xlane.f32.xlu0 %v2060_v13 }
 0x84f   : > { %v4967_v8 = vpop.f32.mrf.mxu1 }
 0x850   : > { %2114 = vmax.xlane.f32.xlu1 %v2052_v51  ;;  %v2063_v25 = vadd.f32 %v4967_v8, %v6039_v49 }
 0x851   : > { %v2054_v5 = vpop.f32.mrf.mxu1 }
 0x852   : > { %v2055_v42 = vadd.f32 %v2054_v5, %v6033_v47  ;;  %v8231_v5 = vld [vmem:[#allocation25_spill] sm:$0xff] }
 0x853   : > { %v4970_v16 = vpop.f32.mrf.mxu1 }
 0x854   : > { %2116 = vmax.xlane.f32.xlu0 %v2055_v42  ;;  %2120 = vmax.xlane.f32.xlu1 %v2063_v25  ;;  %v2076_v7 = vadd.f32 %v4970_v16, %v6063_v11 }
 0x855   : > { %v2067_v9 = vpop.f32.mrf.mxu1 }
 0x856   : > { %v2068_v20 = vadd.f32 %v2067_v9, %v6076_v19 }
 0x857   : > { %v4971_v30 = vpop.f32.mrf.mxu1 }
 0x858   : > { %v6783_v53 = vadd.f32 %v4971_v30, %v6068_v14  ;;  %2126 = vmax.xlane.f32.xlu0 %v2076_v7  ;;  %v8232_v30 = vld [vmem:[#allocation27_spill] sm:$0xff] }
 0x859   : > { %v2070_v10 = vpop.f32.mrf.mxu1 }
 0x85a   : > { %2128 = vmax.xlane.f32.xlu1 %v6783_v53  ;;  %v2071_v3 = vadd.f32 %v2070_v10, %v8224_v33 }
 0x85b   : > { %v4974_v24 = vpop.f32.mrf.mxu1 }
 0x85c   : > { %2122 = vmax.xlane.f32.xlu0 %v2068_v20  ;;  %v6789_v28 = vadd.f32 %v4974_v24, %v8225_v45 }
 0x85d   : > { %v2083_v32 = vpop.f32.mrf.mxu1 }
 0x85e   : > { %2124 = vmax.xlane.f32.xlu1 %v2071_v3  ;;  %v6796_v41 = vadd.f32 %v2083_v32, %v8227_v52 }
 0x85f   : > { %v4975_v6 = vpop.f32.mrf.mxu1 }
 0x860   : > { %v6792_v40 = vadd.f32 %v4975_v6, %v8226_v38  ;;  %2134 = vmax.xlane.f32.xlu0 %v6789_v28 }
 0x861   : > { %v2086_v36 = vpop.f32.mrf.mxu1 }
 0x862   : > { %2136 = vmax.xlane.f32.xlu1 %v6792_v40  ;;  %v6800_v15 = vadd.f32 %v2086_v36, %v8228_v63 }
 0x863   : > { %v4978_v37 = vpop.f32.mrf.mxu1 }
 0x864   : > { %2130 = vmax.xlane.f32.xlu0 %v6796_v41  ;;  %v6804_v1 = vadd.f32 %v4978_v37, %v8229_v4 }
 0x865   : > { %v2099_v59 = vpop.f32.mrf.mxu1 }
 0x866   : > { %2132 = vmax.xlane.f32.xlu1 %v6800_v15  ;;  %v6809_v27 = vadd.f32 %v2099_v59, %v8230_v22 }
 0x867   : > { %v4979_v8 = vpop.f32.mrf.mxu1 }
 0x868   : > { %2142 = vmax.xlane.f32.xlu0 %v6804_v1  ;;  %v6821_v16 = vadd.f32 %v4979_v8, %v8231_v5 }
 0x869   : > { %v2102_v9 = vpop.f32.mrf.mxu1 }
 0x86a   : > { %v6825_v10 = vadd.f32 %v2102_v9, %v8232_v30 }
 0x86c   : > { %2138 = vmax.xlane.f32.xlu0 %v6809_v27 }
 0x877   : > { %2272 = vrot.lane.b32.xlu1 %v5964_v0, %s5730_s23 }
 0x882   : > { %2276 = vrot.lane.b32.xlu0 %v5942_v44, %s5730_s23 }
 0x886   : > { %2274 = vrot.lane.b32.xlu0 %v5946_v50, %s5730_s23 }
 0x88a   : > { %2268 = vrot.lane.b32.xlu0 %v5969_v2, %s5730_s23 }
 0x89b   : > { %2144 = vmax.xlane.f32.xlu1 %v6821_v16 }
 0x89f   : > { %2140 = vmax.xlane.f32.xlu1 %v6825_v10 }
 0x8b0   : > { %2270 = vrot.lane.b32.xlu1 %v5950_v56, %s5730_s23 }
 0x8d7   : > { %v2119_v24 = vpop.xlane.xlu0 %2118 }
 0x8d8   : > { %v2148_v32 = vsub.f32 %v2060_v13, %v2119_v24 }
 0x8d9   : > { %v2115_v6 = vpop.xlane.xlu1 %2114 }
 0x8da   : > { %v2166_v36 = vmul.f32 1.442695, %v2148_v32  ;;  %v2146_v37 = vsub.f32 %v2052_v51, %v2115_v6 }
 0x8dc   : > { %5398 = vpow2.f32 %v2166_v36  ;;  %v2162_v59 = vmul.f32 1.442695, %v2146_v37 }
 0x8dd   : > { %v2121_v8 = vpop.xlane.xlu1 %2120  ;;  %v2117_v29 = vpop.xlane.xlu0 %2116 }
 0x8de   : > { %v2149_v55 = vsub.f32 %v2063_v25, %v2121_v8  ;;  %5400 = vpow2.f32 %v2162_v59  ;;  %v2147_v12 = vsub.f32 %v2055_v42, %v2117_v29 }
 0x8e0   : > { %v2168_v31 = vmul.f32 1.442695, %v2149_v55  ;;  %v2164_v23 = vmul.f32 1.442695, %v2147_v12 }
 0x8e1   : > { %v2127_v9 = vpop.xlane.xlu0 %2126 }
 0x8e2   : > { %v2152_v26 = vsub.f32 %v2076_v7, %v2127_v9  ;;  %5402 = vpow2.f32 %v2168_v31 }
 0x8e3   : > { %v2129_v21 = vpop.xlane.xlu1 %2128 }
 0x8e4   : > { %v2174_v35 = vmul.f32 1.442695, %v2152_v26  ;;  %v2153_v13 = vsub.f32 %v6783_v53, %v2129_v21 }
 0x8e5   : > { %v2123_v18 = vpop.xlane.xlu0 %2122 }
 0x8e6   : > { %5404 = vpow2.f32 %v2174_v35  ;;  %v2150_v24 = vsub.f32 %v2068_v20, %v2123_v18  ;;  %v2176_v55 = vmul.f32 1.442695, %v2153_v13 }
 0x8e7   : > { %v2125_v51 = vpop.xlane.xlu1 %2124  ;;  %5406 = vpow2.f32 %v2164_v23 }
 0x8e8   : > { %v2170_v32 = vmul.f32 1.442695, %v2150_v24  ;;  %v2151_v6 = vsub.f32 %v2071_v3, %v2125_v51 }
 0x8e9   : > { %v6831_v36 = vpop.eup %5398  ;;  %v2135_v25 = vpop.xlane.xlu0 %2134 }
 0x8ea   : > { %5408 = vpow2.f32 %v2170_v32  ;;  %v2172_v29 = vmul.f32 1.442695, %v2151_v6  ;;  %v2156_v42 = vsub.f32 %v6789_v28, %v2135_v25  ;;  %2198 = vadd.xlane.f32.xlu1 %v6831_v36 }
 0x8eb   : > { %v2137_v26 = vpop.xlane.xlu1 %2136  ;;  %v6835_v35 = vpop.eup %5400 }
 0x8ec   : > { %5410 = vpow2.f32 %v2172_v29  ;;  %v2182_v18 = vmul.f32 1.442695, %v2156_v42  ;;  %v2157_v53 = vsub.f32 %v6792_v40, %v2137_v26 }
 0x8ed   : > { %v2131_v21 = vpop.xlane.xlu0 %2130  ;;  %5412 = vpow2.f32 %v2176_v55 }
 0x8ee   : > { %v2154_v23 = vsub.f32 %v6796_v41, %v2131_v21  ;;  %2194 = vadd.xlane.f32.xlu1 %v6835_v35  ;;  %5414 = vpow2.f32 %v2182_v18  ;;  %v2184_v9 = vmul.f32 1.442695, %v2157_v53  ;;  %v5048_v18 = vpop.f32.mrf.mxu1 }
 0x8ef   : > { %v2133_v12 = vpop.xlane.xlu1 %2132  ;;  %v6840_v7 = vpop.eup %5402 }
 0x8f0   : > { %v2155_v31 = vsub.f32 %v6800_v15, %v2133_v12  ;;  %v2178_v3 = vmul.f32 1.442695, %v2154_v23  ;;  %v2651_v23 = vpop.f32.mrf.mxu1 }
 0x8f1   : > { %v2143_v20 = vpop.xlane.xlu0 %2142 }
 0x8f2   : > { %v2180_v28 = vmul.f32 1.442695, %v2155_v31  ;;  %v2160_v37 = vsub.f32 %v6804_v1, %v2143_v20  ;;  %2200 = vadd.xlane.f32.xlu1 %v6840_v7  ;;  %v5049_v12 = vpop.f32.mrf.mxu1 }
 0x8f3   : > { %v6845_v59 = vpop.eup %5404  ;;  %v2273_v25 = vpop.permute.xlu1 %2272 }
 0x8f4   : > { %5416 = vpow2.f32 %v2180_v28  ;;  %v2190_v41 = vmul.f32 1.442695, %v2160_v37  ;;  %2206 = vadd.xlane.f32.xlu0 %v6845_v59  ;;  %v6848_v8 = vpop.eup %5406  ;;  %v2654_v31 = vpop.f32.mrf.mxu1 }
 0x8f5   : > { %v2139_v15 = vpop.xlane.xlu0 %2138  ;;  %5418 = vpow2.f32 %v2178_v3 }
 0x8f6   : > { %v2158_v40 = vsub.f32 %v6809_v27, %v2139_v15  ;;  %2196 = vadd.xlane.f32.xlu1 %v6848_v8  ;;  %5420 = vpow2.f32 %v2190_v41  ;;  %v5052_v53 = vpop.f32.mrf.mxu1 }
 0x8f7   : > { %v6852_v13 = vpop.eup %5408  ;;  %5422 = vpow2.f32 %v2184_v9 }
 0x8f8   : > { %v2186_v1 = vmul.f32 1.442695, %v2158_v40  ;;  %2202 = vadd.xlane.f32.xlu0 %v6852_v13  ;;  %v2667_v20 = vpop.f32.mrf.mxu1 }
 0x8f9   : > { %v6855_v24 = vpop.eup %5410  ;;  %v2277_v51 = vpop.permute.xlu0 %2276 }
 0x8fa   : > { %2204 = vadd.xlane.f32.xlu1 %v6855_v24  ;;  %4984 = vmatprep.subr.bf16.mxu0 %v2277_v51  ;;  %v6858_v32 = vpop.eup %5412  ;;  %5424 = vpow2.f32 %v2186_v1  ;;  %v5053_v28 = vpop.f32.mrf.mxu1 }
 0x8fb   : > { %4985 = vmatpush3.bf16.msra.mxu0 %v2277_v51  ;;  %v6861_v6 = vpop.eup %5414 }
 0x8fc   : > { %2208 = vadd.xlane.f32.xlu0 %v6858_v32  ;;  %v2670_v9 = vpop.f32.mrf.mxu1 }
 0x8fd   : > { %v2275_v27 = vpop.permute.xlu0 %2274 }
 0x8fe   : > { %4986 = vmatprep.subr.bf16.mxu0 %v2275_v27 }
 0x8ff   : > { %4987 = vmatpush3.bf16.msra.mxu0 %v2275_v27  ;;  %v5056_v27 = vpop.f32.mrf.mxu1 }
 0x900   : > { %2214 = vadd.xlane.f32.xlu0 %v6861_v6  ;;  %4988 = vmatprep.subr.bf16.mxu0 %v2273_v25 }
 0x901   : > { %v6864_v55 = vpop.eup %5416  ;;  %v2683_v17 = vpop.f32.mrf.mxu1 }
 0x902   : > { %2212 = vadd.xlane.f32.xlu1 %v6864_v55  ;;  %v6867_v29 = vpop.eup %5418 }
 0x903   : > { %4989 = vmatpush3.bf16.msra.mxu0 %v2273_v25  ;;  %v6870_v42 = vpop.eup %5420  ;;  %v2269_v25 = vpop.permute.xlu0 %2268 }
 0x904   : > { %2210 = vadd.xlane.f32.xlu0 %v6867_v29  ;;  %v6873_v26 = vpop.eup %5422  ;;  %v5057_v46 = vpop.f32.mrf.mxu1 }
 0x906   : > { %2222 = vadd.xlane.f32.xlu1 %v6870_v42  ;;  %v2686_v58 = vpop.f32.mrf.mxu1 }
 0x907   : > { %v6876_v21 = vpop.eup %5424 }
 0x908   : > { %2216 = vadd.xlane.f32.xlu0 %v6873_v26 }
 0x90a   : > { %2218 = vadd.xlane.f32.xlu1 %v6876_v21 }
 0x91b   : > { %2266 = vrot.lane.b32.xlu1 %v5938_v34, %s5730_s23 }
 0x924   : > { %v2145_v3 = vpop.xlane.xlu1 %2144 }
 0x925   : > { %v2161_v41 = vsub.f32 %v6821_v16, %v2145_v3  ;;  %v6887_v16 = vadd.f32 %v2667_v20, %v6076_v19  ;;  %v5060_v3 = vpop.f32.mrf.mxu1  ;;  %v6902_v19 = vadd.f32 %v2654_v31, %v6033_v47  ;;  %v6906_v20 = vadd.f32 %v5048_v18, %v6020_v39 }
 0x926   : > { %v6920_v47 = vadd.f32 %v5052_v53, %v6063_v11  ;;  %v6926_v39 = vadd.f32 %v5053_v28, %v6068_v14 }
 0x927   : > { %v2192_v51 = vmul.f32 1.442695, %v2161_v41  ;;  %v6897_v41 = vadd.f32 %v5060_v3, %v8229_v4  ;;  %v6914_v4 = vadd.f32 %v2670_v9, %v8224_v33  ;;  %v2699_v11 = vpop.f32.mrf.mxu1 }
 0x928   : > { %v2141_v37 = vpop.xlane.xlu1 %2140 }
 0x929   : > { %v2159_v15 = vsub.f32 %v6825_v10, %v2141_v37  ;;  %v6894_v37 = vadd.f32 %v2651_v23, %v6028_v43  ;;  %v6910_v43 = vadd.f32 %v5049_v12, %v6039_v49  ;;  %v6932_v49 = vadd.f32 %v2683_v17, %v8227_v52  ;;  %v5061_v14 = vpop.f32.mrf.mxu1 }
 0x92a   : > { %v6950_v17 = vadd.f32 %v2699_v11, %v8230_v22 }
 0x92b   : > { %v2188_v40 = vmul.f32 1.442695, %v2159_v15 }
 0x92c   : > { %v2271_v1 = vpop.permute.xlu1 %2270 }
 0x92d   : > { %5426 = vpow2.f32 %v2188_v40  ;;  %4990 = vmatprep.subr.bf16.mxu0 %v2271_v1 }
 0x92e   : > { %4991 = vmatpush3.bf16.msra.mxu0 %v2271_v1  ;;  %5428 = vpow2.f32 %v2192_v51 }
 0x92f   : > { %4992 = vmatprep.subr.bf16.mxu0 %v2269_v25 }
 0x932   : > { %4993 = vmatpush3.bf16.msra.mxu0 %v2269_v25 }
 0x93a   : > { %v6883_v60 = vpop.eup %5426 }
 0x93b   : > { %2220 = vadd.xlane.f32.xlu0 %v6883_v60  ;;  %v6889_v10 = vpop.eup %5428 }
 0x93f   : > { %2224 = vadd.xlane.f32.xlu0 %v6889_v10  ;;  %2722 = vmax.xlane.f32.xlu1 %v6887_v16 }
 0x943   : > { %2714 = vmax.xlane.f32.xlu0 %v6894_v37  ;;  %2742 = vmax.xlane.f32.xlu1 %v6897_v41 }
 0x947   : > { %2716 = vmax.xlane.f32.xlu0 %v6902_v19 }
 0x94b   : > { %2718 = vmax.xlane.f32.xlu0 %v6906_v20 }
 0x94f   : > { %2720 = vmax.xlane.f32.xlu0 %v6910_v43 }
 0x953   : > { %2724 = vmax.xlane.f32.xlu0 %v6914_v4 }
 0x954   : > { %2880 = vrot.lane.b32.xlu1 %v5952_v57, %s5731_s24  ;;  %v6938_v57 = vadd.f32 %v2686_v58, %v8228_v63 }
 0x957   : > { %2726 = vmax.xlane.f32.xlu0 %v6920_v47 }
 0x958   : > { %2876 = vrot.lane.b32.xlu1 %v5942_v44, %s5731_s24  ;;  %v6942_v44 = vadd.f32 %v5056_v27, %v8225_v45  ;;  %v6958_v45 = vadd.f32 %v5061_v14, %v8231_v5 }
 0x95b   : > { %2728 = vmax.xlane.f32.xlu0 %v6926_v39 }
 0x95c   : > { %2874 = vrot.lane.b32.xlu1 %v5946_v50, %s5731_s24  ;;  %v6946_v50 = vadd.f32 %v5057_v46, %v8226_v38 }
 0x95f   : > { %2730 = vmax.xlane.f32.xlu0 %v6932_v49 }
 0x960   : > { %2868 = vrot.lane.b32.xlu1 %v5969_v2, %s5731_s24  ;;  %v2702_v2 = vpop.f32.mrf.mxu1 }
 0x961   : > { %v6954_v58 = vadd.f32 %v2702_v2, %v8232_v30 }
 0x963   : > { %2732 = vmax.xlane.f32.xlu0 %v6938_v57 }
 0x967   : > { %2734 = vmax.xlane.f32.xlu0 %v6942_v44 }
 0x96b   : > { %2736 = vmax.xlane.f32.xlu0 %v6946_v50 }
 0x96f   : > { %2738 = vmax.xlane.f32.xlu0 %v6950_v17 }
 0x973   : > { %v2199_v33 = vpop.xlane.xlu1 %2198  ;;  %2740 = vmax.xlane.f32.xlu0 %v6954_v58 }
 0x977   : > { %v2195_v46 = vpop.xlane.xlu1 %2194  ;;  %2744 = vmax.xlane.f32.xlu0 %v6958_v45 }
 0x978   : > { %5430 = vrcp.f32 %v2195_v46 }
 0x97b   : > { %v2201_v38 = vpop.xlane.xlu1 %2200 }
 0x97d   : > { %v2207_v52 = vpop.xlane.xlu0 %2206 }
 0x97f   : > { %v2197_v63 = vpop.xlane.xlu1 %2196 }
 0x980   : > { %5432 = vrcp.f32 %v2197_v63 }
 0x981   : > { %v2203_v22 = vpop.xlane.xlu0 %2202  ;;  %5434 = vrcp.f32 %v2201_v38 }
 0x983   : > { %v2205_v18 = vpop.xlane.xlu1 %2204 }
 0x984   : > { %5436 = vrcp.f32 %v2205_v18 }
 0x985   : > { %v2209_v23 = vpop.xlane.xlu0 %2208  ;;  %5438 = vrcp.f32 %v2199_v33  ;;  %v5431_v12 = vpop.eup %5430 }
 0x986   : > { %5440 = vrcp.f32 %v2203_v22  ;;  %v2242_v28 = vmul.f32 %v5431_v12, %v6835_v35 }
 0x987   : > { %5442 = vrcp.f32 %v2209_v23 }
 0x989   : > { %v2215_v30 = vpop.xlane.xlu0 %2214 }
 0x98b   : > { %v2213_v31 = vpop.xlane.xlu1 %2212 }
 0x98d   : > { %v5433_v5 = vpop.eup %5432  ;;  %2878 = vrot.lane.b32.xlu0 %v5958_v61, %s5731_s24  ;;  %v2211_v53 = vpop.xlane.xlu0 %2210 }
 0x98e   : > { %v2243_v15 = vmul.f32 %v5433_v5, %v6848_v8  ;;  %5444 = vrcp.f32 %v2211_v53  ;;  %v5435_v1 = vpop.eup %5434 }
 0x98f   : > { %v2223_v9 = vpop.xlane.xlu1 %2222  ;;  %5446 = vrcp.f32 %v2207_v52  ;;  %v2245_v8 = vmul.f32 %v5435_v1, %v6840_v7 }
 0x990   : > { %v2258_v40 = vpack.c.bf16 %v2243_v15, %v2242_v28  ;;  %5448 = vrcp.f32 %v2213_v31 }
 0x991   : > { %2872 = vrot.lane.b32.xlu0 %v5964_v0, %s5731_s24  ;;  %v2217_v51 = vpop.xlane.xlu0 %2216  ;;  %v5437_v25 = vpop.eup %5436  ;;  %v4515_v0 = vld [vmem:[%s8147_s3 + $0x8] sm:$0xf] }
 0x992   : > { %4996 = vmatprep.mubr.bf16.mxu0 %v2258_v40  ;;  %v5439_v61 = vpop.eup %5438  ;;  %5450 = vrcp.f32 %v2217_v51  ;;  %v2247_v11 = vmul.f32 %v5437_v25, %v6855_v24 }
 0x993   : > { %v2219_v27 = vpop.xlane.xlu1 %2218  ;;  %v5441_v35 = vpop.eup %5440  ;;  %5452 = vrcp.f32 %v2215_v30  ;;  %v2244_v14 = vmul.f32 %v5439_v61, %v6831_v36 }
 0x994   : > { %v2246_v2 = vmul.f32 %v5441_v35, %v6852_v13  ;;  %v5443_v7 = vpop.eup %5442  ;;  %5454 = vrcp.f32 %v2219_v27 }
 0x995   : > { %2870 = vrot.lane.b32.xlu0 %v5950_v56, %s5731_s24  ;;  %v2259_v33 = vpack.c.bf16 %v2245_v8, %v2244_v14  ;;  %v2422_v56 = vsel %vm1712_vm4, %v4515_v0, 0  ;;  %v2249_v63 = vmul.f32 %v5443_v7, %v6858_v32 }
 0x996   : > { %v2260_v46 = vpack.c.bf16 %v2247_v11, %v2246_v2 }
 0x997   : > { %v2267_v3 = vpop.permute.xlu1 %2266 }
 0x998   : > { %4994 = vmatprep.subr.bf16.mxu0 %v2267_v3 }
 0x999   : > { %4995 = vmatpush3.bf16.msra.mxu0 %v2267_v3 }
 0x99a   : > { %5174 = vmatprep.subr.msk.bf16.mxu0 %vm1712_vm4, %v4515_v0 }
 0x99b   : > { %v5445_v38 = vpop.eup %5444 }
 0x99c   : > { %4997 = vmatmul.mubr.bf16.vlgmr.msra.gmra.mxu0 %v2259_v33  ;;  %v5447_v24 = vpop.eup %5446  ;;  %v2250_v36 = vmul.f32 %v5445_v38, %v6867_v29 }
 0x99d   : > { %5000 = vmatprep.mubr.bf16.mxu0 %v2260_v46  ;;  %5013 = vmatpush3.bf16.msra.mxu0 %v2422_v56  ;;  %v5449_v52 = vpop.eup %5448  ;;  %v2248_v22 = vmul.f32 %v5447_v24, %v6845_v59 }
 0x99e   : > { %v2251_v13 = vmul.f32 %v5449_v52, %v6864_v55 }
 0x99f   : > { %v2261_v18 = vpack.c.bf16 %v2249_v63, %v2248_v22  ;;  %v5451_v23 = vpop.eup %5450 }
 0x9a0   : > { %v2262_v30 = vpack.c.bf16 %v2251_v13, %v2250_v36  ;;  %v5453_v12 = vpop.eup %5452  ;;  %v2253_v31 = vmul.f32 %v5451_v23, %v6873_v26 }
 0x9a1   : > { %v2252_v5 = vmul.f32 %v5453_v12, %v6861_v6  ;;  %v5455_v15 = vpop.eup %5454 }
 0x9a2   : > { %v2254_v6 = vmul.f32 %v5455_v15, %v6876_v21 }
 0x9a3   : > { %v2263_v53 = vpack.c.bf16 %v2253_v31, %v2252_v5 }
 0x9a4   : > { %5001 = vmatmul.mubr.bf16.gmra.mxu0 %v2261_v18 }
 0x9a5   : > { %5004 = vmatprep.mubr.bf16.mxu0 %v2262_v30 }
 0x9ac   : > { %5005 = vmatmul.mubr.bf16.gmra.mxu0 %v2263_v53 }
 0x9c4   : > { %v2221_v32 = vpop.xlane.xlu0 %2220 }
 0x9c5   : > { %5456 = vrcp.f32 %v2221_v32 }
 0x9c6   : > { %5458 = vrcp.f32 %v2223_v9 }
 0x9c8   : > { %v2723_v29 = vpop.xlane.xlu1 %2722  ;;  %v2225_v59 = vpop.xlane.xlu0 %2224 }
 0x9c9   : > { %5460 = vrcp.f32 %v2225_v59  ;;  %v2750_v56 = vsub.f32 %v6887_v16, %v2723_v29 }
 0x9cb   : > { %v2770_v24 = vmul.f32 1.442695, %v2750_v56 }
 0x9cc   : > { %v2743_v55 = vpop.xlane.xlu1 %2742  ;;  %v2715_v28 = vpop.xlane.xlu0 %2714 }
 0x9cd   : > { %v2746_v9 = vsub.f32 %v6894_v37, %v2715_v28 }
 0x9cf   : > { %v2762_v2 = vmul.f32 1.442695, %v2746_v9 }
 0x9d0   : > { %v6984_v40 = vpop.permute.xlu1 %2880  ;;  %v2717_v1 = vpop.xlane.xlu0 %2716 }
 0x9d1   : > { %5062 = vmatprep.subr.bf16.mxu0 %v6984_v40  ;;  %v2747_v33 = vsub.f32 %v6902_v19, %v2717_v1 }
 0x9d2   : > { %v5457_v26 = vpop.eup %5456 }
 0x9d3   : > { %v2255_v51 = vmul.f32 %v5457_v26, %v6883_v60  ;;  %v5459_v27 = vpop.eup %5458  ;;  %v2764_v7 = vmul.f32 1.442695, %v2747_v33 }
 0x9d4   : > { %v2719_v25 = vpop.xlane.xlu0 %2718  ;;  %v2256_v11 = vmul.f32 %v5459_v27, %v6870_v42 }
 0x9d5   : > { %v2748_v61 = vsub.f32 %v6906_v20, %v2719_v25  ;;  %v2264_v35 = vpack.c.bf16 %v2255_v51, %v2254_v6 }
 0x9d6   : > { %v5461_v8 = vpop.eup %5460 }
 0x9d7   : > { %v2766_v3 = vmul.f32 1.442695, %v2748_v61  ;;  %5008 = vmatprep.mubr.bf16.mxu0 %v2264_v35  ;;  %v2257_v0 = vmul.f32 %v5461_v8, %v6889_v10 }
 0x9d8   : > { %v2721_v14 = vpop.xlane.xlu0 %2720 }
 0x9d9   : > { %5462 = vpow2.f32 %v2766_v3  ;;  %v2749_v21 = vsub.f32 %v6910_v43, %v2721_v14  ;;  %v2265_v60 = vpack.c.bf16 %v2257_v0, %v2256_v11  ;;  %v7055_v11 = vpop.f32.mrf.mxu0 }
 0x9da   : > { %5464 = vpow2.f32 %v2762_v2 }
 0x9db   : > { %5009 = vmatmul.mubr.bf16.gmra.mxu0 %v2265_v60  ;;  %v2768_v20 = vmul.f32 1.442695, %v2749_v21  ;;  %v7057_v0 = vpop.f32.mrf.mxu0 }
 0x9dc   : > { %v2725_v37 = vpop.xlane.xlu0 %2724 }
 0x9dd   : > { %5466 = vpow2.f32 %v2768_v20  ;;  %v2751_v42 = vsub.f32 %v6914_v4, %v2725_v37  ;;  %v2760_v4 = vsub.f32 %v6897_v41, %v2743_v55  ;;  %v7061_v14 = vpop.f32.mrf.mxu0 }
 0x9de   : > { %5468 = vpow2.f32 %v2764_v7 }
 0x9df   : > { %v2772_v52 = vmul.f32 1.442695, %v2751_v42  ;;  %v2790_v23 = vmul.f32 1.442695, %v2760_v4  ;;  %v7063_v2 = vpop.f32.mrf.mxu0 }
 0x9e0   : > { %v2727_v46 = vpop.xlane.xlu0 %2726 }
 0x9e1   : > { %v2752_v10 = vsub.f32 %v6920_v47, %v2727_v46  ;;  %v7065_v21 = vpop.f32.mrf.mxu0 }
 0x9e3   : > { %v2774_v38 = vmul.f32 1.442695, %v2752_v10  ;;  %v7067_v60 = vpop.f32.mrf.mxu0 }
 0x9e4   : > { %v2729_v43 = vpop.xlane.xlu0 %2728 }
 0x9e5   : > { %5470 = vpow2.f32 %v2774_v38  ;;  %v2753_v19 = vsub.f32 %v6926_v39, %v2729_v43  ;;  %v7069_v33 = vpop.f32.mrf.mxu0 }
 0x9e6   : > { %v6999_v63 = vpop.eup %5462  ;;  %5472 = vpow2.f32 %v2770_v24 }
 0x9e7   : > { %2798 = vadd.xlane.f32.xlu0 %v6999_v63  ;;  %5474 = vpow2.f32 %v2772_v52  ;;  %v2776_v36 = vmul.f32 1.442695, %v2753_v19  ;;  %v7002_v22 = vpop.eup %5464  ;;  %v7071_v37 = vpop.f32.mrf.mxu0 }
 0x9e8   : > { %v2731_v16 = vpop.xlane.xlu0 %2730 }
 0x9e9   : > { %5476 = vpow2.f32 %v2776_v36  ;;  %v2754_v31 = vsub.f32 %v6932_v49, %v2731_v16  ;;  %v7073_v20 = vpop.f32.mrf.mxu0 }
 0x9ea   : > { %v7007_v18 = vpop.eup %5466 }
 0x9eb   : > { %2794 = vadd.xlane.f32.xlu0 %v7002_v22  ;;  %v7010_v12 = vpop.eup %5468  ;;  %v2778_v29 = vmul.f32 1.442695, %v2754_v31  ;;  %v7075_v56 = vpop.f32.mrf.mxu0 }
 0x9ec   : > { %v2733_v47 = vpop.xlane.xlu0 %2732 }
 0x9ed   : > { %v2755_v13 = vsub.f32 %v6938_v57, %v2733_v47  ;;  %v7077_v7 = vpop.f32.mrf.mxu0 }
 0x9ef   : > { %v2780_v39 = vmul.f32 1.442695, %v2755_v13  ;;  %2800 = vadd.xlane.f32.xlu0 %v7007_v18  ;;  %v7079_v46 = vpop.f32.mrf.mxu0 }
 0x9f0   : > { %v2735_v30 = vpop.xlane.xlu0 %2734 }
 0x9f1   : > { %5478 = vpow2.f32 %v2780_v39  ;;  %v2756_v5 = vsub.f32 %v6942_v44, %v2735_v30  ;;  %v2877_v30 = vpop.permute.xlu1 %2876 }
 0x9f2   : > { %v7014_v53 = vpop.eup %5470  ;;  %5480 = vpow2.f32 %v2790_v23 }
 0x9f3   : > { %v2782_v41 = vmul.f32 1.442695, %v2756_v5  ;;  %2796 = vadd.xlane.f32.xlu0 %v7010_v12  ;;  %2806 = vadd.xlane.f32.xlu1 %v7014_v53  ;;  %v7018_v32 = vpop.eup %5472 }
 0x9f4   : > { %v2737_v57 = vpop.xlane.xlu0 %2736  ;;  %v7021_v55 = vpop.eup %5474 }
 0x9f5   : > { %5482 = vpow2.f32 %v2782_v41  ;;  %v2757_v59 = vsub.f32 %v6946_v50, %v2737_v57 }
 0x9f6   : > { %5484 = vpow2.f32 %v2778_v29  ;;  %v7026_v15 = vpop.eup %5476 }
 0x9f7   : > { %2804 = vadd.xlane.f32.xlu0 %v7021_v55  ;;  %2802 = vadd.xlane.f32.xlu1 %v7018_v32  ;;  %v2784_v44 = vmul.f32 1.442695, %v2757_v59 }
 0x9f8   : > { %v2739_v49 = vpop.xlane.xlu0 %2738 }
 0x9f9   : > { %v2758_v28 = vsub.f32 %v6950_v17, %v2739_v49  ;;  %5486 = vpow2.f32 %v2784_v44  ;;  %v2875_v49 = vpop.permute.xlu1 %2874 }
 0x9fb   : > { %2808 = vadd.xlane.f32.xlu1 %v7026_v15  ;;  %v2786_v1 = vmul.f32 1.442695, %v2758_v28 }
 0x9fc   : > { %v2741_v26 = vpop.xlane.xlu0 %2740 }
 0x9fd   : > { %v2759_v50 = vsub.f32 %v6954_v58, %v2741_v26  ;;  %5488 = vpow2.f32 %v2786_v1 }
 0x9fe   : > { %v7030_v6 = vpop.eup %5478 }
 0x9ff   : > { %v2788_v51 = vmul.f32 1.442695, %v2759_v50  ;;  %2812 = vadd.xlane.f32.xlu0 %v7030_v6  ;;  %v7033_v25 = vpop.eup %5480 }
 0xa00   : > { %v2745_v27 = vpop.xlane.xlu0 %2744 }
 0xa01   : > { %5490 = vpow2.f32 %v2788_v51  ;;  %v2761_v17 = vsub.f32 %v6958_v45, %v2745_v27  ;;  %v2869_v51 = vpop.permute.xlu1 %2868 }
 0xa02   : > { %v7036_v9 = vpop.eup %5482 }
 0xa03   : > { %v2792_v61 = vmul.f32 1.442695, %v2761_v17  ;;  %2822 = vadd.xlane.f32.xlu0 %v7033_v25  ;;  %2814 = vadd.xlane.f32.xlu1 %v7036_v9  ;;  %v7040_v58 = vpop.eup %5484 }
 0xa04   : > { %v2879_v19 = vpop.permute.xlu0 %2878 }
 0xa05   : > { %5492 = vpow2.f32 %v2792_v61 }
 0xa06   : > { %v7043_v35 = vpop.eup %5486 }
 0xa07   : > { %2810 = vadd.xlane.f32.xlu1 %v7040_v58 }
 0xa08   : > { %v2873_v39 = vpop.permute.xlu0 %2872 }
 0xa0a   : > { %v7046_v8 = vpop.eup %5488 }
 0xa0b   : > { %2816 = vadd.xlane.f32.xlu1 %v7043_v35 }
 0xa0c   : > { %v2871_v29 = vpop.permute.xlu0 %2870 }
 0xa0e   : > { %v7048_v3 = vpop.eup %5490 }
 0xa0f   : > { %2818 = vadd.xlane.f32.xlu1 %v7046_v8  ;;  %2820 = vadd.xlane.f32.xlu0 %v7048_v3 }
 0xa12   : > { %v7052_v45 = vpop.eup %5492 }
 0xa13   : > { %2824 = vadd.xlane.f32.xlu1 %v7052_v45 }
 0xa25   : > { %2866 = vrot.lane.b32.xlu0 %v5938_v34, %s5731_s24  ;;  %v7081_v34 = vpop.f32.mrf.mxu0 }
 0xa27   : > { %v7083_v42 = vpop.f32.mrf.mxu0 }
 0xa29   : > { %v7085_v10 = vpop.f32.mrf.mxu0 }
 0xa2b   : > { %v7087_v38 = vpop.f32.mrf.mxu0 }
 0xa5c   : > { %v4998_v24 = vpop.f32.mrf.mxu0 }
 0xa5e   : > { %v2324_v43 = vpop.f32.mrf.mxu0 }
 0xa60   : > { %v4999_v52 = vpop.f32.mrf.mxu0 }
 0xa61   : > { %v2388_v4 = vpack.c.bf16 %v4999_v52, %v4998_v24 }
 0xa62   : > { %v2327_v16 = vpop.f32.mrf.mxu0 }
 0xa63   : > { %v2387_v36 = vpack.c.bf16 %v2327_v16, %v2324_v43 }
 0xa64   : > { %v5002_v47 = vpop.f32.mrf.mxu0 }
 0xa65   : > { %5014 = vmatprep.mubr.msk.bf16.mxu0 %vm800_vm1, %v2387_v36 }
 0xa66   : > { %v2340_v13 = vpop.f32.mrf.mxu0  ;;  %5015 = vmatmul.mubr.msk.bf16.vlgmr.msra.gmra.mxu0 %vm800_vm1, %v2388_v4 }
 0xa67   : > { %5063 = vmatpush3.bf16.msra.mxu0 %v6984_v40 }
 0xa68   : > { %5064 = vmatprep.subr.bf16.mxu0 %v2879_v19  ;;  %v5003_v23 = vpop.f32.mrf.mxu0 }
 0xa69   : > { %v2390_v41 = vpack.c.bf16 %v5003_v23, %v5002_v47 }
 0xa6a   : > { %v2343_v31 = vpop.f32.mrf.mxu0 }
 0xa6b   : > { %v2389_v5 = vpack.c.bf16 %v2343_v31, %v2340_v13  ;;  %5065 = vmatpush3.bf16.msra.mxu0 %v2879_v19 }
 0xa6c   : > { %5066 = vmatprep.subr.bf16.mxu0 %v2877_v30  ;;  %v5006_v57 = vpop.f32.mrf.mxu0 }
 0xa6d   : > { %5018 = vmatprep.mubr.msk.bf16.mxu0 %vm800_vm1, %v2389_v5 }
 0xa6e   : > { %v2356_v59 = vpop.f32.mrf.mxu0  ;;  %5019 = vmatmul.mubr.msk.bf16.gmra.mxu0 %vm800_vm1, %v2390_v41 }
 0xa6f   : > { %5067 = vmatpush3.bf16.msra.mxu0 %v2877_v30 }
 0xa70   : > { %5068 = vmatprep.subr.bf16.mxu0 %v2875_v49  ;;  %v5007_v40 = vpop.f32.mrf.mxu0  ;;  %v2799_v44 = vpop.xlane.xlu0 %2798 }
 0xa71   : > { %v2392_v26 = vpack.c.bf16 %v5007_v40, %v5006_v57 }
 0xa72   : > { %v2359_v28 = vpop.f32.mrf.mxu0 }
 0xa73   : > { %v2391_v1 = vpack.c.bf16 %v2359_v28, %v2356_v59  ;;  %5069 = vmatpush3.bf16.msra.mxu0 %v2875_v49 }
 0xa74   : > { %5070 = vmatprep.subr.bf16.mxu0 %v2873_v39  ;;  %v2795_v50 = vpop.xlane.xlu0 %2794 }
 0xa75   : > { %5022 = vmatprep.mubr.msk.bf16.mxu0 %vm800_vm1, %v2391_v1 }
 0xa76   : > { %5023 = vmatmul.mubr.msk.bf16.gmra.mxu0 %vm800_vm1, %v2392_v26 }
 0xa77   : > { %5071 = vmatpush3.bf16.msra.mxu0 %v2873_v39 }
 0xa78   : > { %5072 = vmatprep.subr.bf16.mxu0 %v2871_v29  ;;  %v2801_v27 = vpop.xlane.xlu0 %2800 }
 0xa7b   : > { %5073 = vmatpush3.bf16.msra.mxu0 %v2871_v29 }
 0xa7c   : > { %5074 = vmatprep.subr.bf16.mxu0 %v2869_v51  ;;  %v2807_v17 = vpop.xlane.xlu1 %2806  ;;  %v2797_v61 = vpop.xlane.xlu0 %2796 }
 0xa7d   : > { %5494 = vrcp.f32 %v2797_v61 }
 0xa7e   : > { %5496 = vrcp.f32 %v2795_v50 }
 0xa7f   : > { %5075 = vmatpush3.bf16.msra.mxu0 %v2869_v51  ;;  %5498 = vrcp.f32 %v2801_v27 }
 0xa80   : > { %v2803_v24 = vpop.xlane.xlu1 %2802  ;;  %v2805_v43 = vpop.xlane.xlu0 %2804 }
 0xa81   : > { %5500 = vrcp.f32 %v2803_v24 }
 0xa82   : > { %5502 = vrcp.f32 %v2805_v43 }
 0xa83   : > { %5504 = vrcp.f32 %v2799_v44 }
 0xa84   : > { %v2809_v52 = vpop.xlane.xlu1 %2808 }
 0xa85   : > { %5506 = vrcp.f32 %v2809_v52 }
 0xa88   : > { %v2813_v19 = vpop.xlane.xlu0 %2812 }
 0xa8a   : > { %v5495_v23 = vpop.eup %5494 }
 0xa8b   : > { %v5497_v5 = vpop.eup %5496  ;;  %v2843_v57 = vmul.f32 %v5495_v23, %v7010_v12 }
 0xa8c   : > { %v2815_v16 = vpop.xlane.xlu1 %2814  ;;  %v2823_v36 = vpop.xlane.xlu0 %2822  ;;  %v2842_v49 = vmul.f32 %v5497_v5, %v7002_v22 }
 0xa8d   : > { %v5499_v40 = vpop.eup %5498 }
 0xa8e   : > { %v5501_v28 = vpop.eup %5500  ;;  %v2858_v26 = vpack.c.bf16 %v2843_v57, %v2842_v49  ;;  %v2845_v12 = vmul.f32 %v5499_v40, %v7007_v18  ;;  %v1875_v40 = vadd.f32 %v7057_v0, %v6747_v54  ;;  %v8235_v0 = vld [vmem:[#allocation30_spill] sm:$0xff] }
 0xa8f   : > { %v5503_v50 = vpop.eup %5502  ;;  %v2846_v27 = vmul.f32 %v5501_v28, %v7018_v32 }
 0xa90   : > { %v2811_v4 = vpop.xlane.xlu1 %2810  ;;  %v5505_v51 = vpop.eup %5504  ;;  %v2847_v22 = vmul.f32 %v5503_v50, %v7021_v55  ;;  %v8233_v50 = vld [vmem:[#allocation28_spill] sm:$0xff] }
 0xa91   : > { %5508 = vrcp.f32 %v2811_v4 }
 0xa92   : > { %5510 = vrcp.f32 %v2807_v17  ;;  %v2844_v17 = vmul.f32 %v5505_v51, %v6999_v63  ;;  %v5507_v24 = vpop.eup %5506  ;;  %v2860_v52 = vpack.c.bf16 %v2847_v22, %v2846_v27  ;;  %v1891_v22 = vadd.f32 %v7067_v60, %v8235_v0 }
 0xa93   : > { %5512 = vrcp.f32 %v2813_v19  ;;  %v2849_v18 = vmul.f32 %v5507_v24, %v7026_v15 }
 0xa94   : > { %v2817_v31 = vpop.xlane.xlu1 %2816  ;;  %v2859_v61 = vpack.c.bf16 %v2845_v12, %v2844_v17 }
 0xa95   : > { %5514 = vrcp.f32 %v2817_v31 }
 0xa98   : > { %v2821_v47 = vpop.xlane.xlu0 %2820  ;;  %v2819_v1 = vpop.xlane.xlu1 %2818 }
 0xa99   : > { %5516 = vrcp.f32 %v2819_v1  ;;  %v1886_v1 = vadd.f32 %v7061_v14, %v6749_v62  ;;  %v8236_v14 = vld [vmem:[#allocation31_spill] sm:$0xff] }
 0xa9a   : > { %5518 = vrcp.f32 %v2821_v47 }
 0xa9b   : > { %v5010_v13 = vpop.f32.mrf.mxu0  ;;  %5520 = vrcp.f32 %v2815_v16 }
 0xa9c   : > { %v2867_v39 = vpop.permute.xlu0 %2866  ;;  %v2825_v43 = vpop.xlane.xlu1 %2824 }
 0xa9d   : > { %v2372_v30 = vpop.f32.mrf.mxu0  ;;  %5076 = vmatprep.subr.bf16.mxu0 %v2867_v39  ;;  %5522 = vrcp.f32 %v2825_v43  ;;  %v8237_v43 = vld [vmem:[#allocation32_spill] sm:$0xff] }
 0xa9e   : > { %5077 = vmatpush3.bf16.msra.mxu0 %v2867_v39  ;;  %v5509_v19 = vpop.eup %5508  ;;  %5524 = vrcp.f32 %v2823_v36 }
 0xa9f   : > { %v5011_v41 = vpop.f32.mrf.mxu0  ;;  %v5511_v4 = vpop.eup %5510  ;;  %v2850_v47 = vmul.f32 %v5509_v19, %v7040_v58 }
 0xaa0   : > { %v2394_v44 = vpack.c.bf16 %v5011_v41, %v5010_v13  ;;  %v5513_v13 = vpop.eup %5512  ;;  %v2848_v32 = vmul.f32 %v5511_v4, %v7014_v53  ;;  %v8238_v4 = vld [vmem:[#allocation33_spill] sm:$0xff] }
 0xaa1   : > { %v2375_v29 = vpop.f32.mrf.mxu0  ;;  %v2851_v55 = vmul.f32 %v5513_v13, %v7030_v6  ;;  %v4532_v6 = vld [vmem:[%s8147_s3 + $0xc] sm:$0xf]  ;;  %v1915_v13 = vadd.f32 %v7073_v20, %v8238_v4 }
 0xaa2   : > { %v2393_v59 = vpack.c.bf16 %v2375_v29, %v2372_v30  ;;  %v5515_v63 = vpop.eup %5514  ;;  %v2861_v16 = vpack.c.bf16 %v2849_v18, %v2848_v32  ;;  %5183 = vmatprep.subr.msk.bf16.mxu0 %vm1712_vm4, %v4532_v6 }
 0xaa3   : > { %v2862_v23 = vpack.c.bf16 %v2851_v55, %v2850_v47  ;;  %v2853_v5 = vmul.f32 %v5515_v63, %v7043_v35  ;;  %v3022_v35 = vsel %vm1712_vm4, %v4532_v6, 0  ;;  %v8239_v47 = vld [vmem:[#allocation34_spill] sm:$0xff]  ;;  %v8240_v63 = vld [vmem:[#allocation35_spill] sm:$0xff] }
 0xaa4   : > { %5026 = vmatprep.mubr.msk.bf16.mxu0 %vm800_vm1, %v2393_v59  ;;  %v1883_v59 = vadd.f32 %v7055_v11, %v6745_v48  ;;  %v8234_v48 = vld [vmem:[#allocation29_spill] sm:$0xff]  ;;  %v1907_v32 = vadd.f32 %v7075_v56, %v8239_v47 }
 0xaa5   : > { %5027 = vmatmul.mubr.msk.bf16.gmra.mxu0 %vm800_vm1, %v2394_v44  ;;  %v1899_v11 = vadd.f32 %v7065_v21, %v8234_v48 }
 0xaa6   : > { %5078 = vmatprep.mubr.bf16.mxu0 %v2858_v26  ;;  %v5517_v39 = vpop.eup %5516 }
 0xaa7   : > { %v5519_v30 = vpop.eup %5518  ;;  %v2854_v41 = vmul.f32 %v5517_v39, %v7046_v8 }
 0xaa8   : > { %v5521_v31 = vpop.eup %5520  ;;  %v2855_v15 = vmul.f32 %v5519_v30, %v7048_v3 }
 0xaa9   : > { %v2852_v58 = vmul.f32 %v5521_v31, %v7036_v9 }
 0xaaa   : > { %v5523_v53 = vpop.eup %5522  ;;  %v2864_v57 = vpack.c.bf16 %v2855_v15, %v2854_v41  ;;  %v8242_v41 = vld [vmem:[#allocation37_spill] sm:$0xff] }
 0xaab   : > { %v2863_v36 = vpack.c.bf16 %v2853_v5, %v2852_v58  ;;  %v5525_v29 = vpop.eup %5524  ;;  %v2857_v8 = vmul.f32 %v5523_v53, %v7052_v45  ;;  %v1931_v56 = vadd.f32 %v7081_v34, %v8242_v41  ;;  %v8243_v58 = vld [vmem:[#allocation38_spill] sm:$0xff] }
 0xaac   : > { %v2856_v3 = vmul.f32 %v5525_v29, %v7033_v25  ;;  %v1878_v25 = vadd.f32 %v7063_v2, %v8233_v50 }
 0xaad   : > { %5079 = vmatmul.mubr.bf16.vlgmr.msra.gmra.mxu0 %v2859_v61  ;;  %v1902_v61 = vadd.f32 %v7069_v33, %v8236_v14 }
 0xaae   : > { %5082 = vmatprep.mubr.bf16.mxu0 %v2860_v52  ;;  %5095 = vmatpush3.bf16.msra.mxu0 %v3022_v35  ;;  %v2865_v9 = vpack.c.bf16 %v2857_v8, %v2856_v3  ;;  %v1894_v52 = vadd.f32 %v7071_v37, %v8237_v43  ;;  %v8245_v35 = vld [vmem:[#allocation40_spill] sm:$0xff] }
 0xaaf   : > { %v1926_v8 = vadd.f32 %v7087_v38, %v8245_v35 }
 0xab5   : > { %5083 = vmatmul.mubr.bf16.gmra.mxu0 %v2861_v16  ;;  %v1918_v16 = vadd.f32 %v7077_v7, %v8240_v63 }
 0xab6   : > { %5086 = vmatprep.mubr.bf16.mxu0 %v2862_v23  ;;  %v8241_v23 = vld [vmem:[#allocation36_spill] sm:$0xff] }
 0xab7   : > { %v1910_v30 = vadd.f32 %v7079_v46, %v8241_v23  ;;  %v5658_v23 = vld [vmem:[%s5899_s27 + $0x10] sm:$0xff] }
 0xabd   : > { %5087 = vmatmul.mubr.bf16.gmra.mxu0 %v2863_v36  ;;  %v1923_v36 = vadd.f32 %v7083_v42, %v8243_v58 }
 0xabe   : > { %5090 = vmatprep.mubr.bf16.mxu0 %v2864_v57  ;;  %v8244_v57 = vld [vmem:[#allocation39_spill] sm:$0xff] }
 0xabf   : > { %v1934_v6 = vadd.f32 %v7085_v10, %v8244_v57 }
 0xac5   : > { %5091 = vmatmul.mubr.bf16.gmra.mxu0 %v2865_v9 }
 0xb26   : > { %v5016_v49 = vpop.f32.mrf.mxu0 }
 0xb27   : > { %v7123_v44 = vadd.f32 %v5016_v49, %v1883_v59 }
 0xb28   : > { %v2458_v28 = vpop.f32.mrf.mxu0 }
 0xb29   : > { %v7127_v26 = vadd.f32 %v2458_v28, %v1875_v40 }
 0xb2a   : > { %v5017_v45 = vpop.f32.mrf.mxu0 }
 0xb2b   : > { %v7131_v51 = vadd.f32 %v5017_v45, %v1886_v1 }
 0xb2c   : > { %v2461_v12 = vpop.f32.mrf.mxu0 }
 0xb2d   : > { %v7135_v27 = vadd.f32 %v2461_v12, %v1878_v25 }
 0xb2e   : > { %v5020_v54 = vpop.f32.mrf.mxu0 }
 0xb2f   : > { %v7139_v17 = vadd.f32 %v5020_v54, %v1899_v11 }
 0xb30   : > { %v2474_v62 = vpop.f32.mrf.mxu0 }
 0xb31   : > { %v7143_v24 = vadd.f32 %v2474_v62, %v1891_v22 }
 0xb32   : > { %v5021_v2 = vpop.f32.mrf.mxu0 }
 0xb33   : > { %v7147_v19 = vadd.f32 %v5021_v2, %v1902_v61 }
 0xb34   : > { %v2477_v21 = vpop.f32.mrf.mxu0 }
 0xb35   : > { %v7151_v18 = vadd.f32 %v2477_v21, %v1894_v52 }
 0xb36   : > { %v5024_v60 = vpop.f32.mrf.mxu0 }
 0xb37   : > { %v7155_v55 = vadd.f32 %v5024_v60, %v1915_v13  ;;  %v7194_v13 = vld [vmem:[%s8148_s4] ss:$0 sm:$0xff] }
 0xb38   : > { %v2490_v33 = vpop.f32.mrf.mxu0 }
 0xb39   : > { %v7159_v39 = vadd.f32 %v2490_v33, %v1907_v32 }
 0xb3a   : > { %v5025_v37 = vpop.f32.mrf.mxu0 }
 0xb3b   : > { %v7163_v31 = vadd.f32 %v5025_v37, %v1918_v16 }
 0xb3c   : > { %v2493_v20 = vpop.f32.mrf.mxu0 }
 0xb3d   : > { %v7165_v5 = vadd.f32 %v2493_v20, %v1910_v30 }
 0xb65   : > { %v5028_v15 = vpop.f32.mrf.mxu0 }
 0xb66   : > { %v7171_v53 = vadd.f32 %v5028_v15, %v1931_v56  ;;  %v5659_v15 = vld [vmem:[%s5899_s27] sm:$0xff] }
 0xb67   : > { %v2506_v7 = vpop.f32.mrf.mxu0 }
 0xb68   : > { %v7175_v29 = vadd.f32 %v2506_v7, %v1923_v36 }
 0xb69   : > { %v5029_v46 = vpop.f32.mrf.mxu0 }
 0xb6a   : > { %v7179_v3 = vadd.f32 %v5029_v46, %v1934_v6  ;;  %v5660_v6 = vld [vmem:[%s5899_s27 + $0x18] sm:$0xff] }
 0xb6b   : > { %v2509_v9 = vpop.f32.mrf.mxu0 }
 0xb6c   : > { %v7181_v34 = vadd.f32 %v2509_v9, %v1926_v8 }
 0xb6d   : > { %v5080_v59 = vpop.f32.mrf.mxu0 }
 0xb6f   : > { %v2924_v49 = vpop.f32.mrf.mxu0 }
 0xb71   : > { %v5081_v42 = vpop.f32.mrf.mxu0 }
 0xb72   : > { %v2988_v1 = vpack.c.bf16 %v5081_v42, %v5080_v59 }
 0xb73   : > { %v2927_v40 = vpop.f32.mrf.mxu0 }
 0xb74   : > { %v2987_v28 = vpack.c.bf16 %v2927_v40, %v2924_v49  ;;  %v5661_v49 = vld [vmem:[%s5899_s27 + $0x8] sm:$0xff] }
 0xb75   : > { %v5084_v45 = vpop.f32.mrf.mxu0 }
 0xb76   : > { %5096 = vmatprep.mubr.msk.bf16.mxu0 %vm800_vm1, %v2987_v28 }
 0xb77   : > { %v2940_v10 = vpop.f32.mrf.mxu0  ;;  %5097 = vmatmul.mubr.msk.bf16.vlgmr.msra.gmra.mxu0 %vm800_vm1, %v2988_v1 }
 0xb79   : > { %v5085_v50 = vpop.f32.mrf.mxu0 }
 0xb7a   : > { %v2990_v12 = vpack.c.bf16 %v5085_v50, %v5084_v45 }
 0xb7b   : > { %v2943_v25 = vpop.f32.mrf.mxu0 }
 0xb7c   : > { %v2989_v38 = vpack.c.bf16 %v2943_v25, %v2940_v10  ;;  %v5663_v25 = vld [vmem:[%s5899_s27 + $0x20] sm:$0xff] }
 0xb7d   : > { %v5088_v48 = vpop.f32.mrf.mxu0 }
 0xb7e   : > { %5100 = vmatprep.mubr.msk.bf16.mxu0 %vm800_vm1, %v2989_v38 }
 0xb7f   : > { %v2956_v11 = vpop.f32.mrf.mxu0  ;;  %5101 = vmatmul.mubr.msk.bf16.gmra.mxu0 %vm800_vm1, %v2990_v12 }
 0xb81   : > { %v5089_v54 = vpop.f32.mrf.mxu0 }
 0xb82   : > { %v2992_v62 = vpack.c.bf16 %v5089_v54, %v5088_v48 }
 0xb83   : > { %v2959_v0 = vpop.f32.mrf.mxu0 }
 0xb84   : > { %v2991_v22 = vpack.c.bf16 %v2959_v0, %v2956_v11 }
 0xb85   : > { %v5092_v14 = vpop.f32.mrf.mxu0 }
 0xb86   : > { %5104 = vmatprep.mubr.msk.bf16.mxu0 %vm800_vm1, %v2991_v22  ;;  %v5664_v22 = vld [vmem:[%s5899_s27 + $0x30] sm:$0xff] }
 0xb87   : > { %v2972_v61 = vpop.f32.mrf.mxu0  ;;  %5105 = vmatmul.mubr.msk.bf16.gmra.mxu0 %vm800_vm1, %v2992_v62 }
 0xb89   : > { %v5093_v2 = vpop.f32.mrf.mxu0 }
 0xb8a   : > { %v2994_v21 = vpack.c.bf16 %v5093_v2, %v5092_v14  ;;  %v5665_v2 = vld [vmem:[%s5899_s27 + $0x38] sm:$0xff] }
 0xb8b   : > { %v2975_v43 = vpop.f32.mrf.mxu0 }
 0xb8c   : > { %v2993_v52 = vpack.c.bf16 %v2975_v43, %v2972_v61 }
 0xb8e   : > { %5108 = vmatprep.mubr.msk.bf16.mxu0 %vm800_vm1, %v2993_v52 }
 0xb8f   : > { %5109 = vmatmul.mubr.msk.bf16.gmra.mxu0 %vm800_vm1, %v2994_v21 }
 0xc37   : > { %v5098_v4 = vpop.f32.mrf.mxu0 }
 0xc38   : > { %v3123_v60 = vadd.f32 %v5098_v4, %v7123_v44 }
 0xc39   : > { %v3058_v47 = vpop.f32.mrf.mxu0 }
 0xc3a   : > { %v3146_v32 = vadd.f32 %v7194_v13, %v3123_v60  ;;  %v3121_v33 = vadd.f32 %v3058_v47, %v7127_v26  ;;  %v5666_v60 = vld [vmem:[%s5899_s27 + $0x70] sm:$0xff] }
 0xc3b   : > { %v5099_v63 = vpop.f32.mrf.mxu0 }
 0xc3c   : > { %v3144_v16 = vadd.f32 %v7194_v13, %v3121_v33  ;;  %v3124_v37 = vadd.f32 %v5099_v63, %v7131_v51  ;;  %v7202_v30 = vadd.f32 %v5658_v23, %v3146_v32  ;;  %v5667_v63 = vld [vmem:[%s5899_s27 + $0x50] sm:$0xff] }
 0xc3d   : > { %v3061_v20 = vpop.f32.mrf.mxu0 }
 0xc3e   : > { %v3147_v41 = vadd.f32 %v7194_v13, %v3124_v37  ;;  %v3122_v56 = vadd.f32 %v3061_v20, %v7135_v27  ;;  %v3182_v44 = vsel %vm578_vm0, %v7202_v30, 0.0  ;;  %v7209_v58 = vadd.f32 %v5659_v15, %v3144_v16 }
 0xc3f   : > { %3183 = vadd.xlane.f32.xlu1 %v3182_v44  ;;  %v5102_v26 = vpop.f32.mrf.mxu0 }
 0xc40   : > { %v3145_v51 = vadd.f32 %v7194_v13, %v3122_v56  ;;  %v3176_v57 = vsel %vm578_vm0, %v7209_v58, 0.0  ;;  %v7216_v46 = vadd.f32 %v5660_v6, %v3147_v41  ;;  %v3127_v35 = vadd.f32 %v5102_v26, %v7139_v17  ;;  %v5668_v56 = vld [vmem:[%s5899_s27 + $0x40] sm:$0xff] }
 0xc41   : > { %v3074_v36 = vpop.f32.mrf.mxu0 }
 0xc42   : > { %v3125_v7 = vadd.f32 %v3074_v36, %v7143_v24  ;;  %v3185_v24 = vsel %vm578_vm0, %v7216_v46, 0.0  ;;  %v7224_v42 = vadd.f32 %v5661_v49, %v3145_v51  ;;  %v3150_v45 = vadd.f32 %v7194_v13, %v3127_v35  ;;  %v5669_v51 = vld [vmem:[%s5899_s27 + $0x58] sm:$0xff]  ;;  %v5670_v35 = vld [vmem:[%s5899_s27 + $0x48] sm:$0xff] }
 0xc43   : > { %3177 = vadd.xlane.f32.xlu1 %v3176_v57  ;;  %v5103_v27 = vpop.f32.mrf.mxu0 }
 0xc44   : > { %v3148_v9 = vadd.f32 %v7194_v13, %v3125_v7  ;;  %v3128_v1 = vadd.f32 %v5103_v27, %v7147_v19  ;;  %v3179_v10 = vsel %vm578_vm0, %v7224_v42, 0.0  ;;  %v7244_v62 = vadd.f32 %v5664_v22, %v3150_v45 }
 0xc45   : > { %v3077_v8 = vpop.f32.mrf.mxu0 }
 0xc46   : > { %v3126_v59 = vadd.f32 %v3077_v8, %v7151_v18  ;;  %v5662_v18 = vld [vmem:[%s5899_s27 + $0x28] sm:$0xff]  ;;  %v7235_v38 = vadd.f32 %v5663_v25, %v3148_v9  ;;  %v3151_v19 = vadd.f32 %v7194_v13, %v3128_v1  ;;  %v3194_v4 = vsel %vm578_vm0, %v7244_v62, 0.0 }
 0xc47   : > { %3186 = vadd.xlane.f32.xlu1 %v3185_v24  ;;  %v5106_v40 = vpop.f32.mrf.mxu0  ;;  %v5671_v24 = vld [vmem:[%s5899_s27 + $0x60] sm:$0xff] }
 0xc48   : > { %v3149_v28 = vadd.f32 %v7194_v13, %v3126_v59  ;;  %v3131_v54 = vadd.f32 %v5106_v40, %v7155_v55  ;;  %v3188_v0 = vsel %vm578_vm0, %v7235_v38, 0.0  ;;  %v7248_v43 = vadd.f32 %v5665_v2, %v3151_v19 }
 0xc49   : > { %v3090_v17 = vpop.f32.mrf.mxu0 }
 0xc4a   : > { %v7232_v50 = vadd.f32 %v5662_v18, %v3149_v28  ;;  %v3154_v52 = vadd.f32 %v7194_v13, %v3131_v54  ;;  %v3129_v21 = vadd.f32 %v3090_v17, %v7159_v39  ;;  %v5672_v28 = vld [vmem:[%s5899_s27 + $0x68] sm:$0xff]  ;;  %v5673_v17 = vld [vmem:[%s5899_s27 + $0x78] sm:$0xff]  ;;  %s4459_s27 = sshll.u32 %s5831_s29, 1 }
 0xc4b   : > { %3180 = vadd.xlane.f32.xlu1 %v3179_v10  ;;  %v5107_v12 = vpop.f32.mrf.mxu0  ;;  %p518_p1 = scmp.lt.s32.totalorder %s4459_s27, 3 }
 0xc4c   : > { %v3191_v48 = vsel %vm578_vm0, %v7232_v50, 0.0  ;;  %v3152_v32 = vadd.f32 %v7194_v13, %v3129_v21  ;;  %v3132_v33 = vadd.f32 %v5107_v12, %v7163_v31  ;;  %v7265_v16 = vadd.f32 %v5667_v63, %v3154_v52 }
 0xc4d   : > { %3192 = vadd.xlane.f32.xlu0 %v3191_v48  ;;  %v3093_v11 = vpop.f32.mrf.mxu0  ;;  %s8258_s27 = smov (!%p518_p1, %s4459_s27), 3 }
 0xc4e   : > { %v3155_v23 = vadd.f32 %v7194_v13, %v3132_v33  ;;  %v3130_v20 = vadd.f32 %v3093_v11, %v7165_v5  ;;  %v3206_v41 = vsel %vm578_vm0, %v7265_v16, 0.0  ;;  %v7272_v31 = vadd.f32 %v5668_v56, %v3152_v32  ;;  %s4460_s21 = sshll.u32 %s8258_s27, 3 }
 0xc4f   : > { %3189 = vadd.xlane.f32.xlu1 %v3188_v0  ;;  %v5110_v14 = vpop.f32.mrf.mxu0  ;;  %s7927_s15 = scalar_lea.vmem %s8155_s11, %s4460_s21  ;;  %s7933_s17 = scalar_lea.vmem %s8246_s14, %s4460_s21 }
 0xc50   : > { %v3135_v61 = vadd.f32 %v5110_v14, %v7171_v53  ;;  %v3197_v53 = vsel %vm578_vm0, %v7248_v43, 0.0  ;;  %v3153_v15 = vadd.f32 %v7194_v13, %v3130_v20  ;;  %v3200_v36 = vsel %vm578_vm0, %v7272_v31, 0.0 }
 0xc51   : > { %v3106_v37 = vpop.f32.mrf.mxu0  ;;  %v7279_v7 = vadd.f32 %v5669_v51, %v3155_v23 }
 0xc52   : > { %v3158_v55 = vadd.f32 %v7194_v13, %v3135_v61  ;;  %v3133_v26 = vadd.f32 %v3106_v37, %v7175_v29  ;;  %v7286_v8 = vadd.f32 %v5670_v35, %v3153_v15 }
 0xc53   : > { %3195 = vadd.xlane.f32.xlu1 %v3194_v4  ;;  %v5111_v44 = vpop.f32.mrf.mxu0  ;;  %v3209_v27 = vsel %vm578_vm0, %v7279_v7, 0.0 }
 0xc54   : > { %v7256_v47 = vadd.f32 %v5666_v60, %v3158_v55  ;;  %v3156_v57 = vadd.f32 %v7194_v13, %v3133_v26  ;;  %v3136_v29 = vadd.f32 %v5111_v44, %v7179_v3  ;;  %v3203_v59 = vsel %vm578_vm0, %v7286_v8, 0.0 }
 0xc55   : > { %v3109_v5 = vpop.f32.mrf.mxu0 }
 0xc56   : > { %v3218_v39 = vsel %vm578_vm0, %v7256_v47, 0.0  ;;  %v3134_v6 = vadd.f32 %v3109_v5, %v7181_v34  ;;  %v7293_v49 = vadd.f32 %v5671_v24, %v3156_v57  ;;  %v3159_v34 = vadd.f32 %v7194_v13, %v3136_v29 }
 0xc57   : > { %3198 = vadd.xlane.f32.xlu1 %v3197_v53  ;;  %3219 = vadd.xlane.f32.xlu0 %v3218_v39 }
 0xc58   : > { %v3157_v9 = vadd.f32 %v7194_v13, %v3134_v6  ;;  %v3212_v40 = vsel %vm578_vm0, %v7293_v49, 0.0  ;;  %v7304_v45 = vadd.f32 %v5673_v17, %v3159_v34 }
 0xc5a   : > { %v7299_v1 = vadd.f32 %v5672_v28, %v3157_v9  ;;  %v3221_v10 = vsel %vm578_vm0, %v7304_v45, 0.0 }
 0xc5b   : > { %3207 = vadd.xlane.f32.xlu1 %v3206_v41 }
 0xc5c   : > { %v3215_v3 = vsel %vm578_vm0, %v7299_v1, 0.0 }
 0xc5f   : > { %3201 = vadd.xlane.f32.xlu1 %v3200_v36 }
 0xc63   : > { %3210 = vadd.xlane.f32.xlu1 %v3209_v27 }
 0xc67   : > { %3204 = vadd.xlane.f32.xlu1 %v3203_v59 }
 0xc6b   : > { %3213 = vadd.xlane.f32.xlu1 %v3212_v40 }
 0xc6f   : > { %3216 = vadd.xlane.f32.xlu1 %v3215_v3 }
 0xc73   : > { %3222 = vadd.xlane.f32.xlu1 %v3221_v10 }
 0xcc8   : > { %v3184_v18 = vpop.xlane.xlu1 %3183 }
 0xcc9   : > { %v3227_v13 = vmul.f32 0.03125, %v3184_v18 }
 0xccb   : > { %v7309_v48 = vsub.f32 %v7202_v30, %v3227_v13 }
 0xccc   : > { %v3178_v25 = vpop.xlane.xlu1 %3177 }
 0xccd   : > { %v3225_v12 = vmul.f32 0.03125, %v3178_v25  ;;  %v3259_v14 = vmul.f32 %v7309_v48, %v7309_v48 }
 0xccf   : > { %v7312_v19 = vsub.f32 %v7209_v58, %v3225_v12  ;;  %v3279_v55 = vsel %vm578_vm0, %v3259_v14, 0.0 }
 0xcd0   : > { %v3187_v11 = vpop.xlane.xlu1 %3186 }
 0xcd1   : > { %v3257_v54 = vmul.f32 %v7312_v19, %v7312_v19  ;;  %v3228_v0 = vmul.f32 0.03125, %v3187_v11 }
 0xcd3   : > { %v3273_v22 = vsel %vm578_vm0, %v3257_v54, 0.0  ;;  %v7320_v30 = vsub.f32 %v7216_v46, %v3228_v0 }
 0xcd4   : > { %v3181_v61 = vpop.xlane.xlu1 %3180  ;;  %3274 = vadd.xlane.f32.xlu0 %v3273_v22 }
 0xcd5   : > { %v3226_v2 = vmul.f32 0.03125, %v3181_v61 }
 0xcd6   : > { %v3193_v52 = vpop.xlane.xlu0 %3192 }
 0xcd7   : > { %v7323_v58 = vsub.f32 %v7224_v42, %v3226_v2  ;;  %v3230_v21 = vmul.f32 0.03125, %v3193_v52  ;;  %v3260_v42 = vmul.f32 %v7320_v30, %v7320_v30  ;;  %v5268_v2 = vld [vmem:[%s8151_s7 + $0x8] sm:$0xff]  }
 0xcd8   : > { %v3190_v4 = vpop.xlane.xlu1 %3189  ;;  %3280 = vadd.xlane.f32.xlu0 %v3279_v55  ;;  %5112 = vmatprep.subr.bf16.mxu1 %v5268_v2 }
 0xcd9   : > { %v3229_v60 = vmul.f32 0.03125, %v3190_v4  ;;  %v3258_v53 = vmul.f32 %v7323_v58, %v7323_v58  ;;  %v7329_v32 = vsub.f32 %v7232_v50, %v3230_v21  ;;  %v3282_v20 = vsel %vm578_vm0, %v3260_v42, 0.0  ;;  %5113 = vmatpush3.bf16.msra.mxu1 %v5268_v2 }
 0xcdb   : > { %v7332_v33 = vsub.f32 %v7235_v38, %v3229_v60  ;;  %v3276_v46 = vsel %vm578_vm0, %v3258_v53, 0.0  ;;  %v3262_v38 = vmul.f32 %v7329_v32, %v7329_v32  ;;  %v5269_v53 = vld [vmem:[%s8151_s7] sm:$0xff]  }
 0xcdc   : > { %v3196_v39 = vpop.xlane.xlu1 %3195  ;;  %3277 = vadd.xlane.f32.xlu1 %v3276_v46  ;;  %5114 = vmatprep.subr.bf16.mxu1 %v5269_v53 }
 0xcdd   : > { %v3231_v63 = vmul.f32 0.03125, %v3196_v39  ;;  %v3261_v37 = vmul.f32 %v7332_v33, %v7332_v33  ;;  %v3288_v26 = vsel %vm578_vm0, %v3262_v38, 0.0  ;;  %5115 = vmatpush3.bf16.msra.mxu1 %v5269_v53 }
 0xcdf   : > { %v7340_v23 = vsub.f32 %v7244_v62, %v3231_v63  ;;  %v3285_v50 = vsel %vm578_vm0, %v3261_v37, 0.0 }
 0xce0   : > { %v3199_v41 = vpop.xlane.xlu1 %3198  ;;  %3286 = vadd.xlane.f32.xlu0 %v3285_v50  ;;  %3283 = vadd.xlane.f32.xlu1 %v3282_v20  ;;  %v3220_v40 = vpop.xlane.xlu0 %3219 }
 0xce1   : > { %v3232_v56 = vmul.f32 0.03125, %v3199_v41  ;;  %v3263_v44 = vmul.f32 %v7340_v23, %v7340_v23  ;;  %v3239_v17 = vmul.f32 0.03125, %v3220_v40 }
 0xce3   : > { %v7349_v15 = vsub.f32 %v7248_v43, %v3232_v56  ;;  %v3291_v62 = vsel %vm578_vm0, %v3263_v44, 0.0  ;;  %v7377_v12 = vsub.f32 %v7256_v47, %v3239_v17 }
 0xce4   : > { %v3208_v36 = vpop.xlane.xlu1 %3207  ;;  %3292 = vadd.xlane.f32.xlu0 %v3291_v62  ;;  %3289 = vadd.xlane.f32.xlu1 %v3288_v26 }
 0xce5   : > { %v3264_v51 = vmul.f32 %v7349_v15, %v7349_v15  ;;  %v3235_v5 = vmul.f32 0.03125, %v3208_v36 }
 0xce7   : > { %v3294_v57 = vsel %vm578_vm0, %v3264_v51, 0.0  ;;  %v7357_v35 = vsub.f32 %v7265_v16, %v3235_v5 }
 0xce8   : > { %v3202_v6 = vpop.xlane.xlu1 %3201  ;;  %3295 = vadd.xlane.f32.xlu1 %v3294_v57 }
 0xce9   : > { %v3233_v27 = vmul.f32 0.03125, %v3202_v6  ;;  %v3267_v34 = vmul.f32 %v7357_v35, %v7357_v35 }
 0xceb   : > { %v7360_v43 = vsub.f32 %v7272_v31, %v3233_v27  ;;  %v3303_v10 = vsel %vm578_vm0, %v3267_v34, 0.0 }
 0xcec   : > { %v3211_v29 = vpop.xlane.xlu1 %3210 }
 0xced   : > { %v3265_v9 = vmul.f32 %v7360_v43, %v7360_v43  ;;  %v3236_v59 = vmul.f32 0.03125, %v3211_v29 }
 0xcef   : > { %v3297_v24 = vsel %vm578_vm0, %v3265_v9, 0.0  ;;  %v7368_v16 = vsub.f32 %v7279_v7, %v3236_v59 }
 0xcf0   : > { %v3205_v28 = vpop.xlane.xlu1 %3204  ;;  %3298 = vadd.xlane.f32.xlu0 %v3297_v24 }
 0xcf1   : > { %v3234_v3 = vmul.f32 0.03125, %v3205_v28 }
 0xcf3   : > { %v7371_v31 = vsub.f32 %v7286_v8, %v3234_v3  ;;  %v3268_v8 = vmul.f32 %v7368_v16, %v7368_v16 }
 0xcf4   : > { %3304 = vadd.xlane.f32.xlu0 %v3303_v10  ;;  %v3214_v18 = vpop.xlane.xlu1 %3213  ;;  %v7414_v10 = vld [vmem:[%s8149_s5] ss:$0 sm:$0xff] }
 0xcf5   : > { %v3237_v13 = vmul.f32 0.03125, %v3214_v18  ;;  %v3266_v25 = vmul.f32 %v7371_v31, %v7371_v31  ;;  %v3306_v61 = vsel %vm578_vm0, %v3268_v8, 0.0 }
 0xcf7   : > { %v7380_v11 = vsub.f32 %v7293_v49, %v3237_v13  ;;  %v3300_v7 = vsel %vm578_vm0, %v3266_v25, 0.0  ;;  %v3271_v49 = vmul.f32 %v7377_v12, %v7377_v12 }
 0xcf8   : > { %3301 = vadd.xlane.f32.xlu1 %v3300_v7  ;;  %v3217_v54 = vpop.xlane.xlu1 %3216 }
 0xcf9   : > { %v3238_v0 = vmul.f32 0.03125, %v3217_v54  ;;  %v3269_v22 = vmul.f32 %v7380_v11, %v7380_v11  ;;  %v3315_v4 = vsel %vm578_vm0, %v3271_v49, 0.0  ;;  %v7422_v54 = vld [vmem:[%s8150_s6] ss:$0 sm:$0xff] }
 0xcfb   : > { %v7388_v14 = vsub.f32 %v7299_v1, %v3238_v0  ;;  %v3309_v47 = vsel %vm578_vm0, %v3269_v22, 0.0 }
 0xcfc   : > { %3310 = vadd.xlane.f32.xlu0 %v3309_v47  ;;  %3307 = vadd.xlane.f32.xlu1 %v3306_v61  ;;  %v3223_v52 = vpop.xlane.xlu1 %3222 }
 0xcfd   : > { %v3240_v21 = vmul.f32 0.03125, %v3223_v52  ;;  %v3270_v55 = vmul.f32 %v7388_v14, %v7388_v14 }
 0xcff   : > { %v7400_v1 = vsub.f32 %v7304_v45, %v3240_v21  ;;  %v3312_v60 = vsel %vm578_vm0, %v3270_v55, 0.0 }
 0xd00   : > { %3316 = vadd.xlane.f32.xlu0 %v3315_v4  ;;  %3313 = vadd.xlane.f32.xlu1 %v3312_v60 }
 0xd01   : > { %v3272_v46 = vmul.f32 %v7400_v1, %v7400_v1 }
 0xd03   : > { %v3318_v42 = vsel %vm578_vm0, %v3272_v46, 0.0 }
 0xd04   : > { %3319 = vadd.xlane.f32.xlu1 %v3318_v42 }
 0xd5d   : > { %v3275_v45 = vpop.xlane.xlu0 %3274 }
 0xd5e   : > { %v3321_v39 = vmul.f32 0.03125, %v3275_v45 }
 0xd60   : > { %v3337_v63 = vadd.f32 1e-05, %v3321_v39 }
 0xd61   : > { %v3281_v37 = vpop.xlane.xlu0 %3280 }
 0xd62   : > { %v3323_v50 = vmul.f32 0.03125, %v3281_v37  ;;  %5526 = vrsqrt.f32 %v3337_v63 }
 0xd64   : > { %v3339_v20 = vadd.f32 1e-05, %v3323_v50 }
 0xd65   : > { %v3278_v38 = vpop.xlane.xlu1 %3277 }
 0xd66   : > { %v3322_v41 = vmul.f32 0.03125, %v3278_v38  ;;  %5528 = vrsqrt.f32 %v3339_v20 }
 0xd68   : > { %v3338_v56 = vadd.f32 1e-05, %v3322_v41 }
 0xd69   : > { %v3287_v44 = vpop.xlane.xlu0 %3286  ;;  %v3284_v62 = vpop.xlane.xlu1 %3283 }
 0xd6a   : > { %5530 = vrsqrt.f32 %v3338_v56  ;;  %v3325_v26 = vmul.f32 0.03125, %v3287_v44  ;;  %v3324_v36 = vmul.f32 0.03125, %v3284_v62 }
 0xd6c   : > { %v3341_v51 = vadd.f32 1e-05, %v3325_v26  ;;  %v3340_v5 = vadd.f32 1e-05, %v3324_v36 }
 0xd6d   : > { %v3293_v57 = vpop.xlane.xlu0 %3292  ;;  %v3290_v6 = vpop.xlane.xlu1 %3289 }
 0xd6e   : > { %5532 = vrsqrt.f32 %v3341_v51  ;;  %v3327_v27 = vmul.f32 0.03125, %v3293_v57  ;;  %v3326_v29 = vmul.f32 0.03125, %v3290_v6 }
 0xd6f   : > { %5534 = vrsqrt.f32 %v3340_v5  ;;  %v5527_v24 = vpop.eup %5526 }
 0xd70   : > { %v3343_v9 = vadd.f32 1e-05, %v3327_v27  ;;  %v3342_v59 = vadd.f32 1e-05, %v3326_v29  ;;  %v3369_v3 = vmul.f32 %v5527_v24, %v7312_v19 }
 0xd71   : > { %v3296_v34 = vpop.xlane.xlu1 %3295 }
 0xd72   : > { %5536 = vrsqrt.f32 %v3343_v9  ;;  %v3328_v40 = vmul.f32 0.03125, %v3296_v34  ;;  %v3392_v7 = vmul.f32 %v7414_v10, %v3369_v3 }
 0xd73   : > { %5538 = vrsqrt.f32 %v3342_v59  ;;  %v5529_v17 = vpop.eup %5528 }
 0xd74   : > { %v3344_v28 = vadd.f32 1e-05, %v3328_v40  ;;  %v3371_v13 = vmul.f32 %v5529_v17, %v7309_v48  ;;  %v7427_v48 = vadd.f32 %v7422_v54, %v3392_v7 }
 0xd76   : > { %5540 = vrsqrt.f32 %v3344_v28  ;;  %v3394_v61 = vmul.f32 %v7414_v10, %v3371_v13 }
 0xd77   : > { %v5531_v18 = vpop.eup %5530 }
 0xd78   : > { %v3370_v25 = vmul.f32 %v5531_v18, %v7323_v58  ;;  %v7439_v42 = vadd.f32 %v7422_v54, %v3394_v61 }
 0xd79   : > { %v3299_v8 = vpop.xlane.xlu0 %3298 }
 0xd7a   : > { %v3329_v19 = vmul.f32 0.03125, %v3299_v8  ;;  %v3393_v0 = vmul.f32 %v7414_v10, %v3370_v25 }
 0xd7b   : > { %v5533_v22 = vpop.eup %5532 }
 0xd7c   : > { %v5535_v47 = vpop.eup %5534  ;;  %v3345_v49 = vadd.f32 1e-05, %v3329_v19  ;;  %v7430_v58 = vadd.f32 %v7422_v54, %v3393_v0  ;;  %v3373_v21 = vmul.f32 %v5533_v22, %v7332_v33 }
 0xd7d   : > { %v3372_v2 = vmul.f32 %v5535_v47, %v7320_v30  ;;  %v3305_v52 = vpop.xlane.xlu0 %3304 }
 0xd7e   : > { %v3331_v55 = vmul.f32 0.03125, %v3305_v52  ;;  %v3431_v4 = vpack.c.bf16 %v7430_v58, %v7427_v48  ;;  %5542 = vrsqrt.f32 %v3345_v49  ;;  %v3396_v37 = vmul.f32 %v7414_v10, %v3373_v21 }
 0xd7f   : > { %v5537_v60 = vpop.eup %5536  ;;  %v3395_v53 = vmul.f32 %v7414_v10, %v3372_v2 }
 0xd80   : > { %v5539_v46 = vpop.eup %5538  ;;  %5116 = vmatprep.mubr.msk.bf16.mxu1 %vm578_vm0, %v3431_v4  ;;  %v3375_v45 = vmul.f32 %v5537_v60, %v7340_v23  ;;  %v3347_v30 = vadd.f32 1e-05, %v3331_v55 }
 0xd81   : > { %v3302_v39 = vpop.xlane.xlu1 %3301  ;;  %v7443_v33 = vadd.f32 %v7422_v54, %v3395_v53  ;;  %v3374_v63 = vmul.f32 %v5539_v46, %v7329_v32  ;;  %v7454_v32 = vadd.f32 %v7422_v54, %v3396_v37 }
 0xd82   : > { %v3330_v50 = vmul.f32 0.03125, %v3302_v39  ;;  %v3398_v23 = vmul.f32 %v7414_v10, %v3375_v45  ;;  %5544 = vrsqrt.f32 %v3347_v30 }
 0xd83   : > { %v5541_v20 = vpop.eup %5540  ;;  %v3432_v38 = vpack.c.bf16 %v7443_v33, %v7439_v42  ;;  %v3397_v41 = vmul.f32 %v7414_v10, %v3374_v63 }
 0xd84   : > { %v3346_v56 = vadd.f32 1e-05, %v3330_v50  ;;  %v3376_v44 = vmul.f32 %v5541_v20, %v7349_v15  ;;  %v7463_v29 = vadd.f32 %v7422_v54, %v3398_v23 }
 0xd85   : > { %5117 = vmatmul.mubr.msk.bf16.vlgmr.msra.gmra.mxu1 %vm578_vm0, %v3432_v38  ;;  %v3311_v62 = vpop.xlane.xlu0 %3310  ;;  %v3308_v26 = vpop.xlane.xlu1 %3307  ;;  %v7457_v36 = vadd.f32 %v7422_v54, %v3397_v41 }
 0xd86   : > { %5546 = vrsqrt.f32 %v3346_v56  ;;  %v3333_v51 = vmul.f32 0.03125, %v3311_v62  ;;  %v3332_v5 = vmul.f32 0.03125, %v3308_v26  ;;  %v3399_v57 = vmul.f32 %v7414_v10, %v3376_v44 }
 0xd87   : > { %v3433_v15 = vpack.c.bf16 %v7457_v36, %v7454_v32 }
 0xd88   : > { %v3349_v6 = vadd.f32 1e-05, %v3333_v51  ;;  %v3348_v27 = vadd.f32 1e-05, %v3332_v5  ;;  %v7466_v9 = vadd.f32 %v7422_v54, %v3399_v57 }
 0xd89   : > { %5120 = vmatprep.mubr.msk.bf16.mxu1 %vm578_vm0, %v3433_v15  ;;  %v3317_v59 = vpop.xlane.xlu0 %3316  ;;  %v3314_v24 = vpop.xlane.xlu1 %3313 }
 0xd8a   : > { %5548 = vrsqrt.f32 %v3349_v6  ;;  %v3335_v34 = vmul.f32 0.03125, %v3317_v59  ;;  %v3334_v40 = vmul.f32 0.03125, %v3314_v24  ;;  %v3434_v28 = vpack.c.bf16 %v7466_v9, %v7463_v29 }
 0xd8b   : > { %5550 = vrsqrt.f32 %v3348_v27  ;;  %v5543_v18 = vpop.eup %5542 }
 0xd8c   : > { %v3351_v3 = vadd.f32 1e-05, %v3335_v34  ;;  %v3350_v17 = vadd.f32 1e-05, %v3334_v40  ;;  %v3377_v8 = vmul.f32 %v5543_v18, %v7360_v43 }
 0xd8d   : > { %5121 = vmatmul.mubr.msk.bf16.gmra.mxu1 %vm578_vm0, %v3434_v28  ;;  %v3320_v13 = vpop.xlane.xlu1 %3319 }
 0xd8e   : > { %5552 = vrsqrt.f32 %v3351_v3  ;;  %v3336_v25 = vmul.f32 0.03125, %v3320_v13  ;;  %v3400_v47 = vmul.f32 %v7414_v10, %v3377_v8 }
 0xd8f   : > { %5554 = vrsqrt.f32 %v3350_v17  ;;  %v5545_v19 = vpop.eup %5544 }
 0xd90   : > { %v3352_v7 = vadd.f32 1e-05, %v3336_v25  ;;  %v3379_v61 = vmul.f32 %v5545_v19, %v7357_v35  ;;  %v7478_v21 = vadd.f32 %v7422_v54, %v3400_v47 }
 0xd92   : > { %5556 = vrsqrt.f32 %v3352_v7  ;;  %v3402_v4 = vmul.f32 %v7414_v10, %v3379_v61 }
 0xd93   : > { %v5547_v0 = vpop.eup %5546 }
 0xd94   : > { %v3378_v22 = vmul.f32 %v5547_v0, %v7371_v31  ;;  %v7492_v30 = vadd.f32 %v7422_v54, %v3402_v4 }
 0xd96   : > { %v3401_v49 = vmul.f32 %v7414_v10, %v3378_v22 }
 0xd97   : > { %v5549_v2 = vpop.eup %5548 }
 0xd98   : > { %v5551_v52 = vpop.eup %5550  ;;  %v7481_v55 = vadd.f32 %v7422_v54, %v3401_v49  ;;  %v3381_v31 = vmul.f32 %v5549_v2, %v7380_v11 }
 0xd99   : > { %v3380_v43 = vmul.f32 %v5551_v52, %v7368_v16 }
 0xd9a   : > { %v3435_v60 = vpack.c.bf16 %v7481_v55, %v7478_v21  ;;  %v3404_v11 = vmul.f32 %v7414_v10, %v3381_v31 }
 0xd9b   : > { %v5553_v35 = vpop.eup %5552  ;;  %v3403_v53 = vmul.f32 %v7414_v10, %v3380_v43 }
 0xd9c   : > { %v5555_v46 = vpop.eup %5554  ;;  %5124 = vmatprep.mubr.msk.bf16.mxu1 %vm578_vm0, %v3435_v60  ;;  %v3383_v45 = vmul.f32 %v5553_v35, %v7377_v12  ;;  %v7506_v38 = vadd.f32 %v7422_v54, %v3404_v11 }
 0xd9d   : > { %v7495_v16 = vadd.f32 %v7422_v54, %v3403_v53  ;;  %v3382_v39 = vmul.f32 %v5555_v46, %v7388_v14 }
 0xd9e   : > { %v3406_v12 = vmul.f32 %v7414_v10, %v3383_v45 }
 0xd9f   : > { %v5557_v63 = vpop.eup %5556  ;;  %v3436_v37 = vpack.c.bf16 %v7495_v16, %v7492_v30  ;;  %v3405_v50 = vmul.f32 %v7414_v10, %v3382_v39 }
 0xda0   : > { %v3384_v20 = vmul.f32 %v5557_v63, %v7400_v1  ;;  %v7515_v44 = vadd.f32 %v7422_v54, %v3406_v12 }
 0xda1   : > { %5125 = vmatmul.mubr.msk.bf16.gmra.mxu1 %vm578_vm0, %v3436_v37  ;;  %v7509_v41 = vadd.f32 %v7422_v54, %v3405_v50 }
 0xda2   : > { %v3407_v14 = vmul.f32 %v7414_v10, %v3384_v20  ;;  %v7527_v10 = vld [vmem:[%s8152_s8] ss:$0 sm:$0xff] }
 0xda3   : > { %v3437_v56 = vpack.c.bf16 %v7509_v41, %v7506_v38 }
 0xda4   : > { %v7518_v1 = vadd.f32 %v7422_v54, %v3407_v14 }
 0xda5   : > { %5128 = vmatprep.mubr.msk.bf16.mxu1 %vm578_vm0, %v3437_v56 }
 0xda6   : > { %v3438_v23 = vpack.c.bf16 %v7518_v1, %v7515_v44 }
 0xda9   : > { %5129 = vmatmul.mubr.msk.bf16.gmra.mxu1 %vm578_vm0, %v3438_v23 }
 0xe45   : > { %v5118_v62 = vpop.f32.mrf.mxu1 }
 0xe46   : > { %v7530_v26 = vadd.f32 %v5118_v62, %v7527_v10 }
 0xe47   : > { %v3520_v51 = vpop.f32.mrf.mxu1 }
 0xe48   : > { %v4557_v54 = vmul.f32 -1.442695, %v7530_v26  ;;  %v7534_v5 = vadd.f32 %v7527_v10, %v3520_v51 }
 0xe49   : > { %v5119_v57 = vpop.f32.mrf.mxu1 }
 0xe4a   : > { %5558 = vpow2.f32 %v4557_v54  ;;  %v4555_v15 = vmul.f32 -1.442695, %v7534_v5  ;;  %v7538_v6 = vadd.f32 %v5119_v57, %v7527_v10 }
 0xe4b   : > { %v3523_v27 = vpop.f32.mrf.mxu1 }
 0xe4c   : > { %5560 = vpow2.f32 %v4555_v15  ;;  %v4558_v59 = vmul.f32 -1.442695, %v7538_v6  ;;  %v7542_v24 = vadd.f32 %v7527_v10, %v3523_v27 }
 0xe4d   : > { %v5122_v34 = vpop.f32.mrf.mxu1 }
 0xe4e   : > { %5562 = vpow2.f32 %v4558_v59  ;;  %v4556_v40 = vmul.f32 -1.442695, %v7542_v24  ;;  %v7546_v28 = vadd.f32 %v5122_v34, %v7527_v10 }
 0xe4f   : > { %v3536_v3 = vpop.f32.mrf.mxu1 }
 0xe50   : > { %5564 = vpow2.f32 %v4556_v40  ;;  %v4561_v17 = vmul.f32 -1.442695, %v7546_v28  ;;  %v7550_v18 = vadd.f32 %v7527_v10, %v3536_v3 }
 0xe51   : > { %v5123_v13 = vpop.f32.mrf.mxu1 }
 0xe52   : > { %5566 = vpow2.f32 %v4561_v17  ;;  %v4559_v25 = vmul.f32 -1.442695, %v7550_v18  ;;  %v7554_v7 = vadd.f32 %v5123_v13, %v7527_v10 }
 0xe53   : > { %v3539_v8 = vpop.f32.mrf.mxu1 }
 0xe54   : > { %5568 = vpow2.f32 %v4559_v25  ;;  %v4562_v19 = vmul.f32 -1.442695, %v7554_v7  ;;  %v7558_v0 = vadd.f32 %v7527_v10, %v3539_v8 }
 0xe56   : > { %5570 = vpow2.f32 %v4562_v19  ;;  %v4560_v22 = vmul.f32 -1.442695, %v7558_v0 }
 0xe57   : > { %v5559_v47 = vpop.eup %5558 }
 0xe58   : > { %v3633_v61 = vadd.f32 1.0, %v5559_v47  ;;  %5572 = vpow2.f32 %v4560_v22 }
 0xe59   : > { %v5561_v49 = vpop.eup %5560 }
 0xe5a   : > { %5574 = vrcp.f32 %v3633_v61  ;;  %v3631_v2 = vadd.f32 1.0, %v5561_v49 }
 0xe5b   : > { %v5563_v52 = vpop.eup %5562 }
 0xe5c   : > { %5576 = vrcp.f32 %v3631_v2  ;;  %v3634_v43 = vadd.f32 1.0, %v5563_v52 }
 0xe5d   : > { %v5565_v4 = vpop.eup %5564 }
 0xe5e   : > { %v3632_v31 = vadd.f32 1.0, %v5565_v4  ;;  %5578 = vrcp.f32 %v3634_v43 }
 0xe5f   : > { %v5567_v60 = vpop.eup %5566 }
 0xe60   : > { %5580 = vrcp.f32 %v3632_v31  ;;  %v3637_v35 = vadd.f32 1.0, %v5567_v60 }
 0xe61   : > { %v5569_v53 = vpop.eup %5568  ;;  %v5126_v46 = vpop.f32.mrf.mxu1 }
 0xe62   : > { %v3635_v45 = vadd.f32 1.0, %v5569_v53  ;;  %v7562_v39 = vadd.f32 %v5126_v46, %v7527_v10  ;;  %5582 = vrcp.f32 %v3637_v35 }
 0xe63   : > { %v5571_v11 = vpop.eup %5570  ;;  %v3552_v63 = vpop.f32.mrf.mxu1 }
 0xe64   : > { %v3638_v37 = vadd.f32 1.0, %v5571_v11  ;;  %v4565_v50 = vmul.f32 -1.442695, %v7562_v39  ;;  %v7566_v20 = vadd.f32 %v7527_v10, %v3552_v63  ;;  %5584 = vrcp.f32 %v3635_v45 }
 0xe65   : > { %v5573_v12 = vpop.eup %5572  ;;  %v5127_v14 = vpop.f32.mrf.mxu1 }
 0xe66   : > { %5586 = vrcp.f32 %v3638_v37  ;;  %v3636_v56 = vadd.f32 1.0, %v5573_v12  ;;  %v4563_v23 = vmul.f32 -1.442695, %v7566_v20  ;;  %v7570_v62 = vadd.f32 %v5127_v14, %v7527_v10 }
 0xe67   : > { %v5575_v51 = vpop.eup %5574  ;;  %5588 = vpow2.f32 %v4565_v50  ;;  %v3555_v54 = vpop.f32.mrf.mxu1 }
 0xe68   : > { %5590 = vrcp.f32 %v3636_v56  ;;  %v4566_v57 = vmul.f32 -1.442695, %v7570_v62  ;;  %v7574_v15 = vadd.f32 %v7527_v10, %v3555_v54  ;;  %3699 = vrot.lane.b32.xlu1 %v5575_v51, %s5720_s16 }
 0xe69   : > { %v5577_v27 = vpop.eup %5576  ;;  %5592 = vpow2.f32 %v4563_v23  ;;  %v5130_v59 = vpop.f32.mrf.mxu1 }
 0xe6a   : > { %5594 = vpow2.f32 %v4566_v57  ;;  %v4564_v34 = vmul.f32 -1.442695, %v7574_v15  ;;  %v7579_v40 = vadd.f32 %v5130_v59, %v7527_v10  ;;  %3695 = vrot.lane.b32.xlu0 %v5577_v27, %s5720_s16 }
 0xe6b   : > { %v3568_v3 = vpop.f32.mrf.mxu1  ;;  %v5579_v17 = vpop.eup %5578 }
 0xe6c   : > { %5596 = vpow2.f32 %v4564_v34  ;;  %v4569_v13 = vmul.f32 -1.442695, %v7579_v40  ;;  %v7584_v25 = vadd.f32 %v7527_v10, %v3568_v3 }
 0xe6d   : > { %v5581_v8 = vpop.eup %5580  ;;  %v5131_v19 = vpop.f32.mrf.mxu1 }
 0xe6e   : > { %v4567_v22 = vmul.f32 -1.442695, %v7584_v25  ;;  %v7588_v47 = vadd.f32 %v5131_v19, %v7527_v10  ;;  %3697 = vrot.lane.b32.xlu1 %v5581_v8, %s5720_s16  ;;  %3701 = vrot.lane.b32.xlu0 %v5579_v17, %s5720_s16  ;;  %5598 = vpow2.f32 %v4569_v13 }
 0xe6f   : > { %v3571_v61 = vpop.f32.mrf.mxu1  ;;  %v5583_v52 = vpop.eup %5582 }
 0xe70   : > { %5600 = vpow2.f32 %v4567_v22  ;;  %v4570_v49 = vmul.f32 -1.442695, %v7588_v47  ;;  %v7594_v2 = vadd.f32 %v7527_v10, %v3571_v61 }
 0xe71   : > { %v5585_v43 = vpop.eup %5584 }
 0xe72   : > { %v4568_v4 = vmul.f32 -1.442695, %v7594_v2  ;;  %3707 = vrot.lane.b32.xlu1 %v5583_v52, %s5720_s16  ;;  %5602 = vpow2.f32 %v4570_v49 }
 0xe73   : > { %v5587_v31 = vpop.eup %5586 }
 0xe74   : > { %v5589_v60 = vpop.eup %5588  ;;  %5604 = vpow2.f32 %v4568_v4  ;;  %3709 = vrot.lane.b32.xlu0 %v5587_v31, %s5720_s16 }
 0xe75   : > { %v5591_v35 = vpop.eup %5590  ;;  %v3641_v53 = vadd.f32 1.0, %v5589_v60 }
 0xe76   : > { %v5593_v46 = vpop.eup %5592  ;;  %3703 = vrot.lane.b32.xlu1 %v5585_v43, %s5720_s16 }
 0xe77   : > { %v5595_v45 = vpop.eup %5594  ;;  %5606 = vrcp.f32 %v3641_v53  ;;  %v3639_v10 = vadd.f32 1.0, %v5593_v46 }
 0xe78   : > { %v3642_v11 = vadd.f32 1.0, %v5595_v45  ;;  %3705 = vrot.lane.b32.xlu0 %v5591_v35, %s5720_s16 }
 0xe79   : > { %v5597_v63 = vpop.eup %5596 }
 0xe7a   : > { %5608 = vrcp.f32 %v3642_v11  ;;  %v3640_v37 = vadd.f32 1.0, %v5597_v63 }
 0xe7b   : > { %5610 = vrcp.f32 %v3639_v10  ;;  %v5599_v50 = vpop.eup %5598 }
 0xe7c   : > { %5612 = vrcp.f32 %v3640_v37  ;;  %v3645_v56 = vadd.f32 1.0, %v5599_v50 }
 0xe7d   : > { %v5601_v12 = vpop.eup %5600 }
 0xe7e   : > { %v3643_v14 = vadd.f32 1.0, %v5601_v12 }
 0xe7f   : > { %v5603_v23 = vpop.eup %5602 }
 0xe80   : > { %5614 = vrcp.f32 %v3643_v14  ;;  %v3646_v27 = vadd.f32 1.0, %v5603_v23 }
 0xe81   : > { %v5605_v51 = vpop.eup %5604  ;;  %5616 = vrcp.f32 %v3645_v56 }
 0xe82   : > { %v3644_v54 = vadd.f32 1.0, %v5605_v51 }
 0xe84   : > { %v5607_v57 = vpop.eup %5606  ;;  %5618 = vrcp.f32 %v3644_v54 }
 0xe85   : > { %3715 = vrot.lane.b32.xlu1 %v5607_v57, %s5720_s16  ;;  %5620 = vrcp.f32 %v3646_v27 }
 0xe87   : > { %v5609_v59 = vpop.eup %5608 }
 0xe88   : > { %v5611_v34 = vpop.eup %5610  ;;  %3717 = vrot.lane.b32.xlu0 %v5609_v59, %s5720_s16 }
 0xe89   : > { %3711 = vrot.lane.b32.xlu1 %v5611_v34, %s5720_s16  ;;  %v5613_v3 = vpop.eup %5612 }
 0xe8c   : > { %3713 = vrot.lane.b32.xlu0 %v5613_v3, %s5720_s16 }
 0xe8d   : > { %v5615_v17 = vpop.eup %5614 }
 0xe8e   : > { %3719 = vrot.lane.b32.xlu1 %v5615_v17, %s5720_s16  ;;  %v5617_v13 = vpop.eup %5616 }
 0xe91   : > { %v5619_v8 = vpop.eup %5618 }
 0xe92   : > { %3721 = vrot.lane.b32.xlu0 %v5619_v8, %s5720_s16  ;;  %3723 = vrot.lane.b32.xlu1 %v5617_v13, %s5720_s16  ;;  %v5621_v19 = vpop.eup %5620 }
 0xe96   : > { %3725 = vrot.lane.b32.xlu0 %v5621_v19, %s5720_s16 }
 0xeda   : > { %v3700_v22 = vpop.permute.xlu1 %3699 }
 0xedb   : > { %v3745_v61 = vmul.f32 %v3700_v22, %v7530_v26 }
 0xedc   : > { %v3696_v49 = vpop.permute.xlu0 %3695 }
 0xedd   : > { %v7611_v52 = vadd.f32 %v3745_v61, %v7439_v42  ;;  %v3743_v43 = vmul.f32 %v3696_v49, %v7534_v5 }
 0xedf   : > { %v7615_v4 = vadd.f32 %v3743_v43, %v7427_v48  ;;  %v3781_v31 = vsel %vm578_vm0, %v7611_v52, 0.0 }
 0xee0   : > { %v3702_v60 = vpop.permute.xlu0 %3701  ;;  %3782 = vadd.xlane.f32.xlu0 %v3781_v31  ;;  %v3698_v35 = vpop.permute.xlu1 %3697 }
 0xee1   : > { %v3746_v53 = vmul.f32 %v3702_v60, %v7538_v6  ;;  %v3744_v46 = vmul.f32 %v3698_v35, %v7542_v24  ;;  %v3775_v26 = vsel %vm578_vm0, %v7615_v4, 0.0 }
 0xee2   : > { %3776 = vadd.xlane.f32.xlu1 %v3775_v26 }
 0xee3   : > { %v7624_v42 = vadd.f32 %v3746_v53, %v7443_v33  ;;  %v7627_v48 = vadd.f32 %v3744_v46, %v7430_v58 }
 0xee4   : > { %v3708_v5 = vpop.permute.xlu1 %3707 }
 0xee5   : > { %v3749_v45 = vmul.f32 %v3708_v5, %v7546_v28  ;;  %v3784_v10 = vsel %vm578_vm0, %v7624_v42, 0.0  ;;  %v3778_v6 = vsel %vm578_vm0, %v7627_v48, 0.0 }
 0xee6   : > { %v3710_v24 = vpop.permute.xlu0 %3709  ;;  %3785 = vadd.xlane.f32.xlu1 %v3784_v10  ;;  %3779 = vadd.xlane.f32.xlu0 %v3778_v6 }
 0xee7   : > { %v7635_v11 = vadd.f32 %v3749_v45, %v7463_v29  ;;  %v3750_v33 = vmul.f32 %v3710_v24, %v7554_v7 }
 0xee8   : > { %v3704_v63 = vpop.permute.xlu1 %3703 }
 0xee9   : > { %v7639_v58 = vadd.f32 %v3750_v33, %v7466_v9  ;;  %v3747_v28 = vmul.f32 %v3704_v63, %v7550_v18  ;;  %v3793_v37 = vsel %vm578_vm0, %v7635_v11, 0.0 }
 0xeea   : > { %v3706_v50 = vpop.permute.xlu0 %3705  ;;  %3794 = vadd.xlane.f32.xlu0 %v3793_v37 }
 0xeeb   : > { %v7645_v12 = vadd.f32 %v3747_v28, %v7454_v32  ;;  %v3748_v14 = vmul.f32 %v3706_v50, %v7558_v0  ;;  %v3796_v29 = vsel %vm578_vm0, %v7639_v58, 0.0 }
 0xeec   : > { %3797 = vadd.xlane.f32.xlu1 %v3796_v29 }
 0xeed   : > { %v7651_v7 = vadd.f32 %v3748_v14, %v7457_v36  ;;  %v3787_v9 = vsel %vm578_vm0, %v7645_v12, 0.0 }
 0xeee   : > { %3788 = vadd.xlane.f32.xlu0 %v3787_v9 }
 0xeef   : > { %v3790_v18 = vsel %vm578_vm0, %v7651_v7, 0.0 }
 0xef0   : > { %3791 = vadd.xlane.f32.xlu1 %v3790_v18 }
 0xef7   : > { %v3716_v56 = vpop.permute.xlu1 %3715 }
 0xef8   : > { %v3753_v32 = vmul.f32 %v3716_v56, %v7562_v39 }
 0xefa   : > { %v7659_v0 = vadd.f32 %v3753_v32, %v7492_v30  ;;  %v3718_v23 = vpop.permute.xlu0 %3717 }
 0xefb   : > { %v3754_v51 = vmul.f32 %v3718_v23, %v7570_v62  ;;  %v3712_v54 = vpop.permute.xlu1 %3711 }
 0xefc   : > { %v3751_v36 = vmul.f32 %v3712_v54, %v7566_v20  ;;  %v3805_v57 = vsel %vm578_vm0, %v7659_v0, 0.0 }
 0xefd   : > { %v7666_v27 = vadd.f32 %v3754_v51, %v7495_v16  ;;  %3806 = vadd.xlane.f32.xlu0 %v3805_v57 }
 0xefe   : > { %v7669_v59 = vadd.f32 %v3751_v36, %v7478_v21  ;;  %v3714_v39 = vpop.permute.xlu0 %3713 }
 0xeff   : > { %v3752_v30 = vmul.f32 %v3714_v39, %v7574_v15  ;;  %v3808_v34 = vsel %vm578_vm0, %v7666_v27, 0.0 }
 0xf00   : > { %3809 = vadd.xlane.f32.xlu1 %v3808_v34  ;;  %v3799_v20 = vsel %vm578_vm0, %v7669_v59, 0.0  ;;  %v3720_v62 = vpop.permute.xlu1 %3719 }
 0xf01   : > { %v7677_v3 = vadd.f32 %v3752_v30, %v7481_v55  ;;  %3800 = vadd.xlane.f32.xlu0 %v3799_v20  ;;  %v3755_v16 = vmul.f32 %v3720_v62, %v7584_v25 }
 0xf03   : > { %v7681_v21 = vadd.f32 %v3755_v16, %v7506_v38  ;;  %v3802_v15 = vsel %vm578_vm0, %v7677_v3, 0.0 }
 0xf04   : > { %v3722_v17 = vpop.permute.xlu0 %3721  ;;  %3803 = vadd.xlane.f32.xlu1 %v3802_v15  ;;  %v3724_v13 = vpop.permute.xlu1 %3723 }
 0xf05   : > { %v3756_v8 = vmul.f32 %v3722_v17, %v7594_v2  ;;  %v3757_v19 = vmul.f32 %v3724_v13, %v7579_v40  ;;  %v3811_v55 = vsel %vm578_vm0, %v7681_v21, 0.0 }
 0xf06   : > { %3812 = vadd.xlane.f32.xlu0 %v3811_v55 }
 0xf07   : > { %v7690_v22 = vadd.f32 %v3756_v8, %v7509_v41  ;;  %v7693_v38 = vadd.f32 %v3757_v19, %v7515_v44 }
 0xf08   : > { %v3726_v25 = vpop.permute.xlu0 %3725 }
 0xf09   : > { %v3758_v61 = vmul.f32 %v3726_v25, %v7588_v47  ;;  %v3814_v49 = vsel %vm578_vm0, %v7690_v22, 0.0  ;;  %v3817_v2 = vsel %vm578_vm0, %v7693_v38, 0.0 }
 0xf0a   : > { %3815 = vadd.xlane.f32.xlu1 %v3814_v49  ;;  %3818 = vadd.xlane.f32.xlu0 %v3817_v2 }
 0xf0b   : > { %v7701_v40 = vadd.f32 %v3758_v61, %v7518_v1 }
 0xf0d   : > { %v3820_v41 = vsel %vm578_vm0, %v7701_v40, 0.0 }
 0xf0e   : > { %3821 = vadd.xlane.f32.xlu1 %v3820_v41 }
 0xf69   : > { %v3783_v44 = vpop.xlane.xlu0 %3782 }
 0xf6a   : > { %v3825_v43 = vmul.f32 0.03125, %v3783_v44 }
 0xf6b   : > { %v3777_v31 = vpop.xlane.xlu1 %3776 }
 0xf6c   : > { %v7706_v47 = vsub.f32 %v7611_v52, %v3825_v43  ;;  %v3823_v60 = vmul.f32 0.03125, %v3777_v31 }
 0xf6e   : > { %v7709_v35 = vsub.f32 %v7615_v4, %v3823_v60  ;;  %v3857_v53 = vmul.f32 %v7706_v47, %v7706_v47 }
 0xf6f   : > { %v3780_v46 = vpop.xlane.xlu0 %3779  ;;  %v3786_v1 = vpop.xlane.xlu1 %3785 }
 0xf70   : > { %v3824_v26 = vmul.f32 0.03125, %v3780_v46  ;;  %v3826_v5 = vmul.f32 0.03125, %v3786_v1  ;;  %v3877_v45 = vsel %vm578_vm0, %v3857_v53, 0.0  ;;  %v3855_v10 = vmul.f32 %v7709_v35, %v7709_v35 }
 0xf71   : > { %3878 = vadd.xlane.f32.xlu0 %v3877_v45 }
 0xf72   : > { %v7717_v52 = vsub.f32 %v7627_v48, %v3824_v26  ;;  %v7720_v6 = vsub.f32 %v7624_v42, %v3826_v5  ;;  %v3871_v33 = vsel %vm578_vm0, %v3855_v10, 0.0 }
 0xf73   : > { %v3795_v4 = vpop.xlane.xlu0 %3794 }
 0xf74   : > { %v3829_v24 = vmul.f32 0.03125, %v3795_v4  ;;  %v3858_v63 = vmul.f32 %v7720_v6, %v7720_v6  ;;  %v3856_v37 = vmul.f32 %v7717_v52, %v7717_v52 }
 0xf75   : > { %3872 = vadd.xlane.f32.xlu0 %v3871_v33  ;;  %v3798_v28 = vpop.xlane.xlu1 %3797 }
 0xf76   : > { %v7728_v50 = vsub.f32 %v7635_v11, %v3829_v24  ;;  %v3830_v48 = vmul.f32 0.03125, %v3798_v28  ;;  %v3880_v14 = vsel %vm578_vm0, %v3858_v63, 0.0  ;;  %v3874_v32 = vsel %vm578_vm0, %v3856_v37, 0.0 }
 0xf77   : > { %v3789_v42 = vpop.xlane.xlu0 %3788  ;;  %3881 = vadd.xlane.f32.xlu1 %v3880_v14 }
 0xf78   : > { %v7732_v29 = vsub.f32 %v7639_v58, %v3830_v48  ;;  %v3827_v9 = vmul.f32 0.03125, %v3789_v42  ;;  %v3861_v18 = vmul.f32 %v7728_v50, %v7728_v50 }
 0xf79   : > { %v3792_v56 = vpop.xlane.xlu1 %3791 }
 0xf7a   : > { %v7738_v23 = vsub.f32 %v7645_v12, %v3827_v9  ;;  %v3828_v11 = vmul.f32 0.03125, %v3792_v56  ;;  %v3889_v51 = vsel %vm578_vm0, %v3861_v18, 0.0  ;;  %v3862_v54 = vmul.f32 %v7732_v29, %v7732_v29 }
 0xf7b   : > { %3890 = vadd.xlane.f32.xlu0 %v3889_v51  ;;  %3875 = vadd.xlane.f32.xlu1 %v3874_v32 }
 0xf7c   : > { %v7744_v58 = vsub.f32 %v7651_v7, %v3828_v11  ;;  %v3859_v36 = vmul.f32 %v7738_v23, %v7738_v23  ;;  %v3892_v39 = vsel %vm578_vm0, %v3862_v54, 0.0 }
 0xf7e   : > { %v3883_v57 = vsel %vm578_vm0, %v3859_v36, 0.0  ;;  %v3860_v12 = vmul.f32 %v7744_v58, %v7744_v58 }
 0xf7f   : > { %3884 = vadd.xlane.f32.xlu0 %v3883_v57  ;;  %3893 = vadd.xlane.f32.xlu1 %v3892_v39 }
 0xf80   : > { %v3886_v30 = vsel %vm578_vm0, %v3860_v12, 0.0 }
 0xf83   : > { %3887 = vadd.xlane.f32.xlu1 %v3886_v30 }
 0xf86   : > { %v3807_v34 = vpop.xlane.xlu0 %3806 }
 0xf87   : > { %v3833_v20 = vmul.f32 0.03125, %v3807_v34 }
 0xf89   : > { %v7754_v7 = vsub.f32 %v7659_v0, %v3833_v20  ;;  %v3810_v62 = vpop.xlane.xlu1 %3809 }
 0xf8a   : > { %v3801_v16 = vpop.xlane.xlu0 %3800  ;;  %v3834_v15 = vmul.f32 0.03125, %v3810_v62 }
 0xf8b   : > { %v3831_v17 = vmul.f32 0.03125, %v3801_v16  ;;  %v3865_v13 = vmul.f32 %v7754_v7, %v7754_v7 }
 0xf8c   : > { %v7759_v8 = vsub.f32 %v7666_v27, %v3834_v15 }
 0xf8d   : > { %v7762_v19 = vsub.f32 %v7669_v59, %v3831_v17  ;;  %v3901_v55 = vsel %vm578_vm0, %v3865_v13, 0.0  ;;  %v3804_v25 = vpop.xlane.xlu1 %3803 }
 0xf8e   : > { %3902 = vadd.xlane.f32.xlu0 %v3901_v55  ;;  %v3832_v61 = vmul.f32 0.03125, %v3804_v25  ;;  %v3866_v0 = vmul.f32 %v7759_v8, %v7759_v8  ;;  %v7804_v55 = vld [vmem:[%s8153_s9] ss:$0 sm:$0xff] }
 0xf8f   : > { %v3813_v49 = vpop.xlane.xlu0 %3812  ;;  %v3863_v2 = vmul.f32 %v7762_v19, %v7762_v19 }
 0xf90   : > { %v7770_v41 = vsub.f32 %v7677_v3, %v3832_v61  ;;  %v3835_v27 = vmul.f32 0.03125, %v3813_v49  ;;  %v3904_v44 = vsel %vm578_vm0, %v3866_v0, 0.0  ;;  %v7810_v0 = vld [vmem:[%s8154_s10] ss:$0 sm:$0xff] }
 0xf91   : > { %v3895_v59 = vsel %vm578_vm0, %v3863_v2, 0.0  ;;  %3905 = vadd.xlane.f32.xlu1 %v3904_v44 }
 0xf92   : > { %v7775_v43 = vsub.f32 %v7681_v21, %v3835_v27  ;;  %3896 = vadd.xlane.f32.xlu0 %v3895_v59  ;;  %v3864_v31 = vmul.f32 %v7770_v41, %v7770_v41 }
 0xf93   : > { %v3819_v60 = vpop.xlane.xlu0 %3818  ;;  %v3816_v53 = vpop.xlane.xlu1 %3815 }
 0xf94   : > { %v3837_v46 = vmul.f32 0.03125, %v3819_v60  ;;  %v3836_v1 = vmul.f32 0.03125, %v3816_v53  ;;  %v3898_v3 = vsel %vm578_vm0, %v3864_v31, 0.0  ;;  %v3867_v26 = vmul.f32 %v7775_v43, %v7775_v43 }
 0xf95   : > { %3899 = vadd.xlane.f32.xlu1 %v3898_v3 }
 0xf96   : > { %v7783_v5 = vsub.f32 %v7693_v38, %v3837_v46  ;;  %v7786_v21 = vsub.f32 %v7690_v22, %v3836_v1  ;;  %v3907_v45 = vsel %vm578_vm0, %v3867_v26, 0.0 }
 0xf97   : > { %3908 = vadd.xlane.f32.xlu0 %v3907_v45  ;;  %v3822_v10 = vpop.xlane.xlu1 %3821 }
 0xf98   : > { %v3838_v4 = vmul.f32 0.03125, %v3822_v10  ;;  %v3869_v24 = vmul.f32 %v7783_v5, %v7783_v5  ;;  %v3868_v33 = vmul.f32 %v7786_v21, %v7786_v21 }
 0xf9a   : > { %v7794_v63 = vsub.f32 %v7701_v40, %v3838_v4  ;;  %v3913_v38 = vsel %vm578_vm0, %v3869_v24, 0.0  ;;  %v3910_v28 = vsel %vm578_vm0, %v3868_v33, 0.0 }
 0xf9b   : > { %3914 = vadd.xlane.f32.xlu0 %v3913_v38  ;;  %3911 = vadd.xlane.f32.xlu1 %v3910_v28 }
 0xf9c   : > { %v3870_v22 = vmul.f32 %v7794_v63, %v7794_v63 }
 0xf9e   : > { %v3916_v37 = vsel %vm578_vm0, %v3870_v22, 0.0 }
 0xf9f   : > { %3917 = vadd.xlane.f32.xlu1 %v3916_v37 }
 0xffa   : > { %v3879_v48 = vpop.xlane.xlu0 %3878 }
 0xffb   : > { %v3921_v14 = vmul.f32 0.03125, %v3879_v48 }
 0xffd   : > { %v3937_v42 = vadd.f32 1e-05, %v3921_v14 }
 0xffe   : > { %v3873_v9 = vpop.xlane.xlu0 %3872 }
 0xfff   : > { %5622 = vrsqrt.f32 %v3937_v42  ;;  %v3919_v18 = vmul.f32 0.03125, %v3873_v9 }
0x1000   : > { %v3882_v40 = vpop.xlane.xlu1 %3881 }
0x1001   : > { %v3935_v56 = vadd.f32 1e-05, %v3919_v18  ;;  %v3922_v32 = vmul.f32 0.03125, %v3882_v40 }
0x1003   : > { %5624 = vrsqrt.f32 %v3935_v56  ;;  %v3938_v11 = vadd.f32 1e-05, %v3922_v32 }
0x1004   : > { %v3891_v51 = vpop.xlane.xlu0 %3890  ;;  %v3876_v54 = vpop.xlane.xlu1 %3875 }
0x1005   : > { %5626 = vrsqrt.f32 %v3938_v11  ;;  %v3925_v36 = vmul.f32 0.03125, %v3891_v51  ;;  %v3920_v57 = vmul.f32 0.03125, %v3876_v54 }
0x1007   : > { %v3941_v39 = vadd.f32 1e-05, %v3925_v36  ;;  %v3936_v12 = vadd.f32 1e-05, %v3920_v57 }
0x1008   : > { %v3885_v30 = vpop.xlane.xlu0 %3884  ;;  %v3894_v34 = vpop.xlane.xlu1 %3893 }
0x1009   : > { %5628 = vrsqrt.f32 %v3941_v39  ;;  %v3923_v20 = vmul.f32 0.03125, %v3885_v30  ;;  %v3926_v62 = vmul.f32 0.03125, %v3894_v34 }
0x100a   : > { %5630 = vrsqrt.f32 %v3936_v12 }
0x100b   : > { %v3939_v16 = vadd.f32 1e-05, %v3923_v20  ;;  %v3942_v15 = vadd.f32 1e-05, %v3926_v62 }
0x100c   : > { %v5623_v17 = vpop.eup %5622  ;;  %v3888_v13 = vpop.xlane.xlu1 %3887 }
0x100d   : > { %5632 = vrsqrt.f32 %v3939_v16  ;;  %v3924_v25 = vmul.f32 0.03125, %v3888_v13  ;;  %v3969_v61 = vmul.f32 %v5623_v17, %v7706_v47 }
0x100e   : > { %5634 = vrsqrt.f32 %v3942_v15 }
0x100f   : > { %v3940_v49 = vadd.f32 1e-05, %v3924_v25  ;;  %v3992_v2 = vmul.f32 %v7804_v55, %v3969_v61 }
0x1010   : > { %v5625_v27 = vpop.eup %5624 }
0x1011   : > { %5636 = vrsqrt.f32 %v3940_v49  ;;  %v7814_v44 = vadd.f32 %v7810_v0, %v3992_v2  ;;  %v3967_v59 = vmul.f32 %v5625_v27, %v7709_v35 }
0x1012   : > { %v5627_v31 = vpop.eup %5626 }
0x1013   : > { %v4035_v47 = vsel %vm578_vm0, %v7814_v44, 0.0  ;;  %v3990_v60 = vmul.f32 %v7804_v55, %v3967_v59  ;;  %v3970_v53 = vmul.f32 %v5627_v31, %v7720_v6 }
0x1014   : > { %4036 = vadd.xlane.f32.xlu0 %v4035_v47 }
0x1015   : > { %v7822_v46 = vadd.f32 %v7810_v0, %v3990_v60  ;;  %v3993_v1 = vmul.f32 %v7804_v55, %v3970_v53 }
0x1016   : > { %v5629_v3 = vpop.eup %5628 }
0x1017   : > { %v5631_v26 = vpop.eup %5630  ;;  %v3903_v45 = vpop.xlane.xlu0 %3902  ;;  %v4029_v35 = vsel %vm578_vm0, %v7822_v46, 0.0  ;;  %v7828_v10 = vadd.f32 %v7810_v0, %v3993_v1  ;;  %v3973_v4 = vmul.f32 %v5629_v3, %v7728_v50 }
0x1018   : > { %v3929_v24 = vmul.f32 0.03125, %v3903_v45  ;;  %4030 = vadd.xlane.f32.xlu0 %v4029_v35  ;;  %v3968_v6 = vmul.f32 %v5631_v26, %v7717_v52  ;;  %v5732_v45 = vmov 0  }
0x1019   : > { %v4038_v33 = vsel %vm578_vm0, %v7828_v10, 0.0  ;;  %v3996_v38 = vmul.f32 %v7804_v55, %v3973_v4  ;;  %5265 = vset.pattern.permute.xlu1 %v5732_v45  ;;  %5264 = vset.pattern.permute.xlu0 %v5732_v45 }
0x101a   : > { %v5633_v28 = vpop.eup %5632  ;;  %v3945_v22 = vadd.f32 1e-05, %v3929_v24  ;;  %4039 = vadd.xlane.f32.xlu1 %v4038_v33  ;;  %v3906_v37 = vpop.xlane.xlu1 %3905  ;;  %v3991_v48 = vmul.f32 %v7804_v55, %v3968_v6 }
0x101b   : > { %v5635_v14 = vpop.eup %5634  ;;  %v3897_v42 = vpop.xlane.xlu0 %3896  ;;  %v3930_v9 = vmul.f32 0.03125, %v3906_v37  ;;  %v7837_v50 = vadd.f32 %v7810_v0, %v3996_v38  ;;  %v3971_v18 = vmul.f32 %v5633_v28, %v7738_v23 }
0x101c   : > { %5638 = vrsqrt.f32 %v3945_v22  ;;  %v3927_v52 = vmul.f32 0.03125, %v3897_v42  ;;  %v7841_v40 = vadd.f32 %v7810_v0, %v3991_v48  ;;  %v3974_v56 = vmul.f32 %v5635_v14, %v7732_v29 }
0x101d   : > { %v3946_v32 = vadd.f32 1e-05, %v3930_v9  ;;  %v4047_v11 = vsel %vm578_vm0, %v7837_v50, 0.0  ;;  %v3994_v51 = vmul.f32 %v7804_v55, %v3971_v18 }
0x101e   : > { %v5637_v54 = vpop.eup %5636  ;;  %v3943_v36 = vadd.f32 1e-05, %v3927_v52  ;;  %4048 = vadd.xlane.f32.xlu0 %v4047_v11  ;;  %v4032_v57 = vsel %vm578_vm0, %v7841_v40, 0.0  ;;  %v3900_v23 = vpop.xlane.xlu1 %3899  ;;  %v3997_v39 = vmul.f32 %v7804_v55, %v3974_v56 }
0x101f   : > { %5640 = vrsqrt.f32 %v3946_v32  ;;  %4033 = vadd.xlane.f32.xlu1 %v4032_v57  ;;  %v3928_v12 = vmul.f32 0.03125, %v3900_v23  ;;  %v7851_v29 = vadd.f32 %v7810_v0, %v3994_v51  ;;  %v3972_v30 = vmul.f32 %v5637_v54, %v7744_v58 }
0x1020   : > { %5642 = vrsqrt.f32 %v3943_v36  ;;  %v3909_v34 = vpop.xlane.xlu0 %3908  ;;  %v7855_v20 = vadd.f32 %v7810_v0, %v3997_v39 }
0x1021   : > { %v3944_v62 = vadd.f32 1e-05, %v3928_v12  ;;  %v3931_v16 = vmul.f32 0.03125, %v3909_v34  ;;  %v4041_v15 = vsel %vm578_vm0, %v7851_v29, 0.0  ;;  %v3995_v17 = vmul.f32 %v7804_v55, %v3972_v30 }
0x1022   : > { %4042 = vadd.xlane.f32.xlu0 %v4041_v15  ;;  %v4050_v13 = vsel %vm578_vm0, %v7855_v20, 0.0 }
0x1023   : > { %5644 = vrsqrt.f32 %v3944_v62  ;;  %v3947_v25 = vadd.f32 1e-05, %v3931_v16  ;;  %4051 = vadd.xlane.f32.xlu1 %v4050_v13  ;;  %v7863_v58 = vadd.f32 %v7810_v0, %v3995_v17 }
0x1024   : > { %v3915_v61 = vpop.xlane.xlu0 %3914  ;;  %v3912_v49 = vpop.xlane.xlu1 %3911 }
0x1025   : > { %5646 = vrsqrt.f32 %v3947_v25  ;;  %v3933_v2 = vmul.f32 0.03125, %v3915_v61  ;;  %v3932_v27 = vmul.f32 0.03125, %v3912_v49  ;;  %v4044_v59 = vsel %vm578_vm0, %v7863_v58, 0.0 }
0x1027   : > { %v3949_v31 = vadd.f32 1e-05, %v3933_v2  ;;  %v3948_v47 = vadd.f32 1e-05, %v3932_v27  ;;  %4045 = vadd.xlane.f32.xlu1 %v4044_v59 }
0x1028   : > { %v3918_v60 = vpop.xlane.xlu1 %3917 }
0x1029   : > { %v5639_v53 = vpop.eup %5638  ;;  %5648 = vrsqrt.f32 %v3949_v31  ;;  %v3934_v1 = vmul.f32 0.03125, %v3918_v60 }
0x102a   : > { %5650 = vrsqrt.f32 %v3948_v47  ;;  %v3977_v3 = vmul.f32 %v5639_v53, %v7754_v7 }
0x102b   : > { %v3950_v26 = vadd.f32 1e-05, %v3934_v1 }
0x102c   : > { %v5641_v35 = vpop.eup %5640  ;;  %v4000_v4 = vmul.f32 %v7804_v55, %v3977_v3 }
0x102d   : > { %v5643_v24 = vpop.eup %5642  ;;  %5652 = vrsqrt.f32 %v3950_v26  ;;  %v3978_v6 = vmul.f32 %v5641_v35, %v7759_v8 }
0x102e   : > { %v7871_v33 = vadd.f32 %v7810_v0, %v4000_v4  ;;  %v3975_v38 = vmul.f32 %v5643_v24, %v7762_v19 }
0x102f   : > { %v4001_v28 = vmul.f32 %v7804_v55, %v3978_v6 }
0x1030   : > { %v5645_v22 = vpop.eup %5644  ;;  %v4059_v7 = vsel %vm578_vm0, %v7871_v33, 0.0  ;;  %v3998_v37 = vmul.f32 %v7804_v55, %v3975_v38 }
0x1031   : > { %4060 = vadd.xlane.f32.xlu0 %v4059_v7  ;;  %v7879_v48 = vadd.f32 %v7810_v0, %v4001_v28  ;;  %v3976_v14 = vmul.f32 %v5645_v22, %v7770_v41 }
0x1032   : > { %v5647_v8 = vpop.eup %5646  ;;  %v7883_v42 = vadd.f32 %v7810_v0, %v3998_v37 }
0x1033   : > { %v4062_v19 = vsel %vm578_vm0, %v7879_v48, 0.0  ;;  %v3999_v9 = vmul.f32 %v7804_v55, %v3976_v14  ;;  %v3979_v18 = vmul.f32 %v5647_v8, %v7775_v43 }
0x1034   : > { %v4053_v52 = vsel %vm578_vm0, %v7883_v42, 0.0  ;;  %4063 = vadd.xlane.f32.xlu1 %v4062_v19 }
0x1035   : > { %4054 = vadd.xlane.f32.xlu0 %v4053_v52  ;;  %v7892_v56 = vadd.f32 %v7810_v0, %v3999_v9  ;;  %v4002_v41 = vmul.f32 %v7804_v55, %v3979_v18 }
0x1036   : > { %v5649_v32 = vpop.eup %5648 }
0x1037   : > { %v5651_v11 = vpop.eup %5650  ;;  %v4056_v51 = vsel %vm578_vm0, %v7892_v56, 0.0  ;;  %v7898_v54 = vadd.f32 %v7810_v0, %v4002_v41  ;;  %v3981_v43 = vmul.f32 %v5649_v32, %v7783_v5 }
0x1038   : > { %4057 = vadd.xlane.f32.xlu1 %v4056_v51  ;;  %v3980_v36 = vmul.f32 %v5651_v11, %v7786_v21 }
0x1039   : > { %v4065_v57 = vsel %vm578_vm0, %v7898_v54, 0.0  ;;  %v4004_v23 = vmul.f32 %v7804_v55, %v3981_v43 }
0x103a   : > { %v5653_v39 = vpop.eup %5652  ;;  %4066 = vadd.xlane.f32.xlu0 %v4065_v57  ;;  %v4003_v12 = vmul.f32 %v7804_v55, %v3980_v36 }
0x103b   : > { %v7907_v30 = vadd.f32 %v7810_v0, %v4004_v23  ;;  %v3982_v34 = vmul.f32 %v5653_v39, %v7794_v63 }
0x103c   : > { %v7911_v5 = vadd.f32 %v7810_v0, %v4003_v12 }
0x103d   : > { %v4071_v21 = vsel %vm578_vm0, %v7907_v30, 0.0  ;;  %v4005_v62 = vmul.f32 %v7804_v55, %v3982_v34  ;;  %v4243_v55 = vld [vmem:[%s7927_s15 + $0x8] sm:$0xff] }
0x103e   : > { %4072 = vadd.xlane.f32.xlu0 %v4071_v21  ;;  %v4068_v16 = vsel %vm578_vm0, %v7911_v5, 0.0 }
0x103f   : > { %4069 = vadd.xlane.f32.xlu1 %v4068_v16  ;;  %v7919_v15 = vadd.f32 %v7810_v0, %v4005_v62  ;;  %v4270_v0 = vld [vmem:[%s7933_s17] sm:$0xff] }
0x1041   : > { %v4074_v63 = vsel %vm578_vm0, %v7919_v15, 0.0 }
0x1043   : > { %4075 = vadd.xlane.f32.xlu1 %v4074_v63 }
0x1054   : > { %4251 = vperm.xlu1 %5265, %v4243_v55  }
0x1058   : > { %4274 = vperm.xlu1 %5265, %v4270_v0  }
0x109d   : > { %v4037_v17 = vpop.xlane.xlu0 %4036 }
0x109e   : > { %v4079_v31 = vmul.f32 0.03125, %v4037_v17 }
0x10a1   : > { %v4031_v25 = vpop.xlane.xlu0 %4030 }
0x10a2   : > { %v4077_v59 = vmul.f32 0.03125, %v4031_v25 }
0x10a3   : > { %v4040_v13 = vpop.xlane.xlu1 %4039 }
0x10a4   : > { %v4093_v53 = vadd.f32 %v4079_v31, %v4077_v59  ;;  %v4080_v45 = vmul.f32 0.03125, %v4040_v13 }
0x10a7   : > { %v4049_v49 = vpop.xlane.xlu0 %4048 }
0x10a8   : > { %v4034_v61 = vpop.xlane.xlu1 %4033  ;;  %v4083_v24 = vmul.f32 0.03125, %v4049_v49 }
0x10a9   : > { %v4078_v3 = vmul.f32 0.03125, %v4034_v61 }
0x10ab   : > { %v4043_v27 = vpop.xlane.xlu0 %4042  ;;  %v4100_v38 = vadd.f32 %v4080_v45, %v4078_v3 }
0x10ac   : > { %v4052_v2 = vpop.xlane.xlu1 %4051  ;;  %v4081_v47 = vmul.f32 0.03125, %v4043_v27 }
0x10ad   : > { %v4084_v8 = vmul.f32 0.03125, %v4052_v2 }
0x10ae   : > { %v4094_v26 = vadd.f32 %v4093_v53, %v4081_v47 }
0x10b0   : > { %v4046_v60 = vpop.xlane.xlu1 %4045  ;;  %v4095_v22 = vadd.f32 %v4094_v26, %v4083_v24 }
0x10b1   : > { %v4082_v35 = vmul.f32 0.03125, %v4046_v60 }
0x10b3   : > { %v4101_v7 = vadd.f32 %v4100_v38, %v4082_v35 }
0x10b5   : > { %v4102_v41 = vadd.f32 %v4101_v7, %v4084_v8 }
0x10ba   : > { %v4061_v1 = vpop.xlane.xlu0 %4060 }
0x10bb   : > { %v4087_v18 = vmul.f32 0.03125, %v4061_v1 }
0x10bd   : > { %v4064_v4 = vpop.xlane.xlu1 %4063 }
0x10be   : > { %v4055_v6 = vpop.xlane.xlu0 %4054  ;;  %v4088_v23 = vmul.f32 0.03125, %v4064_v4 }
0x10bf   : > { %v4085_v28 = vmul.f32 0.03125, %v4055_v6 }
0x10c1   : > { %v4058_v37 = vpop.xlane.xlu1 %4057  ;;  %v4096_v14 = vadd.f32 %v4095_v22, %v4085_v28 }
0x10c2   : > { %v4086_v19 = vmul.f32 0.03125, %v4058_v37 }
0x10c3   : > { %v4067_v9 = vpop.xlane.xlu0 %4066  ;;  %v4097_v32 = vadd.f32 %v4096_v14, %v4087_v18 }
0x10c4   : > { %v4089_v52 = vmul.f32 0.03125, %v4067_v9  ;;  %v4103_v11 = vadd.f32 %v4102_v41, %v4086_v19 }
0x10c6   : > { %v4098_v43 = vadd.f32 %v4097_v32, %v4089_v52  ;;  %v4104_v34 = vadd.f32 %v4103_v11, %v4088_v23  ;;  %v4271_v11 = vld [vmem:[%s7933_s17 + $0x8] sm:$0xff] }
0x10c7   : > { %v4073_v51 = vpop.xlane.xlu0 %4072 }
0x10c8   : > { %v4091_v36 = vmul.f32 0.03125, %v4073_v51  ;;  %v4070_v57 = vpop.xlane.xlu1 %4069  ;;  %v4242_v51 = vld [vmem:[%s7927_s15] sm:$0xff] }
0x10c9   : > { %v4090_v39 = vmul.f32 0.03125, %v4070_v57 }
0x10ca   : > { %v4099_v12 = vadd.f32 %v4098_v43, %v4091_v36 }
0x10cb   : > { %v4105_v16 = vadd.f32 %v4104_v34, %v4090_v39 }
0x10cc   : > { %v4108_v21 = vmul.f32 0.125, %v4099_v12  ;;  %v4076_v62 = vpop.xlane.xlu1 %4075 }
0x10cd   : > { %v4092_v63 = vmul.f32 0.03125, %v4076_v62 }
0x10ce   : > { %v7937_v55 = vsub.f32 %v7822_v46, %v4108_v21  ;;  %v7940_v0 = vsub.f32 %v7814_v44, %v4108_v21  ;;  %v7948_v2 = vsub.f32 %v7851_v29, %v4108_v21  ;;  %v7962_v47 = vsub.f32 %v7837_v50, %v4108_v21 }
0x10cf   : > { %v4106_v17 = vadd.f32 %v4105_v16, %v4092_v63  ;;  %v7974_v1 = vsub.f32 %v7883_v42, %v4108_v21  ;;  %v7986_v35 = vsub.f32 %v7871_v33, %v4108_v21  ;;  %v7998_v38 = vsub.f32 %v7898_v54, %v4108_v21 }
0x10d0   : > { %v4126_v13 = vmul.f32 %v7937_v55, %v7937_v55  ;;  %v4128_v49 = vmul.f32 %v7940_v0, %v7940_v0  ;;  %v4130_v31 = vmul.f32 %v7948_v2, %v7948_v2  ;;  %v4132_v53 = vmul.f32 %v7962_v47, %v7962_v47  ;;  %v8034_v43 = vpop.permute.xlu1 %4251 }
0x10d1   : > { %v4109_v25 = vmul.f32 0.125, %v4106_v17  ;;  %v4134_v45 = vmul.f32 %v7974_v1, %v7974_v1  ;;  %v4136_v6 = vmul.f32 %v7986_v35, %v7986_v35  ;;  %v4138_v7 = vmul.f32 %v7998_v38, %v7998_v38 }
0x10d2   : > { %v4142_v61 = vsel %vm578_vm0, %v4126_v13, 0.0  ;;  %v4148_v59 = vsel %vm578_vm0, %v4128_v49, 0.0  ;;  %v4154_v60 = vsel %vm578_vm0, %v4130_v31, 0.0  ;;  %v8010_v37 = vsub.f32 %v7907_v30, %v4108_v21 }
0x10d3   : > { %4143 = vadd.xlane.f32.xlu0 %v4142_v61  ;;  %v7951_v46 = vsub.f32 %v7841_v40, %v4109_v25  ;;  %v7954_v44 = vsub.f32 %v7828_v10, %v4109_v25  ;;  %v7968_v10 = vsub.f32 %v7863_v58, %v4109_v25  ;;  %v7980_v26 = vsub.f32 %v7855_v20, %v4109_v25 }
0x10d4   : > { %v4160_v58 = vsel %vm578_vm0, %v4132_v53, 0.0  ;;  %v7992_v24 = vsub.f32 %v7892_v56, %v4109_v25  ;;  %v4166_v20 = vsel %vm578_vm0, %v4134_v45, 0.0  ;;  %v8004_v22 = vsub.f32 %v7879_v48, %v4109_v25  ;;  %v8036_v36 = vpop.permute.xlu1 %4274 }
0x10d5   : > { %v4127_v27 = vmul.f32 %v7951_v46, %v7951_v46  ;;  %v4129_v40 = vmul.f32 %v7954_v44, %v7954_v44  ;;  %v4131_v3 = vmul.f32 %v7968_v10, %v7968_v10  ;;  %v4133_v4 = vmul.f32 %v7980_v26, %v7980_v26 }
0x10d6   : > { %v4135_v28 = vmul.f32 %v7992_v24, %v7992_v24  ;;  %v4172_v56 = vsel %vm578_vm0, %v4136_v6, 0.0  ;;  %v4137_v14 = vmul.f32 %v8004_v22, %v8004_v22  ;;  %v8016_v8 = vsub.f32 %v7911_v5, %v4109_v25 }
0x10d7   : > { %4149 = vadd.xlane.f32.xlu0 %v4148_v59  ;;  %v4145_v29 = vsel %vm578_vm0, %v4127_v27, 0.0  ;;  %v4151_v50 = vsel %vm578_vm0, %v4129_v40, 0.0  ;;  %v4157_v42 = vsel %vm578_vm0, %v4131_v3, 0.0  ;;  %v4163_v33 = vsel %vm578_vm0, %v4133_v4, 0.0 }
0x10d8   : > { %4146 = vadd.xlane.f32.xlu1 %v4145_v29  ;;  %v4169_v54 = vsel %vm578_vm0, %v4135_v28, 0.0  ;;  %v4178_v48 = vsel %vm578_vm0, %v4138_v7, 0.0  ;;  %v4140_v19 = vmul.f32 %v8010_v37, %v8010_v37  ;;  %v4175_v30 = vsel %vm578_vm0, %v4137_v14, 0.0 }
0x10d9   : > { %v4139_v9 = vmul.f32 %v8016_v8, %v8016_v8  ;;  %v8025_v18 = vsub.f32 %v7919_v15, %v4109_v25 }
0x10da   : > { %v4184_v5 = vsel %vm578_vm0, %v4140_v19, 0.0 }
0x10db   : > { %4155 = vadd.xlane.f32.xlu0 %v4154_v60  ;;  %v4181_v52 = vsel %vm578_vm0, %v4139_v9, 0.0  ;;  %v4141_v41 = vmul.f32 %v8025_v18, %v8025_v18 }
0x10dc   : > { %4152 = vadd.xlane.f32.xlu1 %v4151_v50 }
0x10dd   : > { %v4187_v32 = vsel %vm578_vm0, %v4141_v41, 0.0 }
0x10df   : > { %4161 = vadd.xlane.f32.xlu0 %v4160_v58 }
0x10e0   : > { %4158 = vadd.xlane.f32.xlu1 %v4157_v42 }
0x10e3   : > { %4167 = vadd.xlane.f32.xlu0 %v4166_v20 }
0x10e4   : > { %4164 = vadd.xlane.f32.xlu1 %v4163_v33 }
0x10e7   : > { %4173 = vadd.xlane.f32.xlu0 %v4172_v56 }
0x10e8   : > { %4170 = vadd.xlane.f32.xlu1 %v4169_v54 }
0x10eb   : > { %4179 = vadd.xlane.f32.xlu0 %v4178_v48 }
0x10ec   : > { %4176 = vadd.xlane.f32.xlu1 %v4175_v30 }
0x10ef   : > { %4185 = vadd.xlane.f32.xlu0 %v4184_v5 }
0x10f0   : > { %4182 = vadd.xlane.f32.xlu1 %v4181_v52 }
0x10f4   : > { %4188 = vadd.xlane.f32.xlu1 %v4187_v32 }
0x1105   : > { %4279 = vperm.xlu1 %5265, %v4271_v11   ;;  %4246 = vperm.xlu0 %5264, %v4242_v51  }
0x115c   : > { %v4144_v15 = vpop.xlane.xlu0 %4143 }
0x115d   : > { %v4190_v63 = vmul.f32 0.03125, %v4144_v15 }
0x1160   : > { %v4150_v57 = vpop.xlane.xlu0 %4149 }
0x1161   : > { %v4147_v23 = vpop.xlane.xlu1 %4146  ;;  %v4192_v62 = vmul.f32 0.03125, %v4150_v57 }
0x1162   : > { %v4191_v40 = vmul.f32 0.03125, %v4147_v23 }
0x1163   : > { %v4206_v25 = vadd.f32 %v4192_v62, %v4190_v63 }
0x1164   : > { %v4156_v39 = vpop.xlane.xlu0 %4155 }
0x1165   : > { %v4153_v12 = vpop.xlane.xlu1 %4152  ;;  %v4194_v17 = vmul.f32 0.03125, %v4156_v39 }
0x1166   : > { %v4193_v49 = vmul.f32 0.03125, %v4153_v12 }
0x1167   : > { %v4207_v59 = vadd.f32 %v4206_v25, %v4194_v17 }
0x1168   : > { %v4162_v34 = vpop.xlane.xlu0 %4161  ;;  %v4213_v3 = vadd.f32 %v4193_v49, %v4191_v40 }
0x1169   : > { %v4159_v21 = vpop.xlane.xlu1 %4158  ;;  %v4196_v61 = vmul.f32 0.03125, %v4162_v34 }
0x116a   : > { %v4195_v60 = vmul.f32 0.03125, %v4159_v21 }
0x116b   : > { %v4208_v53 = vadd.f32 %v4207_v59, %v4196_v61 }
0x116c   : > { %v4168_v16 = vpop.xlane.xlu0 %4167  ;;  %v4214_v6 = vadd.f32 %v4213_v3, %v4195_v60 }
0x116d   : > { %v4165_v13 = vpop.xlane.xlu1 %4164  ;;  %v4198_v31 = vmul.f32 0.03125, %v4168_v16 }
0x116e   : > { %v4197_v58 = vmul.f32 0.03125, %v4165_v13 }
0x116f   : > { %v4209_v42 = vadd.f32 %v4208_v53, %v4198_v31 }
0x1170   : > { %v4174_v27 = vpop.xlane.xlu0 %4173  ;;  %v4215_v56 = vadd.f32 %v4214_v6, %v4197_v58 }
0x1171   : > { %v4171_v29 = vpop.xlane.xlu1 %4170  ;;  %v4200_v50 = vmul.f32 0.03125, %v4174_v27 }
0x1172   : > { %v4199_v33 = vmul.f32 0.03125, %v4171_v29 }
0x1173   : > { %v4210_v28 = vadd.f32 %v4209_v42, %v4200_v50 }
0x1174   : > { %v4180_v45 = vpop.xlane.xlu0 %4179  ;;  %v4216_v30 = vadd.f32 %v4215_v56, %v4199_v33 }
0x1175   : > { %v4202_v4 = vmul.f32 0.03125, %v4180_v45  ;;  %v4177_v20 = vpop.xlane.xlu1 %4176 }
0x1176   : > { %v4201_v7 = vmul.f32 0.03125, %v4177_v20 }
0x1177   : > { %v4211_v14 = vadd.f32 %v4210_v28, %v4202_v4 }
0x1178   : > { %v4186_v54 = vpop.xlane.xlu0 %4185  ;;  %v4217_v52 = vadd.f32 %v4216_v30, %v4201_v7 }
0x1179   : > { %v4204_v48 = vmul.f32 0.03125, %v4186_v54  ;;  %v4183_v19 = vpop.xlane.xlu1 %4182 }
0x117a   : > { %v4203_v9 = vmul.f32 0.03125, %v4183_v19 }
0x117b   : > { %v4212_v5 = vadd.f32 %v4211_v14, %v4204_v48 }
0x117c   : > { %v4218_v11 = vadd.f32 %v4217_v52, %v4203_v9 }
0x117d   : > { %v4220_v41 = vmul.f32 0.125, %v4212_v5  ;;  %v4189_v32 = vpop.xlane.xlu1 %4188 }
0x117e   : > { %v4205_v51 = vmul.f32 0.03125, %v4189_v32 }
0x117f   : > { %v4222_v15 = vadd.f32 1e-05, %v4220_v41 }
0x1180   : > { %v4219_v57 = vadd.f32 %v4218_v11, %v4205_v51  ;;  %v4247_v34 = vpop.permute.xlu0 %4246 }
0x1181   : > { %5654 = vrsqrt.f32 %v4222_v15  ;;  %v4280_v4 = vpop.permute.xlu1 %4279 }
0x1182   : > { %v4221_v23 = vmul.f32 0.125, %v4219_v57 }
0x1184   : > { %v4223_v39 = vadd.f32 1e-05, %v4221_v23 }
0x1186   : > { %5656 = vrsqrt.f32 %v4223_v39 }
0x118e   : > { %v5655_v12 = vpop.eup %5654 }
0x118f   : > { %v4226_v21 = vmul.f32 %v5655_v12, %v7937_v55  ;;  %v4228_v62 = vmul.f32 %v5655_v12, %v7940_v0  ;;  %v4230_v16 = vmul.f32 %v5655_v12, %v7948_v2  ;;  %v4232_v63 = vmul.f32 %v5655_v12, %v7962_v47 }
0x1190   : > { %v4234_v17 = vmul.f32 %v5655_v12, %v7974_v1  ;;  %v4236_v13 = vmul.f32 %v5655_v12, %v7986_v35  ;;  %v4238_v25 = vmul.f32 %v5655_v12, %v7998_v38  ;;  %v4240_v61 = vmul.f32 %v5655_v12, %v8010_v37 }
0x1191   : > { %v4254_v49 = vmul.f32 %v4247_v34, %v4226_v21  ;;  %v4256_v27 = vmul.f32 %v4247_v34, %v4228_v62  ;;  %v4258_v59 = vmul.f32 %v4247_v34, %v4230_v16  ;;  %v4260_v31 = vmul.f32 %v4247_v34, %v4232_v63 }
0x1192   : > { %v4262_v29 = vmul.f32 %v4247_v34, %v4234_v17  ;;  %v4264_v55 = vmul.f32 %v4247_v34, %v4236_v13  ;;  %v4266_v0 = vmul.f32 %v4247_v34, %v4238_v25  ;;  %v4268_v40 = vmul.f32 %v4247_v34, %v4240_v61 }
0x1193   : > { %v5657_v2 = vpop.eup %5656  ;;  %v4282_v47 = vadd.f32 %v8036_v36, %v4254_v49  ;;  %v4284_v1 = vadd.f32 %v8036_v36, %v4256_v27  ;;  %v4286_v35 = vadd.f32 %v8036_v36, %v4258_v59  ;;  %v4288_v38 = vadd.f32 %v8036_v36, %v4260_v31 }
0x1194   : > { %v4227_v37 = vmul.f32 %v5657_v2, %v7951_v46  ;;  %v4229_v60 = vmul.f32 %v5657_v2, %v7954_v44  ;;  %v4231_v53 = vmul.f32 %v5657_v2, %v7968_v10  ;;  %v4233_v50 = vmul.f32 %v5657_v2, %v7980_v26 }
0x1195   : > { %v4235_v3 = vmul.f32 %v5657_v2, %v7992_v24  ;;  %v4237_v58 = vmul.f32 %v5657_v2, %v8004_v22  ;;  %v4239_v45 = vmul.f32 %v5657_v2, %v8016_v8  ;;  %v4241_v42 = vmul.f32 %v5657_v2, %v8025_v18  ;;  %4298 = vst.msk [vmem:[%s8060_s30] sm:$0xff] %vm578_vm0, %v4282_v47 }
0x1196   : > { %4300 = vst.msk [vmem:[%s8060_s30 + $0x10] sm:$0xff] %vm578_vm0, %v4284_v1  ;;  %4302 = vst.msk [vmem:[%s8060_s30 + $0x20] sm:$0xff] %vm578_vm0, %v4286_v35  ;;  %v4255_v46 = vmul.f32 %v8034_v43, %v4227_v37  ;;  %v4257_v44 = vmul.f32 %v8034_v43, %v4229_v60  ;;  %v4259_v10 = vmul.f32 %v8034_v43, %v4231_v53 }
0x1197   : > { %4304 = vst.msk [vmem:[%s8060_s30 + $0x30] sm:$0xff] %vm578_vm0, %v4288_v38  ;;  %v4261_v26 = vmul.f32 %v8034_v43, %v4233_v50  ;;  %v4263_v24 = vmul.f32 %v8034_v43, %v4235_v3  ;;  %v4265_v22 = vmul.f32 %v8034_v43, %v4237_v58  ;;  %v4267_v8 = vmul.f32 %v8034_v43, %v4239_v45 }
0x1198   : > { %v4269_v18 = vmul.f32 %v8034_v43, %v4241_v42  ;;  %v4283_v20 = vadd.f32 %v4280_v4, %v4255_v46  ;;  %v4285_v6 = vadd.f32 %v4280_v4, %v4257_v44  ;;  %v4287_v33 = vadd.f32 %v4280_v4, %v4259_v10 }
0x1199   : > { %v4289_v28 = vadd.f32 %v4280_v4, %v4261_v26  ;;  %v4291_v56 = vadd.f32 %v4280_v4, %v4263_v24  ;;  %v4293_v7 = vadd.f32 %v4280_v4, %v4265_v22  ;;  %v4295_v54 = vadd.f32 %v4280_v4, %v4267_v8 }
0x119a   : > { %v4297_v14 = vadd.f32 %v4280_v4, %v4269_v18  ;;  %4299 = vst.msk [vmem:[%s8060_s30 + $0x8] sm:$0xff] %vm578_vm0, %v4283_v20  ;;  %4301 = vst.msk [vmem:[%s8060_s30 + $0x18] sm:$0xff] %vm578_vm0, %v4285_v6  ;;  %v4290_v43 = vadd.f32 %v8036_v36, %v4262_v29  ;;  %v4292_v48 = vadd.f32 %v8036_v36, %v4264_v55 }
0x119b   : > { %4303 = vst.msk [vmem:[%s8060_s30 + $0x28] sm:$0xff] %vm578_vm0, %v4287_v33  ;;  %4305 = vst.msk [vmem:[%s8060_s30 + $0x38] sm:$0xff] %vm578_vm0, %v4289_v28  ;;  %v4294_v19 = vadd.f32 %v8036_v36, %v4266_v0  ;;  %v4296_v30 = vadd.f32 %v8036_v36, %v4268_v40 }
0x119c   : > { %4307 = vst.msk [vmem:[%s8060_s30 + $0x48] sm:$0xff] %vm578_vm0, %v4291_v56  ;;  %4309 = vst.msk [vmem:[%s8060_s30 + $0x58] sm:$0xff] %vm578_vm0, %v4293_v7 }
0x119d   : > { %4311 = vst.msk [vmem:[%s8060_s30 + $0x68] sm:$0xff] %vm578_vm0, %v4295_v54  ;;  %4313 = vst.msk [vmem:[%s8060_s30 + $0x78] sm:$0xff] %vm578_vm0, %v4297_v14 }
0x119e   : > { %4306 = vst.msk [vmem:[%s8060_s30 + $0x40] sm:$0xff] %vm578_vm0, %v4290_v43  ;;  %4308 = vst.msk [vmem:[%s8060_s30 + $0x50] sm:$0xff] %vm578_vm0, %v4292_v48 }
0x119f   : > { %4310 = vst.msk [vmem:[%s8060_s30 + $0x60] sm:$0xff] %vm578_vm0, %v4294_v19  ;;  %4312 = vst.msk [vmem:[%s8060_s30 + $0x70] sm:$0xff] %vm578_vm0, %v4296_v30 }
0x11a0   : > { %s4579_s25 = sshll.u32 %s5831_s29, 8  ;;  %s4338_s18 = sshll.u32 %s8060_s30, 4  ;;  %s4339_s18 = int_to_ptr.vmem [resolvable:$true] %s4338_s18 }
0x11a1   : > { %s8248_s21 = sld [smem:[#allocation42_spill]]  ;;  %s5733_s19 = smov 256  }
0x11a2   : > { %5193 = sst [smem:[#allocation9]] (%p5858_p9), %s5733_s19  ;;  %s5734_s13 = smov 512  }
0x11a3   : > { %5194 = sst [smem:[#allocation9 + $0x1]] (%p5858_p9), %s5734_s13  ;;  %s5735_s15 = smov 2  }
0x11a4   : > { %5195 = sst [smem:[#allocation9 + $0x2]] (%p5858_p9), %s5735_s15  ;;  %s5736_s23 = smov 128  }
0x11a5   : > { %5196 = sst [smem:[#allocation9 + $0x3]] (%p5858_p9), %s5736_s23  ;;  %s5737_s29 = smov 8  }
0x11a6   : > { %5197 = sst [smem:[#allocation9 + $0x4]] (%p5858_p9), %s5736_s23  ;;  %s5738_s24 = smov 131072  }
0x11a7   : > { %s4327_s22 = scalar_lea.hbm %s8248_s21, %s4579_s25  ;;  %5198 = sst [smem:[#allocation9 + $0x5]] (%p5858_p9), %s5737_s29 }
0x11a8   : > { %s5739_s14 = smov 0  }
0x11a9   : > { %5199 = dma.general (%p5858_p9), %s4339_s18, 2048, %s4327_s22, %s4315_s12, %s5738_s24, [#allocation9], %s5739_s14, 0  }
0x11aa PF: > { %s8249_s17 = sld [smem:[#allocation13_spill]]  ;;  %p5202_p2 = pnand %p4450_p11, %p5862_p10 }
0x11ac   : > { %p5203_p3 = pneg %p5202_p2 }
0x11b0   : > { %s4366_s25 = sand.u32 1, %s8249_s17  }
0x11b1   : > { %s4367_s20 = scalar_lea.sflag [#allocation4], %s4366_s25 }
0x11b2   : > { %5695 = dma.done.wait (%p5203_p3), %s4367_s20, 2048  }
0x11b3   : > { %5697 = vsyncadd (%p5203_p3), %s4367_s20, 4294965248  ;;  %s8251_s28 = sld [smem:[#allocation15_spill]]  ;;  %s8254_s25 = smov %s5704_s26 }
0x11b4   : > { %s8252_s27 = sld [smem:[#allocation14_spill]] }
0x11b5   : > { %s8253_s21 = sld [smem:[#allocation16_spill]] }
0x11b9   : > { %p26_p4 = scmp.ge.s32.totalorder %s8251_s28, 4  }
0x11ba   : > { %s8255_s26 = smov %s8252_s27 }
0x11bb   : > { %s8256_s27 = smov %s8253_s21  ;;  %28 = sbr.rel (!%p26_p4) target bundleno = 8 (0x8), region = 136 }
0x11c0   :  { %4372 = vsyncpa [#allocation3], 1 }
0x11c1   :  { %4374 = vsyncpa [#allocation3 + $0x1], 1 }
0x11c2   :  { %4375 = vsyncpa [#allocation4], 1 }
0x11c3   :  { %4377 = vsyncpa [#allocation4 + $0x1], 1 }

</bundles_post_ra>
